<compile_context>
chip_gen: v6e
topology: v6e:2x2x1
jax: 0.10.0
libtpu: 0.0.40
codegen_flags: <defaults>
</compile_context>

<pallas_src>
import functools

import jax
import jax.numpy as jnp
from jax.experimental import pallas as pl
from jax.experimental.pallas import tpu as pltpu

# VMEM budget: largest per-call working sets are fc1 (two double-buffered
# 13.9 MB bf16 weight blocks ~= 28 MB) and conv2 (~22 MB incl. the im2col
# scratch).  44 MiB fits every call, stays well inside v7x's 64 MiB/TC with
# headroom for compiler scratch, and is far below v5e/v6e's 128 MiB.
_VMEM_LIMIT = 44 * 1024 * 1024

# fc1 tiling: K = 67840 = 10 * 6784 (6784 = 53*128 keeps lane alignment of the
# activation block); Nout = 2003 padded to 2048 = 2 * 1024 "parallel" tiles.
FC1_BLOCK_K = 6784
FC1_BLOCK_N = 1024


# ----------------------------------------------------------------------------
# Conv (1, K) + bias + ReLU kernel: one batch element per grid step.
# ----------------------------------------------------------------------------
def _conv_relu_kernel(x_ref, w_ref, b_ref, o_ref, col_ref, *, ktaps, c_in, w_out):
    # x_ref:   (C_in, W_in)      bf16  (one batch element)
    # w_ref:   (C_out, K*C_in)   bf16  (row index = t*C_in + ci, tap-major)
    # b_ref:   (C_out, 1)        f32
    # o_ref:   (C_out, W_out)    bf16
    # col_ref: (K*C_in, W_out)   bf16  im2col scratch
    #
    # Build the im2col buffer once (pays the lane-shift cost a single time),
    # then do ONE MXU contraction over K*C_in instead of 8 accumulator
    # round-trips through VMEM.
    for t in range(ktaps):  # static unrolled loop over the filter taps
        col_ref[pl.ds(t * c_in, c_in), :] = x_ref[:, pl.ds(t, w_out)]
    y = jnp.dot(w_ref[...], col_ref[...], preferred_element_type=jnp.float32)
    o_ref[...] = jnp.maximum(y + b_ref[...], 0.0).astype(o_ref.dtype)


def conv1d_relu(x, p):
    """x: (N, C_in, W_in) bf16; p: prepared conv params.  Valid conv + ReLU."""
    wmat, b2d = p["w"], p["b"]
    c_in, ktaps = p["c_in"], p["k"]
    n, _, w_in = x.shape
    c_out = wmat.shape[0]
    w_out = w_in - ktaps + 1
    kernel = functools.partial(
        _conv_relu_kernel, ktaps=ktaps, c_in=c_in, w_out=w_out
    )
    return pl.pallas_call(
        kernel,
        out_shape=jax.ShapeDtypeStruct((n, c_out, w_out), jnp.bfloat16),
        grid_spec=pltpu.PrefetchScalarGridSpec(
            num_scalar_prefetch=0,
            grid=(n,),
            in_specs=[
                pl.BlockSpec((None, c_in, w_in), lambda i: (i, 0, 0)),
                # Constant index_map: Mosaic keeps the weight/bias blocks
                # resident across the batch grid (no per-step re-fetch).
                pl.BlockSpec((c_out, ktaps * c_in), lambda i: (0, 0)),
                pl.BlockSpec((c_out, 1), lambda i: (0, 0)),
            ],
            out_specs=pl.BlockSpec((None, c_out, w_out), lambda i: (i, 0, 0)),
            scratch_shapes=[pltpu.VMEM((ktaps * c_in, w_out), jnp.bfloat16)],
        ),
        compiler_params=pltpu.CompilerParams(
            dimension_semantics=("parallel",),
            vmem_limit_bytes=_VMEM_LIMIT,
        ),
    )(x, wmat, b2d)


# ----------------------------------------------------------------------------
# Linear (matmul) kernel: grid = (Nout tiles "parallel", K tiles "arbitrary"),
# f32 VMEM accumulator, fused bias + activation.
# ----------------------------------------------------------------------------
def _linear_kernel(x_ref, w_ref, b_ref, o_ref, acc_ref, *, activation):
    k = pl.program_id(1)

    @pl.when(k == 0)
    def _():
        acc_ref[...] = jnp.zeros_like(acc_ref)

    acc_ref[...] += jnp.dot(
        x_ref[...], w_ref[...], preferred_element_type=jnp.float32
    )

    @pl.when(k == pl.num_programs(1) - 1)
    def _():
        y = acc_ref[...] + b_ref[...]
        if activation == "relu":
            y = jnp.maximum(y, 0.0)
        elif activation == "sigmoid":
            y = jax.nn.sigmoid(y)
        o_ref[...] = y.astype(o_ref.dtype)


def linear(x, p, *, activation=None, block_k=None, out_dtype=jnp.float32):
    """x: (M, K); p: prepared fc params (bf16 weights padded to a block_n multiple)."""
    w, b2d, nout, block_n = p["w"], p["b"], p["nout"], p["block_n"]
    m, kdim = x.shape
    n_pad = w.shape[1]
    if block_k is None:
        block_k = kdim
    assert kdim % block_k == 0
    ksteps = kdim // block_k
    nsteps = n_pad // block_n
    kernel = functools.partial(_linear_kernel, activation=activation)
    out = pl.pallas_call(
        kernel,
        out_shape=jax.ShapeDtypeStruct((m, n_pad), out_dtype),
        grid_spec=pltpu.PrefetchScalarGridSpec(
            num_scalar_prefetch=0,
            grid=(nsteps, ksteps),  # (parallel Nout tiles, K reduction last)
            in_specs=[
                pl.BlockSpec((m, block_k), lambda j, k: (0, k)),
                pl.BlockSpec((block_k, block_n), lambda j, k: (k, j)),
                pl.BlockSpec((1, block_n), lambda j, k: (0, j)),
            ],
            out_specs=pl.BlockSpec((m, block_n), lambda j, k: (0, j)),
            scratch_shapes=[pltpu.VMEM((m, block_n), jnp.float32)],
        ),
        compiler_params=pltpu.CompilerParams(
            dimension_semantics=("parallel", "arbitrary"),
            vmem_limit_bytes=_VMEM_LIMIT,
        ),
    )(x.astype(jnp.bfloat16), w, b2d)
    return out[:, :nout] if n_pad != nout else out


# ----------------------------------------------------------------------------
# MaxPool2d((1, 4), (1, 4)) -> cheap 4:1 reduce on bf16, kept as plain JAX glue.
# TODO(synk): fuse the 4:1 max-pool into the conv2/conv4 epilogues (needs
# lane-strided reads in-kernel); bf16 activations already halve its HBM cost.
# ----------------------------------------------------------------------------
def maxpool_w4(x):
    n, c, w = x.shape
    w4 = w // 4  # PyTorch MaxPool2d floors (drops the trailing remainder)
    return jnp.max(x[:, :, : w4 * 4].reshape(n, c, w4, 4), axis=-1)


# ----------------------------------------------------------------------------
# Deterministic parameter init (synthetic; shapes from Beluga.__init__).
# ----------------------------------------------------------------------------
def init_params(key):
    def conv_p(k, c_out, c_in, kw):
        k1, k2 = jax.random.split(k)
        w = jax.random.normal(k1, (c_out, c_in, kw), jnp.float32) / jnp.sqrt(
            float(c_in * kw)
        )
        b = 0.01 * jax.random.normal(k2, (c_out,), jnp.float32)
        return w, b

    def lin_p(k, n_in, n_out):
        k1, k2 = jax.random.split(k)
        w = jax.random.normal(k1, (n_in, n_out), jnp.float32) / jnp.sqrt(float(n_in))
        b = 0.01 * jax.random.normal(k2, (n_out,), jnp.float32)
        return w, b

    keys = jax.random.split(key, 8)
    return {
        "conv1": conv_p(keys[0], 320, 4, 8),
        "conv2": conv_p(keys[1], 320, 320, 8),
        "conv3": conv_p(keys[2], 480, 320, 8),
        "conv4": conv_p(keys[3], 480, 480, 8),
        "conv5": conv_p(keys[4], 640, 480, 8),
        "conv6": conv_p(keys[5], 640, 640, 8),
        "fc1": lin_p(keys[6], 67840, 2003),
        "fc2": lin_p(keys[7], 2003, 2002),
    }


# ----------------------------------------------------------------------------
# One-time inference-layout transform: bf16 MXU weights, tap-major conv weight
# matrices matching the in-kernel im2col row order, fc weights padded to the
# Nout tile size.  Do this once, outside the hot path.
# ----------------------------------------------------------------------------
def prepare_params(params):
    pp = {}
    for name in ("conv1", "conv2", "conv3", "conv4", "conv5", "conv6"):
        w, b = params[name]
        c_out, c_in, k = w.shape
        # wmat[co, t*C_in + ci] == w[co, ci, t]  (matches im2col row order)
        wmat = jnp.transpose(w, (0, 2, 1)).reshape(c_out, k * c_in)
        pp[name] = {
            "w": wmat.astype(jnp.bfloat16),
            "b": b.reshape(c_out, 1).astype(jnp.float32),
            "c_in": c_in,
            "k": k,
        }

    def prep_fc(name, block_n):
        w, b = params[name]
        _, nout = w.shape
        n_pad = pl.cdiv(nout, block_n) * block_n
        wq = w.astype(jnp.bfloat16)
        bq = b.astype(jnp.float32).reshape(1, nout)
        if n_pad != nout:
            wq = jnp.pad(wq, ((0, 0), (0, n_pad - nout)))
            bq = jnp.pad(bq, ((0, 0), (0, n_pad - nout)))
        return {"w": wq, "b": bq, "nout": nout, "block_n": block_n}

    pp["fc1"] = prep_fc("fc1", FC1_BLOCK_N)  # 2003 -> 2 x 1024 parallel tiles
    pp["fc2"] = prep_fc("fc2", 2002)         # small: single full-width block
    return pp


# ----------------------------------------------------------------------------
# Full forward pass (inference: Dropout == identity).
# ----------------------------------------------------------------------------
def beluga_forward(pp, x_nchw):
    # x_nchw: (N, 4, 1, 2000), PyTorch NCHW with singleton H.
    x = jnp.squeeze(x_nchw, axis=2).astype(jnp.bfloat16)       # (N, 4, 2000)
    x = conv1d_relu(x, pp["conv1"])                             # (N, 320, 1993)
    x = conv1d_relu(x, pp["conv2"])                             # (N, 320, 1986)
    x = maxpool_w4(x)                                           # (N, 320, 496)
    x = conv1d_relu(x, pp["conv3"])                             # (N, 480, 489)
    x = conv1d_relu(x, pp["conv4"])                             # (N, 480, 482)
    x = maxpool_w4(x)                                           # (N, 480, 120)
    x = conv1d_relu(x, pp["conv5"])                             # (N, 640, 113)
    x = conv1d_relu(x, pp["conv6"])                             # (N, 640, 106)
    n = x.shape[0]
    # Matches torch .view(N, -1): layout is (C, W) row-major -> 640*106 = 67840.
    x = x.reshape(n, 640 * 106)
    x = linear(x, pp["fc1"], activation="relu",
               block_k=FC1_BLOCK_K, out_dtype=jnp.bfloat16)     # (N, 2003)
    x = linear(x, pp["fc2"], activation="sigmoid",
               out_dtype=jnp.float32)                           # (N, 2002)
    return x


if __name__ == "__main__":
    key = jax.random.PRNGKey(0)
    pkey, xkey = jax.random.split(key)
    params = init_params(pkey)
    pp = prepare_params(params)
    # Small batch; seq length 2000 / channel widths are dictated by the model
    # (flatten must produce 67840 = 640 * 106 features).
    x = jax.random.normal(xkey, (2, 4, 1, 2000), jnp.float32)
    out = beluga_forward(pp, x)
    out = jax.block_until_ready(out)
    assert out.shape == (2, 2002), out.shape
    assert out.dtype == jnp.float32
    assert bool(jnp.all(jnp.isfinite(out)))
    assert bool(jnp.all((out >= 0.0) & (out <= 1.0)))  # sigmoid range
    print("KERNEL_OK")
</pallas_src>

<mosaic_0001>
module attributes {stable_mosaic.version = 11 : i64} {
  func.func @_conv_relu_kernel(%arg0: i32, %arg1: memref<1x4x2000xbf16, #tpu.memory_space<vmem>>, %arg2: memref<320x32xbf16, #tpu.memory_space<vmem>>, %arg3: memref<320x1xf32, #tpu.memory_space<vmem>>, %arg4: memref<1x320x1993xbf16, #tpu.memory_space<vmem>>, %arg5: memref<32x1993xbf16, #tpu.memory_space<vmem>>) attributes {dimension_semantics = [#tpu.dimension_semantics<parallel>], iteration_bounds = array<i64: 2>, scalar_prefetch = 0 : i64, scratch_operands = 1 : i64, tpu.core_type = #tpu.core_type<tc>, window_params = [{transform_indices = @transform_0, window_bounds = array<i64: 1, 4, 2000>}, {pipeline_mode = #tpu.pipeline_mode<synchronous>, transform_indices = @transform_1, window_bounds = array<i64: 320, 32>}, {pipeline_mode = #tpu.pipeline_mode<synchronous>, transform_indices = @transform_2, window_bounds = array<i64: 320, 1>}, {transform_indices = @transform_3, window_bounds = array<i64: 1, 320, 1993>}]} {
    %c0 = arith.constant 0 : index
    %c0_0 = arith.constant 0 : index
    %c0_1 = arith.constant 0 : index
    %0 = vector.load %arg1[%c0, %c0_0, %c0_1] : memref<1x4x2000xbf16, #tpu.memory_space<vmem>>, vector<1x4x1993xbf16>
    %1 = vector.shape_cast %0 : vector<1x4x1993xbf16> to vector<4x1993xbf16>
    %c0_2 = arith.constant 0 : index
    %c0_3 = arith.constant 0 : index
    %2 = vector.load %arg5[%c0_2, %c0_3] : memref<32x1993xbf16, #tpu.memory_space<vmem>>, vector<4x1993xbf16>
    tpu.vector_store %arg5[%c0_2, %c0_3], %1 {strides = array<i32>} : memref<32x1993xbf16, #tpu.memory_space<vmem>>, vector<4x1993xbf16>,
    %c0_4 = arith.constant 0 : index
    %c0_5 = arith.constant 0 : index
    %c1 = arith.constant 1 : index
    %3 = vector.load %arg1[%c0_4, %c0_5, %c1] : memref<1x4x2000xbf16, #tpu.memory_space<vmem>>, vector<1x4x1993xbf16>
    %4 = vector.shape_cast %3 : vector<1x4x1993xbf16> to vector<4x1993xbf16>
    %c4 = arith.constant 4 : index
    %c0_6 = arith.constant 0 : index
    %5 = vector.load %arg5[%c4, %c0_6] : memref<32x1993xbf16, #tpu.memory_space<vmem>>, vector<4x1993xbf16>
    tpu.vector_store %arg5[%c4, %c0_6], %4 {strides = array<i32>} : memref<32x1993xbf16, #tpu.memory_space<vmem>>, vector<4x1993xbf16>,
    %c0_7 = arith.constant 0 : index
    %c0_8 = arith.constant 0 : index
    %c2 = arith.constant 2 : index
    %6 = vector.load %arg1[%c0_7, %c0_8, %c2] : memref<1x4x2000xbf16, #tpu.memory_space<vmem>>, vector<1x4x1993xbf16>
    %7 = vector.shape_cast %6 : vector<1x4x1993xbf16> to vector<4x1993xbf16>
    %c8 = arith.constant 8 : index
    %c0_9 = arith.constant 0 : index
    %8 = vector.load %arg5[%c8, %c0_9] : memref<32x1993xbf16, #tpu.memory_space<vmem>>, vector<4x1993xbf16>
    tpu.vector_store %arg5[%c8, %c0_9], %7 {strides = array<i32>} : memref<32x1993xbf16, #tpu.memory_space<vmem>>, vector<4x1993xbf16>,
    %c0_10 = arith.constant 0 : index
    %c0_11 = arith.constant 0 : index
    %c3 = arith.constant 3 : index
    %9 = vector.load %arg1[%c0_10, %c0_11, %c3] : memref<1x4x2000xbf16, #tpu.memory_space<vmem>>, vector<1x4x1993xbf16>
    %10 = vector.shape_cast %9 : vector<1x4x1993xbf16> to vector<4x1993xbf16>
    %c12 = arith.constant 12 : index
    %c0_12 = arith.constant 0 : index
    %11 = vector.load %arg5[%c12, %c0_12] : memref<32x1993xbf16, #tpu.memory_space<vmem>>, vector<4x1993xbf16>
    tpu.vector_store %arg5[%c12, %c0_12], %10 {strides = array<i32>} : memref<32x1993xbf16, #tpu.memory_space<vmem>>, vector<4x1993xbf16>,
    %c0_13 = arith.constant 0 : index
    %c0_14 = arith.constant 0 : index
    %c4_15 = arith.constant 4 : index
    %12 = vector.load %arg1[%c0_13, %c0_14, %c4_15] : memref<1x4x2000xbf16, #tpu.memory_space<vmem>>, vector<1x4x1993xbf16>
    %13 = vector.shape_cast %12 : vector<1x4x1993xbf16> to vector<4x1993xbf16>
    %c16 = arith.constant 16 : index
    %c0_16 = arith.constant 0 : index
    %14 = vector.load %arg5[%c16, %c0_16] : memref<32x1993xbf16, #tpu.memory_space<vmem>>, vector<4x1993xbf16>
    tpu.vector_store %arg5[%c16, %c0_16], %13 {strides = array<i32>} : memref<32x1993xbf16, #tpu.memory_space<vmem>>, vector<4x1993xbf16>,
    %c0_17 = arith.constant 0 : index
    %c0_18 = arith.constant 0 : index
    %c5 = arith.constant 5 : index
    %15 = vector.load %arg1[%c0_17, %c0_18, %c5] : memref<1x4x2000xbf16, #tpu.memory_space<vmem>>, vector<1x4x1993xbf16>
    %16 = vector.shape_cast %15 : vector<1x4x1993xbf16> to vector<4x1993xbf16>
    %c20 = arith.constant 20 : index
    %c0_19 = arith.constant 0 : index
    %17 = vector.load %arg5[%c20, %c0_19] : memref<32x1993xbf16, #tpu.memory_space<vmem>>, vector<4x1993xbf16>
    tpu.vector_store %arg5[%c20, %c0_19], %16 {strides = array<i32>} : memref<32x1993xbf16, #tpu.memory_space<vmem>>, vector<4x1993xbf16>,
    %c0_20 = arith.constant 0 : index
    %c0_21 = arith.constant 0 : index
    %c6 = arith.constant 6 : index
    %18 = vector.load %arg1[%c0_20, %c0_21, %c6] : memref<1x4x2000xbf16, #tpu.memory_space<vmem>>, vector<1x4x1993xbf16>
    %19 = vector.shape_cast %18 : vector<1x4x1993xbf16> to vector<4x1993xbf16>
    %c24 = arith.constant 24 : index
    %c0_22 = arith.constant 0 : index
    %20 = vector.load %arg5[%c24, %c0_22] : memref<32x1993xbf16, #tpu.memory_space<vmem>>, vector<4x1993xbf16>
    tpu.vector_store %arg5[%c24, %c0_22], %19 {strides = array<i32>} : memref<32x1993xbf16, #tpu.memory_space<vmem>>, vector<4x1993xbf16>,
    %c0_23 = arith.constant 0 : index
    %c0_24 = arith.constant 0 : index
    %c7 = arith.constant 7 : index
    %21 = vector.load %arg1[%c0_23, %c0_24, %c7] : memref<1x4x2000xbf16, #tpu.memory_space<vmem>>, vector<1x4x1993xbf16>
    %22 = vector.shape_cast %21 : vector<1x4x1993xbf16> to vector<4x1993xbf16>
    %c28 = arith.constant 28 : index
    %c0_25 = arith.constant 0 : index
    %23 = vector.load %arg5[%c28, %c0_25] : memref<32x1993xbf16, #tpu.memory_space<vmem>>, vector<4x1993xbf16>
    tpu.vector_store %arg5[%c28, %c0_25], %22 {strides = array<i32>} : memref<32x1993xbf16, #tpu.memory_space<vmem>>, vector<4x1993xbf16>,
    %c0_26 = arith.constant 0 : index
    %c0_27 = arith.constant 0 : index
    %24 = vector.load %arg2[%c0_26, %c0_27] : memref<320x32xbf16, #tpu.memory_space<vmem>>, vector<320x32xbf16>
    %c0_28 = arith.constant 0 : index
    %c0_29 = arith.constant 0 : index
    %25 = vector.load %arg5[%c0_28, %c0_29] : memref<32x1993xbf16, #tpu.memory_space<vmem>>, vector<32x1993xbf16>
    %cst = arith.constant dense<0.000000e+00> : vector<320x1993xf32>
    %26 = tpu.matmul %24, %25, %cst {dimension_numbers = #tpu.dot_dimension_numbers<[1], [0], [0], [1], [0, 0, 1, 1], [], []>} : vector<320x32xbf16>, vector<32x1993xbf16>, vector<320x1993xf32> -> vector<320x1993xf32>
    %c0_30 = arith.constant 0 : index
    %c0_31 = arith.constant 0 : index
    %27 = vector.load %arg3[%c0_30, %c0_31] : memref<320x1xf32, #tpu.memory_space<vmem>>, vector<320x1xf32>
    %28 = vector.broadcast %27 : vector<320x1xf32> to vector<320x1993xf32>
    %29 = arith.addf %26, %28 : vector<320x1993xf32>
    %cst_32 = arith.constant 0.000000e+00 : f32
    %30 = vector.broadcast %cst_32 : f32 to vector<320x1993xf32>
    %31 = arith.maximumf %29, %30 : vector<320x1993xf32>
    %32 = arith.truncf %31 : vector<320x1993xf32> to vector<320x1993xbf16>
    %c0_33 = arith.constant 0 : index
    %c0_34 = arith.constant 0 : index
    %c0_35 = arith.constant 0 : index
    %33 = vector.load %arg4[%c0_33, %c0_34, %c0_35] : memref<1x320x1993xbf16, #tpu.memory_space<vmem>>, vector<1x320x1993xbf16>
    %34 = vector.shape_cast %33 : vector<1x320x1993xbf16> to vector<320x1993xbf16>
    %35 = vector.shape_cast %32 : vector<320x1993xbf16> to vector<1x320x1993xbf16>
    tpu.vector_store %arg4[%c0_33, %c0_34, %c0_35], %35 {strides = array<i32>} : memref<1x320x1993xbf16, #tpu.memory_space<vmem>>, vector<1x320x1993xbf16>,
    return
  }
  func.func @transform_0(%arg0: i32) -> (i32, i32, i32) {
    %c0_i32 = arith.constant 0 : i32
    %c0_i32_0 = arith.constant 0 : i32
    %c0_i32_1 = arith.constant 0 : i32
    return %arg0, %c0_i32, %c0_i32_0 : i32, i32, i32
  }
  func.func @transform_1(%arg0: i32) -> (i32, i32) {
    %c0_i32 = arith.constant 0 : i32
    %c0_i32_0 = arith.constant 0 : i32
    %c0_i32_1 = arith.constant 0 : i32
    return %c0_i32, %c0_i32_0 : i32, i32
  }
  func.func @transform_2(%arg0: i32) -> (i32, i32) {
    %c0_i32 = arith.constant 0 : i32
    %c0_i32_0 = arith.constant 0 : i32
    %c0_i32_1 = arith.constant 0 : i32
    return %c0_i32, %c0_i32_0 : i32, i32
  }
  func.func @transform_3(%arg0: i32) -> (i32, i32, i32) {
    %c0_i32 = arith.constant 0 : i32
    %c0_i32_0 = arith.constant 0 : i32
    %c0_i32_1 = arith.constant 0 : i32
    return %arg0, %c0_i32, %c0_i32_0 : i32, i32, i32
  }
}

</mosaic_0001>

<bundles_post_ra>
// kernel: tpu_custom_call.1
= control target key start
LH: loop header
LB: loop body
LE: loop exit
PB: predicated region body
PF: predicated region fallthrough
CT: control target
= control target key end

     0   :  { %8 = vsyncpa [#allocation4], 0  ;;  %s10212_s0 = inlined_call_operand.hbm [shape: bf16[2,4,2000], index: 0, kind: input, shape index: {}]   ;;  %s10213_s1 = inlined_call_operand.vmem [shape: bf16[320,32], index: 1, kind: input, shape index: {}]   ;;  %s10214_s2 = inlined_call_operand.vmem [shape: f32[320,1], index: 2, kind: input, shape index: {}]   ;;  %s10215_s3 = inlined_call_operand.hbm [shape: bf16[2,320,1993], index: 3, kind: output, shape index: {}]  }
   0x1   :  { %10 = vsyncpa [#allocation4 + $0x1], 0 }
   0x2   :  { %11 = vsyncpa [#allocation5], 0 }
   0x3   :  { %13 = vsyncpa [#allocation5 + $0x1], 0  ;;  %s7743_s12 = smov 0   ;;  %s7745_s13 = smov 0  }
   0x4   :  { %s7747_s14 = smov 0   ;;  %s7749_s15 = smov 0  }
   0x5 LB: > { %s7764_s16 = sadd.s32 4294967295, %s7708_s15   ;;  %s6614_s17 = sadd.s32 4294967294, %s7708_s15   ;;  %s7708_s15 = sphi %s7749_s15, %s10238_s15   ;;  %s7704_s14 = sphi %s7747_s14, %s10237_s14   ;;  %s7700_s13 = sphi %s7745_s13, %s10236_s13   ;;  %s7696_s12 = sphi %s7743_s12, %s10235_s12  }
   0x6   : > { %s7768_s18 = sadd.s32 1, %s7708_s15   ;;  %s26_s19 = sadd.s32 1, %s7704_s14 }
   0x7   : > { %s23_s20 = ssub.s32 %s7708_s15, %s7768_s18  ;;  %p33_p0 = scmp.ne.s32.totalorder %s7704_s14, %s7700_s13 }
   0x8   : > { %p24_p1 = scmp.eq.s32.totalorder %s23_s20, 0  ;;  %p34_p2 = scmp.eq.s32.totalorder %s7708_s15, 0 }
   0x9   : > { %p39_p3 = scmp.ne.s32.totalorder %s7700_s13, %s7696_s12  ;;  %p40_p4 = scmp.eq.s32.totalorder %s7764_s16, 0 }
   0xa   : > { %s7780_s21 = scalar_select %p24_p1, %s7704_s14, %s26_s19  }
   0xb   : > { %p7782_p5 = por %p34_p2, %p33_p0  ;;  %p7786_p6 = por %p40_p4, %p39_p3 }
   0xc   : > { %p105_p7 = scmp.eq.s32.totalorder %s7764_s16, 1  ;;  %p111_p8 = scmp.eq.s32.totalorder %s6614_s17, 1 }
   0xd   : > { %s10219_s23 = scalar_select %p7786_p6, 1, 0 }
   0xe   : > { %p7499_p10 = scmp.lt.s32.totalorder %s7708_s15, 2  ;;  %p7793_p11 = por %p105_p7, %p33_p0 }
   0xf   : > { %p7797_p12 = por %p111_p8, %p39_p3  ;;  %s137_s26 = sand.u32 1, %s7704_s14  }
  0x10   : > { %s10220_s24 = scalar_select %p7793_p11, 1, 0 }
  0x11   : > { %s10221_s25 = scalar_select %p7797_p12, 1, 0 }
  0x12   : > { %s7164_s27 = sshll.u32 %s7708_s15, 9  ;;  %s6617_s28 = sshll.u32 %s137_s26, 5 }
  0x13   : > { %s7806_s4 = scalar_lea.hbm %s10212_s0, %s7164_s27  ;;  %s141_s5 = scalar_lea.vmem [#allocation3], %s6617_s28 }
  0x14   : > { %s149_s6 = sshll.u32 %s141_s5, 4  ;;  %p7810_p13 = pnand %p7499_p10, %p7782_p5  ;;  %s7814_s6 = int_to_ptr.vmem [resolvable:$true] %s149_s6 }
  0x15   : > { %s138_s8 = scalar_lea.sflag [#allocation4], %s137_s26  ;;  %s7616_s9 = scalar_lea.hbm %s7806_s4, 512 }
  0x16   : > { %p7617_p2 = scmp.ne.s32.totalorder %s7806_s4, %s7616_s9  ;;  %p7618_p3 = pneg %p7810_p13 }
  0x17   : > { %s7621_s17 = scalar_lea.hbm %s10212_s0, 1024  ;;  %p7622_p5 = scmp.lt.s32.totalorder %s7806_s4, %s10212_s0 }
  0x18   : > { %p7619_p4 = pnand %p7618_p3, %p7617_p2  ;;  %p7623_p8 = scmp.lt.s32.totalorder %s7621_s17, %s7616_s9 }
  0x1a   : > { %p7620_p7 = pneg %p7619_p4  ;;  %p7624_p10 = por %p7623_p8, %p7622_p5 }
  0x1c   : > { %p7625_p9 = pnand %p7624_p10, %p7620_p7 }
  0x1e   : > { %7628 = shalt.err (!%p7625_p9)
}
  0x1f   : > { %s7629_s22 = scalar_lea.vmem %s7814_s6, 512  ;;  %s7710_s26 = smov [#allocation3]  }
  0x20   : > { %p7630_p0 = scmp.ne.s32.totalorder %s7814_s6, %s7629_s22  ;;  %s7634_s27 = sshll.u32 %s7710_s26, 4  ;;  %s7635_s27 = int_to_ptr.vmem [resolvable:$false] %s7634_s27 }
  0x21   : > { %s7636_s28 = scalar_lea.vmem %s7635_s27, 1024  ;;  %p7637_p4 = scmp.lt.s32.totalorder %s7814_s6, %s7635_s27 }
  0x22   : > { %p7632_p1 = pnand %p7630_p0, %p7618_p3  ;;  %p7638_p12 = scmp.lt.s32.totalorder %s7636_s28, %s7629_s22 }
  0x24   : > { %p7633_p2 = pneg %p7632_p1  ;;  %p7639_p11 = por %p7638_p12, %p7637_p4 }
  0x26   : > { %p7640_p6 = pnand %p7639_p11, %p7633_p2 }
  0x28   : > { %7643 = shalt.err (!%p7640_p6)
}
  0x29   : > { %7494 = dma.hbm_to_vmem [thread:$0]  (!%p7810_p13), %s7806_s4, 512, %s7814_s6, %s138_s8  }
  0x2a   : > { %p10223_p9 = scmp.lt.s32.totalorder %s7708_s15, 3  ;;  %p10224_p7 = scmp.ge.s32.totalorder %s7708_s15, 1 }
  0x2c   : > { %p155_p0 = pnand %p10224_p7, %p10223_p9 }
  0x2d   : > { %s7841_s29 = sand.u32 (!%p155_p0), 1, %s7700_s13   ;;  %p10225_p6 = scmp.ne.s32.totalorder (!%p155_p0), %s10219_s23, 0 }
  0x2e   : > { %158 = sbr.rel (%p155_p0) target bundleno = 1085 (0x43d), region = 32  ;;  %s6621_s30 = sshll.u32 (!%p155_p0), %s7841_s29, 5 }
  0x2f   : > { %s161_s5 = scalar_lea.sflag (!%p155_p0), [#allocation4], %s7841_s29  ;;  %s7845_s9 = scalar_lea.vmem (!%p155_p0), [#allocation3], %s6621_s30 }
  0x33   : > { %7687 = dma.done.wait (%p10225_p6), %s161_s5, 512  }
  0x34   : > { %7689 = vsyncadd (%p10225_p6), %s161_s5, 4294966784  ;;  %v252_v0 = vlaneseq  ;;  %v7711_v1 = vmov 1983009808   ;;  %v652_v6 = vld [vmem:[%s7845_s9 + $0x8] sm:$0xff]  ;;  %v651_v7 = vld [vmem:[%s7845_s9] sm:$0xff]  ;;  %s7712_s23 = smov 124  }
  0x35   : > { %v250_v2 = vunpack.c.l.s4 %v7711_v1  ;;  %v674_v9 = vcombine.high %v652_v6, %v652_v6  ;;  %v659_v11 = vcombine.high %v651_v7, %v651_v7  ;;  %6622 = vst.sshfl [vmem:[#allocation2] sm:$0xf pattern:$0x76325410] %v651_v7  ;;  %v783_v12 = vcombine.low %v651_v7, %v651_v7  ;;  %s7713_s4 = smov 123   ;;  %s7714_s6 = smov 122  }
  0x36   : > { %v253_v3 = vshrl.u32 %v252_v0, 7  ;;  %6624 = vst.sshfl [vmem:[#allocation2 + $0x10] sm:$0xf pattern:$0x76325410] %v652_v6  ;;  %v798_v13 = vcombine.low %v652_v6, %v652_v6  ;;  %s7715_s7 = smov 121  }
  0x37   : > { %v251_v4 = vunpack.c.0.s8 %v250_v2  ;;  %6623 = vst.sshfl [vmem:[#allocation2 + $0x8] sm:$0xf pattern:$0x76325410] %v659_v11  ;;  %s7716_s8 = smov 127   ;;  %s7717_s10 = smov 126  }
  0x38   : > { %6625 = vst.sshfl [vmem:[#allocation2 + $0x18] sm:$0xf pattern:$0x76325410] %v674_v9  ;;  %s7718_s11 = smov 125   ;;  %v653_v18 = vld [vmem:[%s7845_s9 + $0x10] sm:$0xff] }
  0x39   : > { %v7851_v5 = vsub.s32 %v251_v4, %v253_v3  ;;  %v813_v20 = vcombine.low %v653_v18, %v653_v18  ;;  %v7719_v21 = vmov 0   ;;  %v654_v22 = vld [vmem:[%s7845_s9 + $0x18] sm:$0xff]  ;;  %v689_v24 = vcombine.high %v653_v18, %v653_v18  ;;  %v1220_v33 = vld [vmem:[%s10214_s2 + $0x8] sm:$0xff]  ;;  %v1219_v34 = vld [vmem:[%s10214_s2] sm:$0xff]  ;;  %s7485_s22 = smul.u32 2560, %s7841_s29  ;;  %p10232_p12 = scmp.ne.s32.totalorder %s10220_s24, 0 }
  0x3a   : > { %1812 = vmatprep.mubr.bf16.mxu0 %v7719_v21  ;;  %2045 = vmatprep.mubr.bf16.mxu1 %v7719_v21  ;;  %6628 = vst.sshfl [vmem:[#allocation2 + $0x30] sm:$0xf pattern:$0x76325410] %v654_v22  ;;  %v828_v27 = vcombine.low %v654_v22, %v654_v22  ;;  %v704_v29 = vcombine.high %v654_v22, %v654_v22  ;;  %vm367_vm0 = vcmask 1043456   ;;  %vm868_vm1 = vcmask 1006592  }
  0x3b   : > { %v7856_v8 = vrot.slane %v652_v6, %v7851_v5  ;;  %v666_v10 = vrot.slane %v651_v7, %v7851_v5  ;;  %v790_v14 = vrot.slane %v783_v12, %v7851_v5  ;;  %v805_v15 = vrot.slane %v798_v13, %v7851_v5  ;;  %7545 = vset.pattern.permute.xlu1 %v7719_v21  ;;  %v1221_v43 = vld [vmem:[%s10214_s2 + $0x10] sm:$0xff]  ;;  %v1222_v44 = vld [vmem:[%s10214_s2 + $0x18] sm:$0xff]  ;;  %v1223_v63 = vld [vmem:[%s10214_s2 + $0x20] sm:$0xff]  ;;  %s8663_s26 = scalar_lea.vmem [#allocation6], %s7485_s22  ;;  %s7720_s20 = smov [#allocation6]  }
  0x3c   : > { %v921_v16 = vrot.slane %v659_v11, %v7851_v5  ;;  %v688_v17 = vrot.slane %v674_v9, %v7851_v5  ;;  %v696_v19 = vrot.slane %v653_v18, %v7851_v5  ;;  %7544 = vset.pattern.permute.xlu0 %v7719_v21  ;;  %v820_v23 = vrot.slane %v813_v20, %v7851_v5  ;;  %v1224_v0 = vld [vmem:[%s10214_s2 + $0x28] sm:$0xff]  ;;  %v1226_v18 = vld [vmem:[%s10214_s2 + $0x38] sm:$0xff]  ;;  %s7648_s22 = sshll.u32 %s7720_s20, 4  ;;  %s7649_s22 = int_to_ptr.vmem [resolvable:$false] %s7648_s22 }
  0x3d   : > { %723 = vrot.lane.b32.xlu1 %v7856_v8, %s7712_s23  ;;  %719 = vrot.lane.b32.xlu0 %v666_v10, %s7712_s23  ;;  %v703_v25 = vrot.slane %v689_v24, %v7851_v5  ;;  %v711_v26 = vrot.slane %v654_v22, %v7851_v5  ;;  %v835_v28 = vrot.slane %v828_v27, %v7851_v5  ;;  %vm992_vm2 = vcmask 998400   ;;  %s7650_s27 = scalar_lea.vmem %s7649_s22, 81920 }
  0x3e   : > { %v7930_v30 = vrot.slane %v704_v29, %v7851_v5  ;;  %vm744_vm3 = vcmask 1014784   ;;  %vm1116_vm4 = vcmask 990208   ;;  %vm369_vm5 = vcmask 1039360  }
  0x3f   : > { %vm496_vm6 = vcmask 1031168   ;;  %vm620_vm7 = vcmask 1022976   ;;  %vm1719_vm8 = vcmask 261120   ;;  %vm271_vm9 = vcmask 1041408  }
  0x40   : > { %vm272_vm10 = vcmask 594948   ;;  %vm399_vm12 = vcmask 1043458   ;;  %vm400_vm13 = vcmask 596998   ;;  %vm6212_vm15 = vcmask 596996  }
  0x41   : > { %843 = vrot.lane.b32.xlu1 %v790_v14, %s7713_s4  ;;  %845 = vrot.lane.b32.xlu0 %v666_v10, %s7713_s4  ;;  %vm8170_vm11 = vmor %vm272_vm10, %vm271_vm9 }
  0x42   : > { %274 = vst.msk [vmem:[#allocation2 + $0x38] sm:$0x33] %vm8170_vm11, %v7930_v30  ;;  %vm8360_vm14 = vmor %vm400_vm13, %vm399_vm12 }
  0x45   : > { %847 = vrot.lane.b32.xlu1 %v805_v15, %s7713_s4  ;;  %967 = vrot.lane.b32.xlu0 %v666_v10, %s7714_s6 }
  0x49   : > { %969 = vrot.lane.b32.xlu1 %v921_v16, %s7714_s6  ;;  %721 = vrot.lane.b32.xlu0 %v921_v16, %s7712_s23 }
  0x4d   : > { %1091 = vrot.lane.b32.xlu1 %v790_v14, %s7715_s7  ;;  %971 = vrot.lane.b32.xlu0 %v7856_v8, %s7714_s6 }
  0x51   : > { %1095 = vrot.lane.b32.xlu1 %v805_v15, %s7715_s7  ;;  %1093 = vrot.lane.b32.xlu0 %v666_v10, %s7715_s7 }
  0x55   : > { %345 = vrot.lane.b32.xlu1 %v666_v10, %s7716_s8  ;;  %343 = vrot.lane.b32.xlu0 %v790_v14, %s7716_s8 }
  0x59   : > { %471 = vrot.lane.b32.xlu1 %v666_v10, %s7717_s10  ;;  %347 = vrot.lane.b32.xlu0 %v805_v15, %s7716_s8 }
  0x5d   : > { %475 = vrot.lane.b32.xlu1 %v7856_v8, %s7717_s10  ;;  %473 = vrot.lane.b32.xlu0 %v921_v16, %s7717_s10 }
  0x61   : > { %597 = vrot.lane.b32.xlu1 %v666_v10, %s7718_s11  ;;  %595 = vrot.lane.b32.xlu0 %v790_v14, %s7718_s11 }
  0x65   : > { %725 = vrot.lane.b32.xlu1 %v688_v17, %s7712_s23  ;;  %599 = vrot.lane.b32.xlu0 %v805_v15, %s7718_s11  ;;  %v1225_v15 = vld [vmem:[%s10214_s2 + $0x30] sm:$0xff] }
  0x69   : > { %849 = vrot.lane.b32.xlu1 %v7856_v8, %s7713_s4  ;;  %727 = vrot.lane.b32.xlu0 %v696_v19, %s7712_s23 }
  0x6d   : > { %973 = vrot.lane.b32.xlu1 %v688_v17, %s7714_s6  ;;  %851 = vrot.lane.b32.xlu0 %v820_v23, %s7713_s4 }
  0x71   : > { %1097 = vrot.lane.b32.xlu1 %v7856_v8, %s7715_s7  ;;  %975 = vrot.lane.b32.xlu0 %v696_v19, %s7714_s6 }
  0x75   : > { %349 = vrot.lane.b32.xlu1 %v7856_v8, %s7716_s8  ;;  %1099 = vrot.lane.b32.xlu0 %v820_v23, %s7715_s7 }
  0x79   : > { %477 = vrot.lane.b32.xlu1 %v688_v17, %s7717_s10  ;;  %351 = vrot.lane.b32.xlu0 %v820_v23, %s7716_s8 }
  0x7d   : > { %601 = vrot.lane.b32.xlu1 %v7856_v8, %s7718_s11  ;;  %479 = vrot.lane.b32.xlu0 %v696_v19, %s7717_s10 }
  0x81   : > { %729 = vrot.lane.b32.xlu1 %v703_v25, %s7712_s23  ;;  %603 = vrot.lane.b32.xlu0 %v820_v23, %s7718_s11 }
  0x85   : > { %853 = vrot.lane.b32.xlu1 %v696_v19, %s7713_s4  ;;  %731 = vrot.lane.b32.xlu0 %v711_v26, %s7712_s23 }
  0x89   : > { %977 = vrot.lane.b32.xlu1 %v703_v25, %s7714_s6  ;;  %855 = vrot.lane.b32.xlu0 %v835_v28, %s7713_s4 }
  0x8d   : > { %1101 = vrot.lane.b32.xlu1 %v696_v19, %s7715_s7  ;;  %979 = vrot.lane.b32.xlu0 %v711_v26, %s7714_s6 }
  0x91   : > { %353 = vrot.lane.b32.xlu1 %v696_v19, %s7716_s8  ;;  %1103 = vrot.lane.b32.xlu0 %v835_v28, %s7715_s7 }
  0x95   : > { %481 = vrot.lane.b32.xlu1 %v703_v25, %s7717_s10  ;;  %355 = vrot.lane.b32.xlu0 %v835_v28, %s7716_s8 }
  0x99   : > { %605 = vrot.lane.b32.xlu1 %v696_v19, %s7718_s11  ;;  %483 = vrot.lane.b32.xlu0 %v711_v26, %s7717_s10 }
  0x9d   : > { %607 = vrot.lane.b32.xlu0 %v835_v28, %s7718_s11  ;;  %733 = vrot.lane.b32.xlu1 %v7930_v30, %s7712_s23 }
  0xa1   : > { %857 = vrot.lane.b32.xlu0 %v711_v26, %s7713_s4  ;;  %981 = vrot.lane.b32.xlu1 %v7930_v30, %s7714_s6 }
  0xa5   : > { %1105 = vrot.lane.b32.xlu0 %v711_v26, %s7715_s7  ;;  %357 = vrot.lane.b32.xlu1 %v711_v26, %s7716_s8  ;;  %s7486_s7 = smul.u32 40960, %s7764_s16  ;;  %s6541_s8 = sshll.u32 %s8663_s26, 4  ;;  %s10166_s8 = int_to_ptr.vmem [resolvable:$true] %s6541_s8 }
  0xa6   : > { %s6528_s16 = scalar_lea.sflag [#allocation5], %s7841_s29  ;;  %s7644_s19 = scalar_lea.vmem %s10166_s8, 40960 }
  0xa7   : > { %s10164_s17 = scalar_lea.hbm %s10215_s3, %s7486_s7  ;;  %p7645_p11 = scmp.ne.s32.totalorder %s10166_s8, %s7644_s19 }
  0xa8   : > { %p7651_p3 = scmp.lt.s32.totalorder %s10166_s8, %s7649_s22  ;;  %p7652_p5 = scmp.lt.s32.totalorder %s7650_s27, %s7644_s19 }
  0xa9   : > { %609 = vrot.lane.b32.xlu1 %v711_v26, %s7718_s11  ;;  %485 = vrot.lane.b32.xlu0 %v7930_v30, %s7717_s10  ;;  %p7646_p13 = pnand %p7645_p11, %p10232_p12 }
  0xaa   : > { %p7653_p8 = por %p7652_p5, %p7651_p3 }
  0xab   : > { %p7647_p1 = pneg %p7646_p13 }
  0xad   : > { %1266 = vperm.xlu1 %7545, %v1220_v33   ;;  %1261 = vperm.xlu0 %7544, %v1219_v34   ;;  %p7654_p10 = pnand %p7653_p8, %p7647_p1 }
  0xaf   : > { %v7943_v31 = vpop.permute.xlu1 %723  ;;  %v720_v32 = vpop.permute.xlu0 %719 }
  0xb0   : > { %v737_v47 = vrot.slane %v7943_v31, 4  ;;  %v735_v51 = vrot.slane %v720_v32, 4 }
  0xb1   : > { %1271 = vperm.xlu1 %7545, %v1221_v43   ;;  %1276 = vperm.xlu0 %7544, %v1222_v44  }
  0xb3   : > { %v844_v35 = vpop.permute.xlu1 %843  ;;  %v846_v36 = vpop.permute.xlu0 %845 }
  0xb4   : > { %v859_v37 = vrot.slane %v844_v35, 4  ;;  %v860_v38 = vrot.slane %v846_v36, 4 }
  0xb5   : > { %1281 = vperm.xlu1 %7545, %v1223_v63   ;;  %1286 = vperm.xlu0 %7544, %v1224_v0  }
  0xb6   : > { %v867_v39 = vsel %vm367_vm0, %v859_v37, %v860_v38 }
  0xb7   : > { %v869_v40 = vsel %vm868_vm1, %v844_v35, %v867_v39  ;;  %v7953_v41 = vpop.permute.xlu1 %847  ;;  %v968_v42 = vpop.permute.xlu0 %967 }
  0xb8   : > { %891 = vst [vmem:[#allocation2 + $0x80] sm:$0xcc] %v869_v40  ;;  %v861_v45 = vrot.slane %v7953_v41, 4  ;;  %v983_v52 = vrot.slane %v968_v42, 4 }
  0xb9   : > { %1291 = vperm.xlu1 %7545, %v1225_v15   ;;  %1296 = vperm.xlu0 %7544, %v1226_v18  }
  0xba   : > { %v870_v46 = vsel %vm367_vm0, %v860_v38, %v861_v45 }
  0xbb   : > { %v871_v48 = vsel %vm868_vm1, %v846_v36, %v870_v46  ;;  %v970_v49 = vpop.permute.xlu1 %969  ;;  %v722_v50 = vpop.permute.xlu0 %721  ;;  %v1227_v36 = vld [vmem:[%s10214_s2 + $0x40] sm:$0xff] }
  0xbc   : > { %892 = vst [vmem:[#allocation2 + $0x88] sm:$0xcc] %v871_v48  ;;  %v984_v53 = vrot.slane %v970_v49, 4  ;;  %v736_v54 = vrot.slane %v722_v50, 4 }
  0xbd   : > { %1301 = vperm.xlu1 %7545, %v1227_v36  }
  0xbe   : > { %v991_v55 = vsel %vm367_vm0, %v983_v52, %v984_v53  ;;  %v743_v56 = vsel %vm367_vm0, %v735_v51, %v736_v54  ;;  %v746_v57 = vsel %vm367_vm0, %v736_v54, %v737_v47 }
  0xbf   : > { %v993_v58 = vsel %vm992_vm2, %v968_v42, %v991_v55  ;;  %v745_v59 = vsel %vm744_vm3, %v720_v32, %v743_v56  ;;  %v747_v60 = vsel %vm744_vm3, %v722_v50, %v746_v57  ;;  %v1092_v61 = vpop.permute.xlu1 %1091  ;;  %v7975_v62 = vpop.permute.xlu0 %971  ;;  %v1228_v42 = vld [vmem:[%s10214_s2 + $0x48] sm:$0xff] }
  0xc0   : > { %1015 = vst [vmem:[#allocation2 + $0xc0] sm:$0x33] %v993_v58  ;;  %767 = vst [vmem:[#allocation2 + $0x80] sm:$0x33] %v745_v59  ;;  %v985_v1 = vrot.slane %v7975_v62, 4  ;;  %v1107_v2 = vrot.slane %v1092_v61, 4  ;;  %1306 = vperm.xlu0 %7544, %v1228_v42  }
  0xc1   : > { %768 = vst [vmem:[#allocation2 + $0x88] sm:$0x33] %v747_v60  ;;  %v1229_v59 = vld [vmem:[%s10214_s2 + $0x50] sm:$0xff]  ;;  %v1230_v60 = vld [vmem:[%s10214_s2 + $0x58] sm:$0xff] }
  0xc2   : > { %v994_v3 = vsel %vm367_vm0, %v984_v53, %v985_v1  ;;  %1311 = vperm.xlu1 %7545, %v1229_v59  }
  0xc3   : > { %v995_v4 = vsel %vm992_vm2, %v970_v49, %v994_v3  ;;  %v7988_v5 = vpop.permute.xlu1 %1095  ;;  %v1094_v6 = vpop.permute.xlu0 %1093 }
  0xc4   : > { %1016 = vst [vmem:[#allocation2 + $0xc8] sm:$0x33] %v995_v4  ;;  %v1109_v7 = vrot.slane %v7988_v5, 4  ;;  %v1108_v8 = vrot.slane %v1094_v6, 4  ;;  %1316 = vperm.xlu0 %7544, %v1230_v60  }
  0xc6   : > { %v1115_v9 = vsel %vm367_vm0, %v1107_v2, %v1108_v8  ;;  %v1118_v10 = vsel %vm367_vm0, %v1108_v8, %v1109_v7 }
  0xc7   : > { %v1117_v11 = vsel %vm1116_vm4, %v1092_v61, %v1115_v9  ;;  %v1119_v12 = vsel %vm1116_vm4, %v1094_v6, %v1118_v10  ;;  %v346_v13 = vpop.permute.xlu1 %345  ;;  %v344_v14 = vpop.permute.xlu0 %343  ;;  %v1203_v27 = vld [vmem:[#allocation2 + $0x80] sm:$0xff] }
  0xc8   : > { %1139 = vst [vmem:[#allocation2 + $0xc0] sm:$0xcc] %v1117_v11  ;;  %1140 = vst [vmem:[#allocation2 + $0xc8] sm:$0xcc] %v1119_v12  ;;  %v360_v16 = vrot.slane %v346_v13, 4  ;;  %v359_v17 = vrot.slane %v344_v14, 4 }
  0xc9   : > { %v1204_v28 = vld [vmem:[#allocation2 + $0x88] sm:$0xff] }
  0xca   : > { %v368_v19 = vsel %vm367_vm0, %v359_v17, %v360_v16  ;;  %v1231_v17 = vld [vmem:[%s10214_s2 + $0x60] sm:$0xff] }
  0xcb   : > { %v370_v20 = vsel %vm369_vm5, %v344_v14, %v368_v19  ;;  %v472_v22 = vpop.permute.xlu1 %471  ;;  %v8005_v23 = vpop.permute.xlu0 %347  ;;  %1321 = vperm.xlu1 %7545, %v1231_v17  }
  0xcc   : > { %392 = vst [vmem:[#allocation2] sm:$0xcc] %v370_v20  ;;  %v361_v24 = vrot.slane %v8005_v23, 4  ;;  %v487_v25 = vrot.slane %v472_v22, 4 }
  0xce   : > { %v371_v26 = vsel %vm367_vm0, %v360_v16, %v361_v24 }
  0xcf   : > { %v372_v29 = vsel %vm369_vm5, %v346_v13, %v371_v26  ;;  %v8012_v32 = vpop.permute.xlu1 %475  ;;  %v474_v33 = vpop.permute.xlu0 %473  ;;  %v1211_v34 = vld [vmem:[#allocation2 + $0xc0] sm:$0xff]  ;;  %v1212_v35 = vld [vmem:[#allocation2 + $0xc8] sm:$0xff] }
  0xd0   : > { %393 = vst [vmem:[#allocation2 + $0x8] sm:$0xcc] %v372_v29  ;;  %v489_v37 = vrot.slane %v8012_v32, 4  ;;  %v488_v38 = vrot.slane %v474_v33, 4  ;;  %v6666_v39 = vcombine.high %v1203_v27, %v1211_v34  ;;  %v6668_v40 = vcombine.high %v1204_v28, %v1212_v35  ;;  %v8077_v26 = vld [vmem:[%s10213_s1] sm:$0xff]  }
  0xd1   : > { %v6665_v43 = vcombine.low %v1203_v27, %v1211_v34  ;;  %v6667_v44 = vcombine.low %v1204_v28, %v1212_v35 }
  0xd2   : > { %v495_v46 = vsel %vm367_vm0, %v487_v25, %v488_v38  ;;  %v498_v48 = vsel %vm367_vm0, %v488_v38, %v489_v37  ;;  %1792 = vmatprep.subr.bf16.mxu0 %v6666_v39  ;;  %2025 = vmatprep.subr.bf16.mxu1 %v6668_v40 }
  0xd3   : > { %v497_v49 = vsel %vm496_vm6, %v472_v22, %v495_v46  ;;  %v499_v50 = vsel %vm496_vm6, %v474_v33, %v498_v48  ;;  %1793 = vmatpush1.bf16.msra.mxu0 %v6665_v43  ;;  %2026 = vmatpush1.bf16.msra.mxu1 %v6667_v44  ;;  %v598_v51 = vpop.permute.xlu1 %597  ;;  %v596_v52 = vpop.permute.xlu0 %595  ;;  %v1187_v12 = vld [vmem:[#allocation2] sm:$0xff]  ;;  %v1234_v48 = vld [vmem:[%s10214_s2 + $0x78] sm:$0xff] }
  0xd4   : > { %519 = vst [vmem:[#allocation2 + $0x40] sm:$0x33] %v497_v49  ;;  %520 = vst [vmem:[#allocation2 + $0x48] sm:$0x33] %v499_v50  ;;  %v612_v53 = vrot.slane %v598_v51, 4  ;;  %v611_v54 = vrot.slane %v596_v52, 4 }
  0xd6   : > { %v619_v55 = vsel %vm367_vm0, %v611_v54, %v612_v53 }
  0xd7   : > { %v621_v56 = vsel %vm620_vm7, %v596_v52, %v619_v55  ;;  %v726_v57 = vpop.permute.xlu1 %725  ;;  %v8029_v58 = vpop.permute.xlu0 %599  ;;  %v8117_v52 = vld [vmem:[%s10213_s1 + $0x8] sm:$0xff]  }
  0xd8   : > { %643 = vst [vmem:[#allocation2 + $0x40] sm:$0xcc] %v621_v56  ;;  %v738_v61 = vrot.slane %v726_v57, 4  ;;  %v613_v63 = vrot.slane %v8029_v58, 4 }
  0xda   : > { %v748_v0 = vsel %vm367_vm0, %v737_v47, %v738_v61  ;;  %v622_v2 = vsel %vm367_vm0, %v612_v53, %v613_v63 }
  0xdb   : > { %v749_v3 = vsel %vm744_vm3, %v7943_v31, %v748_v0  ;;  %v623_v4 = vsel %vm620_vm7, %v598_v51, %v622_v2  ;;  %v850_v6 = vpop.permute.xlu1 %849  ;;  %v8047_v8 = vpop.permute.xlu0 %727 }
  0xdc   : > { %769 = vst [vmem:[#allocation2 + $0x90] sm:$0x33] %v749_v3  ;;  %644 = vst [vmem:[#allocation2 + $0x48] sm:$0xcc] %v623_v4  ;;  %v862_v9 = vrot.slane %v850_v6, 4  ;;  %v739_v10 = vrot.slane %v8047_v8, 4 }
  0xde   : > { %v872_v47 = vsel %vm367_vm0, %v861_v45, %v862_v9  ;;  %v750_v11 = vsel %vm367_vm0, %v738_v61, %v739_v10  ;;  %v1232_v45 = vld [vmem:[%s10214_s2 + $0x68] sm:$0xff] }
  0xdf   : > { %v873_v31 = vsel %vm868_vm1, %v7953_v41, %v872_v47  ;;  %v751_v13 = vsel %vm744_vm3, %v726_v57, %v750_v11  ;;  %v974_v14 = vpop.permute.xlu1 %973  ;;  %v8059_v15 = vpop.permute.xlu0 %851  ;;  %v1195_v16 = vld [vmem:[#allocation2 + $0x40] sm:$0xff]  ;;  %1326 = vperm.xlu0 %7544, %v1232_v45  }
  0xe0   : > { %893 = vst [vmem:[#allocation2 + $0x90] sm:$0xcc] %v873_v31  ;;  %770 = vst [vmem:[#allocation2 + $0x98] sm:$0x33] %v751_v13  ;;  %v986_v18 = vrot.slane %v974_v14, 4  ;;  %v863_v19 = vrot.slane %v8059_v15, 4  ;;  %v6650_v41 = vcombine.high %v1187_v12, %v1195_v16  ;;  %v6649_v20 = vcombine.low %v1187_v12, %v1195_v16 }
  0xe1   : > { %v8148_v31 = vld [vmem:[%s7845_s9 + $0x10] sm:$0xff] }
  0xe2   : > { %v996_v22 = vsel %vm367_vm0, %v985_v1, %v986_v18  ;;  %v874_v25 = vsel %vm367_vm0, %v862_v9, %v863_v19  ;;  %1794 = vmatprep.subr.bf16.mxu0 %v6650_v41  ;;  %v1188_v1 = vld [vmem:[#allocation2 + $0x8] sm:$0xff]  ;;  %6626 = vst.sshfl [vmem:[#allocation2 + $0x20] sm:$0xf pattern:$0x76325410] %v8148_v31 }
  0xe3   : > { %v997_v27 = vsel %vm992_vm2, %v7975_v62, %v996_v22  ;;  %v875_v28 = vsel %vm868_vm1, %v850_v6, %v874_v25  ;;  %v1098_v29 = vpop.permute.xlu1 %1097  ;;  %v8082_v33 = vpop.permute.xlu0 %975  ;;  %1795 = vmatpush1.bf16.msra.mxu0 %v6649_v20  ;;  %v1196_v34 = vld [vmem:[#allocation2 + $0x48] sm:$0xff]  ;;  %1336 = vperm.xlu0 %7544, %v1234_v48   ;;  %v8500_v20 = vld [vmem:[%s10213_s1 + $0x58] sm:$0xff]  }
  0xe4   : > { %1017 = vst [vmem:[#allocation2 + $0xd0] sm:$0x33] %v997_v27  ;;  %894 = vst [vmem:[#allocation2 + $0x98] sm:$0xcc] %v875_v28  ;;  %v1110_v35 = vrot.slane %v1098_v29, 4  ;;  %v987_v36 = vrot.slane %v8082_v33, 4  ;;  %v6652_v38 = vcombine.high %v1188_v1, %v1196_v34  ;;  %v6651_v39 = vcombine.low %v1188_v1, %v1196_v34 }
  0xe5   : > { %v1236_v6 = vld [vmem:[%s10214_s2 + $0x88] sm:$0xff] }
  0xe6   : > { %v1120_v62 = vsel %vm367_vm0, %v1109_v7, %v1110_v35  ;;  %v998_v40 = vsel %vm367_vm0, %v986_v18, %v987_v36  ;;  %6681 = vmatmul.mubr.msk.bf16.vlgmr.msra.gmra.mxu0 %vm1719_vm8, %v8077_v26  ;;  %2027 = vmatprep.subr.bf16.mxu1 %v6652_v38  ;;  %v1233_v7 = vld [vmem:[%s10214_s2 + $0x70] sm:$0xff]  ;;  %v1238_v38 = vld [vmem:[%s10214_s2 + $0x98] sm:$0xff] }
  0xe7   : > { %v1121_v42 = vsel %vm1116_vm4, %v7988_v5, %v1120_v62  ;;  %v999_v43 = vsel %vm992_vm2, %v974_v14, %v998_v40  ;;  %v350_v44 = vpop.permute.xlu1 %349  ;;  %v8096_v46 = vpop.permute.xlu0 %1099  ;;  %2028 = vmatpush1.bf16.msra.mxu1 %v6651_v39  ;;  %1822 = vmatprep.mubr.bf16.mxu0 %v7719_v21  ;;  %v8158_v14 = vld [vmem:[%s10213_s1 + $0x10] sm:$0xff]   ;;  %v8207_v40 = vld [vmem:[%s10213_s1 + $0x18] sm:$0xff]  }
  0xe8   : > { %1141 = vst [vmem:[#allocation2 + $0xd0] sm:$0xcc] %v1121_v42  ;;  %1018 = vst [vmem:[#allocation2 + $0xd8] sm:$0x33] %v999_v43  ;;  %v362_v49 = vrot.slane %v350_v44, 4  ;;  %v1111_v5 = vrot.slane %v8096_v46, 4  ;;  %1331 = vperm.xlu1 %7545, %v1233_v7   ;;  %1346 = vperm.xlu0 %7544, %v1236_v6  }
  0xea   : > { %v373_v50 = vsel %vm367_vm0, %v361_v24, %v362_v49  ;;  %v1122_v51 = vsel %vm367_vm0, %v1110_v35, %v1111_v5  ;;  %6701 = vmatmul.mubr.msk.bf16.vlgmr.msra.gmra.mxu1 %vm1719_vm8, %v8077_v26 }
  0xeb   : > { %v374_v53 = vsel %vm369_vm5, %v8005_v23, %v373_v50  ;;  %v1123_v54 = vsel %vm1116_vm4, %v1098_v29, %v1122_v51  ;;  %v478_v55 = vpop.permute.xlu1 %477  ;;  %2055 = vmatprep.mubr.bf16.mxu1 %v7719_v21  ;;  %v8123_v24 = vpop.permute.xlu0 %351  ;;  %v1205_v23 = vld [vmem:[#allocation2 + $0x90] sm:$0xff]  ;;  %v1206_v12 = vld [vmem:[#allocation2 + $0x98] sm:$0xff] }
  0xec   : > { %394 = vst [vmem:[#allocation2 + $0x10] sm:$0xcc] %v374_v53  ;;  %1142 = vst [vmem:[#allocation2 + $0xd8] sm:$0xcc] %v1123_v54  ;;  %v490_v56 = vrot.slane %v478_v55, 4  ;;  %v363_v57 = vrot.slane %v8123_v24, 4  ;;  %1356 = vperm.xlu0 %7544, %v1238_v38  }
  0xee   : > { %v500_v59 = vsel %vm367_vm0, %v489_v37, %v490_v56  ;;  %6682 = vmatmul.mubr.msk.bf16.gmra.mxu0 %vm1719_vm8, %v8117_v52  ;;  %v375_v60 = vsel %vm367_vm0, %v362_v49, %v363_v57  ;;  %v1235_v37 = vld [vmem:[%s10214_s2 + $0x80] sm:$0xff] }
  0xef   : > { %v501_v61 = vsel %vm496_vm6, %v8012_v32, %v500_v59  ;;  %v602_v0 = vpop.permute.xlu1 %601  ;;  %v1213_v2 = vld [vmem:[#allocation2 + $0xd0] sm:$0xff]  ;;  %1832 = vmatprep.mubr.bf16.mxu0 %v7719_v21  ;;  %v376_v3 = vsel %vm369_vm5, %v350_v44, %v375_v60  ;;  %v8138_v4 = vpop.permute.xlu0 %479  ;;  %1341 = vperm.xlu1 %7545, %v1235_v37  }
  0xf0   : > { %521 = vst [vmem:[#allocation2 + $0x50] sm:$0x33] %v501_v61  ;;  %v614_v9 = vrot.slane %v602_v0, 4  ;;  %v6669_v32 = vcombine.low %v1205_v23, %v1213_v2  ;;  %v6670_v47 = vcombine.high %v1205_v23, %v1213_v2  ;;  %395 = vst [vmem:[#allocation2 + $0x18] sm:$0xcc] %v376_v3  ;;  %v491_v11 = vrot.slane %v8138_v4, 4 }
  0xf1   : > { %v1240_v2 = vld [vmem:[%s10214_s2 + $0xa8] sm:$0xff] }
  0xf2   : > { %v624_v13 = vsel %vm367_vm0, %v613_v63, %v614_v9  ;;  %6702 = vmatmul.mubr.msk.bf16.gmra.mxu1 %vm1719_vm8, %v8117_v52  ;;  %2258 = vmatprep.subr.bf16.mxu0 %v6670_v47  ;;  %v502_v16 = vsel %vm367_vm0, %v490_v56, %v491_v11 }
  0xf3   : > { %v625_v63 = vsel %vm620_vm7, %v8029_v58, %v624_v13  ;;  %v730_v17 = vpop.permute.xlu1 %729  ;;  %2259 = vmatpush1.bf16.msra.mxu0 %v6669_v32  ;;  %v1214_v45 = vld [vmem:[#allocation2 + $0xd8] sm:$0xff]  ;;  %2065 = vmatprep.mubr.bf16.mxu1 %v7719_v21  ;;  %v503_v18 = vsel %vm496_vm6, %v478_v55, %v502_v16  ;;  %v8168_v41 = vpop.permute.xlu0 %603  ;;  %v1189_v7 = vld [vmem:[#allocation2 + $0x10] sm:$0xff]  ;;  %v8248_v32 = vld [vmem:[%s10213_s1 + $0x20] sm:$0xff]  }
  0xf4   : > { %645 = vst [vmem:[#allocation2 + $0x50] sm:$0xcc] %v625_v63  ;;  %v740_v22 = vrot.slane %v730_v17, 4  ;;  %v6671_v25 = vcombine.low %v1206_v12, %v1214_v45  ;;  %v6672_v27 = vcombine.high %v1206_v12, %v1214_v45  ;;  %522 = vst [vmem:[#allocation2 + $0x58] sm:$0x33] %v503_v18  ;;  %v615_v58 = vrot.slane %v8168_v41, 4  ;;  %1366 = vperm.xlu0 %7544, %v1240_v2  }
  0xf6   : > { %v752_v28 = vsel %vm367_vm0, %v739_v10, %v740_v22  ;;  %6683 = vmatmul.mubr.msk.bf16.gmra.mxu0 %vm1719_vm8, %v8158_v14  ;;  %2491 = vmatprep.subr.bf16.mxu1 %v6672_v27  ;;  %v626_v29 = vsel %vm367_vm0, %v614_v9, %v615_v58  ;;  %v1237_v10 = vld [vmem:[%s10214_s2 + $0x90] sm:$0xff] }
  0xf7   : > { %v753_v1 = vsel %vm744_vm3, %v8047_v8, %v752_v28  ;;  %v854_v34 = vpop.permute.xlu1 %853  ;;  %2492 = vmatpush1.bf16.msra.mxu1 %v6671_v25  ;;  %1842 = vmatprep.mubr.bf16.mxu0 %v7719_v21  ;;  %v627_v30 = vsel %vm620_vm7, %v602_v0, %v626_v29  ;;  %v8190_v35 = vpop.permute.xlu0 %731  ;;  %v1190_v55 = vld [vmem:[#allocation2 + $0x18] sm:$0xff]  ;;  %v1241_v28 = vld [vmem:[%s10214_s2 + $0xb0] sm:$0xff] }
  0xf8   : > { %771 = vst [vmem:[#allocation2 + $0xa0] sm:$0x33] %v753_v1  ;;  %v864_v39 = vrot.slane %v854_v34, 4  ;;  %646 = vst [vmem:[#allocation2 + $0x58] sm:$0xcc] %v627_v30  ;;  %v741_v8 = vrot.slane %v8190_v35, 4  ;;  %1351 = vperm.xlu1 %7545, %v1237_v10  }
  0xfa   : > { %v876_v62 = vsel %vm367_vm0, %v863_v19, %v864_v39  ;;  %6703 = vmatmul.mubr.msk.bf16.gmra.mxu1 %vm1719_vm8, %v8158_v14  ;;  %v754_v42 = vsel %vm367_vm0, %v740_v22, %v741_v8 }
  0xfb   : > { %v877_v43 = vsel %vm868_vm1, %v8059_v15, %v876_v62  ;;  %v978_v44 = vpop.permute.xlu1 %977  ;;  %v1197_v48 = vld [vmem:[#allocation2 + $0x50] sm:$0xff]  ;;  %2075 = vmatprep.mubr.bf16.mxu1 %v7719_v21  ;;  %v755_v19 = vsel %vm744_vm3, %v730_v17, %v754_v42  ;;  %v8216_v49 = vpop.permute.xlu0 %855 }
  0xfc   : > { %895 = vst [vmem:[#allocation2 + $0xa0] sm:$0xcc] %v877_v43  ;;  %v988_v50 = vrot.slane %v978_v44, 4  ;;  %v6653_v51 = vcombine.low %v1189_v7, %v1197_v48  ;;  %v6654_v53 = vcombine.high %v1189_v7, %v1197_v48  ;;  %772 = vst [vmem:[#allocation2 + $0xa8] sm:$0x33] %v755_v19  ;;  %v865_v54 = vrot.slane %v8216_v49, 4 }
  0xfe   : > { %v1000_v15 = vsel %vm367_vm0, %v987_v36, %v988_v50  ;;  %6684 = vmatmul.mubr.msk.bf16.gmra.mxu0 %vm1719_vm8, %v8207_v40  ;;  %2260 = vmatprep.subr.bf16.mxu0 %v6654_v53  ;;  %v878_v56 = vsel %vm367_vm0, %v864_v39, %v865_v54  ;;  %v1239_v36 = vld [vmem:[%s10214_s2 + $0xa0] sm:$0xff] }
  0xff   : > { %v1001_v59 = vsel %vm992_vm2, %v8082_v33, %v1000_v15  ;;  %v1102_v23 = vpop.permute.xlu1 %1101  ;;  %2261 = vmatpush1.bf16.msra.mxu0 %v6653_v51  ;;  %1852 = vmatprep.mubr.bf16.mxu0 %v7719_v21  ;;  %v1198_v60 = vld [vmem:[#allocation2 + $0x58] sm:$0xff]  ;;  %v879_v61 = vsel %vm868_vm1, %v854_v34, %v878_v56  ;;  %v8231_v0 = vpop.permute.xlu0 %979  ;;  %v8288_v34 = vld [vmem:[%s10213_s1 + $0x28] sm:$0xff]  }
 0x100   : > { %1019 = vst [vmem:[#allocation2 + $0xe0] sm:$0x33] %v1001_v59  ;;  %v1112_v3 = vrot.slane %v1102_v23, 4  ;;  %v6655_v33 = vcombine.low %v1190_v55, %v1198_v60  ;;  %v6656_v37 = vcombine.high %v1190_v55, %v1198_v60  ;;  %896 = vst [vmem:[#allocation2 + $0xa8] sm:$0xcc] %v879_v61  ;;  %v989_v6 = vrot.slane %v8231_v0, 4  ;;  %1361 = vperm.xlu1 %7545, %v1239_v36  }
 0x101   : > { %v1244_v61 = vld [vmem:[%s10214_s2 + $0xc8] sm:$0xff]  ;;  %v8343_v36 = vld [vmem:[%s10213_s1 + $0x30] sm:$0xff]  }
 0x102   : > { %v1124_v9 = vsel %vm367_vm0, %v1111_v5, %v1112_v3  ;;  %6704 = vmatmul.mubr.msk.bf16.gmra.mxu1 %vm1719_vm8, %v8207_v40  ;;  %2493 = vmatprep.subr.bf16.mxu1 %v6656_v37  ;;  %v1002_v47 = vsel %vm367_vm0, %v988_v50, %v989_v6 }
 0x103   : > { %v1125_v12 = vsel %vm1116_vm4, %v8096_v46, %v1124_v9  ;;  %2085 = vmatprep.mubr.bf16.mxu1 %v7719_v21  ;;  %v354_v13 = vpop.permute.xlu1 %353  ;;  %2494 = vmatpush1.bf16.msra.mxu1 %v6655_v33  ;;  %v1003_v5 = vsel %vm992_vm2, %v978_v44, %v1002_v47  ;;  %v8257_v16 = vpop.permute.xlu0 %1103 }
 0x104   : > { %1143 = vst [vmem:[#allocation2 + $0xe0] sm:$0xcc] %v1125_v12  ;;  %v364_v63 = vrot.slane %v354_v13, 4  ;;  %1020 = vst [vmem:[#allocation2 + $0xe8] sm:$0x33] %v1003_v5  ;;  %v1113_v17 = vrot.slane %v8257_v16, 4  ;;  %1371 = vperm.xlu1 %7545, %v1241_v28  }
 0x106   : > { %6685 = vmatmul.mubr.msk.bf16.gmra.mxu0 %vm1719_vm8, %v8248_v32  ;;  %v377_v46 = vsel %vm367_vm0, %v363_v57, %v364_v63  ;;  %v1126_v45 = vsel %vm367_vm0, %v1112_v3, %v1113_v17  ;;  %v1242_v57 = vld [vmem:[%s10214_s2 + $0xb8] sm:$0xff] }
 0x107   : > { %1862 = vmatprep.mubr.bf16.mxu0 %v7719_v21  ;;  %v378_v18 = vsel %vm369_vm5, %v8123_v24, %v377_v46  ;;  %v482_v22 = vpop.permute.xlu1 %481  ;;  %v1127_v25 = vsel %vm1116_vm4, %v1102_v23, %v1126_v45  ;;  %v8272_v27 = vpop.permute.xlu0 %355  ;;  %1376 = vperm.xlu0 %7544, %v1242_v57   ;;  %v8281_v24 = vld [vmem:[#allocation2 + $0xa0] sm:$0xff]  ;;  %v8309_v19 = vld [vmem:[#allocation2 + $0xa8] sm:$0xff] }
 0x108   : > { %396 = vst [vmem:[#allocation2 + $0x20] sm:$0xcc] %v378_v18  ;;  %v492_v29 = vrot.slane %v482_v22, 4  ;;  %1144 = vst [vmem:[#allocation2 + $0xe8] sm:$0xcc] %v1127_v25  ;;  %v365_v1 = vrot.slane %v8272_v27, 4 }
 0x109   : > { %v1246_v25 = vld [vmem:[%s10214_s2 + $0xd8] sm:$0xff] }
 0x10a   : > { %6705 = vmatmul.mubr.msk.bf16.gmra.mxu1 %vm1719_vm8, %v8248_v32  ;;  %v504_v30 = vsel %vm367_vm0, %v491_v11, %v492_v29  ;;  %v379_v10 = vsel %vm367_vm0, %v364_v63, %v365_v1 }
 0x10b   : > { %v8296_v38 = vld [vmem:[#allocation2 + $0xe0] sm:$0xff]  ;;  %2095 = vmatprep.mubr.bf16.mxu1 %v7719_v21  ;;  %v505_v39 = vsel %vm496_vm6, %v8138_v4, %v504_v30  ;;  %v606_v62 = vpop.permute.xlu1 %605  ;;  %v380_v42 = vsel %vm369_vm5, %v354_v13, %v379_v10  ;;  %v8302_v43 = vpop.permute.xlu0 %483  ;;  %1386 = vperm.xlu0 %7544, %v1244_v61   ;;  %v1248_v30 = vld [vmem:[%s10214_s2 + $0xe8] sm:$0xff] }
 0x10c   : > { %v6673_v44 = vcombine.low %v8281_v24, %v8296_v38  ;;  %v6674_v11 = vcombine.high %v8281_v24, %v8296_v38  ;;  %523 = vst [vmem:[#allocation2 + $0x60] sm:$0x33] %v505_v39  ;;  %v616_v7 = vrot.slane %v606_v62, 4  ;;  %397 = vst [vmem:[#allocation2 + $0x28] sm:$0xcc] %v380_v42  ;;  %v493_v48 = vrot.slane %v8302_v43, 4 }
 0x10d   : > { %v8421_v10 = vld [vmem:[%s10213_s1 + $0x40] sm:$0xff]   ;;  %v1249_v42 = vld [vmem:[%s10214_s2 + $0xf0] sm:$0xff] }
 0x10e   : > { %6686 = vmatmul.mubr.msk.bf16.gmra.mxu0 %vm1719_vm8, %v8288_v34  ;;  %2724 = vmatprep.subr.bf16.mxu0 %v6674_v11  ;;  %v628_v4 = vsel %vm367_vm0, %v615_v58, %v616_v7  ;;  %v506_v50 = vsel %vm367_vm0, %v492_v29, %v493_v48  ;;  %v1243_v58 = vld [vmem:[%s10214_s2 + $0xc0] sm:$0xff]  ;;  %v1250_v11 = vld [vmem:[%s10214_s2 + $0xf8] sm:$0xff] }
 0x10f   : > { %1872 = vmatprep.mubr.bf16.mxu0 %v7719_v21  ;;  %v629_v51 = vsel %vm620_vm7, %v8168_v41, %v628_v4  ;;  %v507_v53 = vsel %vm496_vm6, %v482_v22, %v506_v50  ;;  %v8323_v55 = vpop.permute.xlu0 %607  ;;  %v734_v15 = vpop.permute.xlu1 %733  ;;  %v8325_v56 = vld [vmem:[#allocation2 + $0xe8] sm:$0xff]  ;;  %1381 = vperm.xlu1 %7545, %v1243_v58  }
 0x110   : > { %647 = vst [vmem:[#allocation2 + $0x60] sm:$0xcc] %v629_v51  ;;  %524 = vst [vmem:[#allocation2 + $0x68] sm:$0x33] %v507_v53  ;;  %v617_v59 = vrot.slane %v8323_v55, 4  ;;  %v742_v23 = vrot.slane %v734_v15, 4  ;;  %v6675_v60 = vcombine.low %v8309_v19, %v8325_v56  ;;  %v6676_v41 = vcombine.high %v8309_v19, %v8325_v56  ;;  %1396 = vperm.xlu0 %7544, %v1246_v25  }
 0x111   : > { %v1251_v51 = vld [vmem:[%s10214_s2 + $0x100] sm:$0xff]  ;;  %v1252_v53 = vld [vmem:[%s10214_s2 + $0x108] sm:$0xff] }
 0x112   : > { %6706 = vmatmul.mubr.msk.bf16.gmra.mxu1 %vm1719_vm8, %v8288_v34  ;;  %v630_v2 = vsel %vm367_vm0, %v616_v7, %v617_v59  ;;  %v756_v3 = vsel %vm367_vm0, %v741_v8, %v742_v23  ;;  %v758_v33 = vsel %vm744_vm3, %v734_v15, %v742_v23  ;;  %2957 = vmatprep.subr.bf16.mxu1 %v6676_v41  ;;  %v8442_v7 = vld [vmem:[%s10213_s1 + $0x48] sm:$0xff]   ;;  %v8517_v8 = vld [vmem:[%s10213_s1 + $0x60] sm:$0xff]  }
 0x113   : > { %2105 = vmatprep.mubr.bf16.mxu1 %v7719_v21  ;;  %v631_v37 = vsel %vm620_vm7, %v606_v62, %v630_v2  ;;  %v757_v9 = vsel %vm744_vm3, %v8190_v35, %v756_v3  ;;  %774 = vst.msk [vmem:[#allocation2 + $0xb8] sm:$0x33] %vm8170_vm11, %v758_v33  ;;  %v858_v47 = vpop.permute.xlu0 %857  ;;  %v982_v12 = vpop.permute.xlu1 %981  ;;  %v8467_v2 = vld [vmem:[%s10213_s1 + $0x50] sm:$0xff]  }
 0x114   : > { %648 = vst [vmem:[#allocation2 + $0x68] sm:$0xcc] %v631_v37  ;;  %773 = vst [vmem:[#allocation2 + $0xb0] sm:$0x33] %v757_v9  ;;  %v866_v13 = vrot.slane %v858_v47, 4  ;;  %v990_v5 = vrot.slane %v982_v12, 4  ;;  %1406 = vperm.xlu0 %7544, %v1248_v30  }
 0x116   : > { %6687 = vmatmul.mubr.msk.bf16.gmra.mxu0 %vm1719_vm8, %v8343_v36  ;;  %v880_v35 = vsel %vm367_vm0, %v865_v54, %v866_v13  ;;  %v882_v63 = vsel %vm868_vm1, %v858_v47, %v866_v13  ;;  %v1004_v46 = vsel %vm367_vm0, %v989_v6, %v990_v5  ;;  %v1006_v45 = vsel %vm992_vm2, %v982_v12, %v990_v5  ;;  %v1245_v6 = vld [vmem:[%s10214_s2 + $0xd0] sm:$0xff]  ;;  %v1258_v5 = vld [vmem:[%s10214_s2 + $0x138] sm:$0xff] }
 0x117   : > { %1882 = vmatprep.mubr.bf16.mxu0 %v7719_v21  ;;  %v881_v18 = vsel %vm868_vm1, %v8216_v49, %v880_v35  ;;  %898 = vst.msk [vmem:[#allocation2 + $0xb8] sm:$0xcc] %vm8360_vm14, %v882_v63  ;;  %v1005_v22 = vsel %vm992_vm2, %v8231_v0, %v1004_v46  ;;  %v1106_v54 = vpop.permute.xlu0 %1105  ;;  %1391 = vperm.xlu1 %7545, %v1245_v6   ;;  %v8394_v0 = vld [vmem:[%s10213_s1 + $0x38] sm:$0xff]   ;;  %v358_v4 = vpop.permute.xlu1 %357  ;;  %v1257_v13 = vld [vmem:[%s10214_s2 + $0x130] sm:$0xff]  ;;  %v8534_v35 = vld [vmem:[%s10213_s1 + $0x68] sm:$0xff]  }
 0x118   : > { %1022 = vst.msk [vmem:[#allocation2 + $0xf8] sm:$0x33] %vm8170_vm11, %v1006_v45  ;;  %897 = vst [vmem:[#allocation2 + $0xb0] sm:$0xcc] %v881_v18  ;;  %v1114_v49 = vrot.slane %v1106_v54, 4  ;;  %1416 = vperm.xlu0 %7544, %v1250_v11   ;;  %v366_v50 = vrot.slane %v358_v4, 4  ;;  %v226_v45 = vcombine.high %v8148_v31, %v8148_v31 }
 0x119   : > { %1021 = vst [vmem:[#allocation2 + $0xf0] sm:$0x33] %v1005_v22  ;;  %v8545_v63 = vld [vmem:[%s10213_s1 + $0x70] sm:$0xff]   ;;  %v8556_v46 = vld [vmem:[%s10213_s1 + $0x78] sm:$0xff]   ;;  %v8569_v18 = vld [vmem:[%s10213_s1 + $0x80] sm:$0xff]  }
 0x11a   : > { %6707 = vmatmul.mubr.msk.bf16.gmra.mxu1 %vm1719_vm8, %v8343_v36  ;;  %v1128_v28 = vsel %vm367_vm0, %v1113_v17, %v1114_v49  ;;  %v1130_v57 = vsel %vm1116_vm4, %v1106_v54, %v1114_v49  ;;  %v1247_v17 = vld [vmem:[%s10214_s2 + $0xe0] sm:$0xff]  ;;  %v381_v15 = vsel %vm367_vm0, %v365_v1, %v366_v50  ;;  %v383_v58 = vsel %vm369_vm5, %v358_v4, %v366_v50  ;;  %v7569_v31 = vld [vmem:[%s10213_s1 + $0x88] sm:$0xff]   ;;  %v7570_v22 = vld [vmem:[%s10213_s1 + $0x90] sm:$0xff]  }
 0x11b   : > { %2115 = vmatprep.mubr.bf16.mxu1 %v7719_v21  ;;  %v1129_v29 = vsel %vm1116_vm4, %v8257_v16, %v1128_v28  ;;  %1146 = vst.msk [vmem:[#allocation2 + $0xf8] sm:$0xcc] %vm8360_vm14, %v1130_v57  ;;  %1401 = vperm.xlu1 %7545, %v1247_v17   ;;  %v382_v23 = vsel %vm369_vm5, %v8272_v27, %v381_v15  ;;  %402 = vst.msk [vmem:[#allocation2 + $0x38] sm:$0xcc] %vm8360_vm14, %v383_v58  ;;  %v610_v41 = vpop.permute.xlu1 %609  ;;  %v486_v61 = vpop.permute.xlu0 %485  ;;  %v7571_v54 = vld [vmem:[%s10213_s1 + $0x98] sm:$0xff]   ;;  %v1191_v6 = vld [vmem:[#allocation2 + $0x20] sm:$0xff] }
 0x11c   : > { %1145 = vst [vmem:[#allocation2 + $0xf0] sm:$0xcc] %v1129_v29  ;;  %1426 = vperm.xlu0 %7544, %v1252_v53   ;;  %398 = vst [vmem:[#allocation2 + $0x30] sm:$0xcc] %v382_v23  ;;  %v618_v1 = vrot.slane %v610_v41, 4  ;;  %v494_v3 = vrot.slane %v486_v61, 4 }
 0x11d   : > { %6627 = vst.sshfl [vmem:[#allocation2 + $0x28] sm:$0xf pattern:$0x76325410] %v226_v45  ;;  %v1199_v25 = vld [vmem:[#allocation2 + $0x60] sm:$0xff]  ;;  %v1200_v57 = vld [vmem:[#allocation2 + $0x68] sm:$0xff]  ;;  %vm9847_vm1 = vmor %vm6212_vm15, %vm367_vm0 }
 0x11e   : > { %6688 = vmatmul.mubr.msk.bf16.gmra.mxu0 %vm1719_vm8, %v8394_v0  ;;  %v632_v27 = vsel %vm367_vm0, %v617_v59, %v618_v1  ;;  %v634_v33 = vsel %vm620_vm7, %v610_v41, %v618_v1  ;;  %v508_v37 = vsel %vm367_vm0, %v493_v48, %v494_v3  ;;  %v510_v9 = vsel %vm496_vm6, %v486_v61, %v494_v3  ;;  %v1253_v48 = vld [vmem:[%s10214_s2 + $0x110] sm:$0xff]  ;;  %v1256_v59 = vld [vmem:[%s10214_s2 + $0x128] sm:$0xff]  ;;  %v8652_v3 = vld [vmem:[#allocation2 + $0xb8] sm:$0xff] }
 0x11f   : > { %1892 = vmatprep.mubr.bf16.mxu0 %v7719_v21  ;;  %v8414_v16 = vld [vmem:[#allocation2 + $0xb0] sm:$0xff]  ;;  %1411 = vperm.xlu1 %7545, %v1249_v42   ;;  %v633_v47 = vsel %vm620_vm7, %v8323_v55, %v632_v27  ;;  %650 = vst.msk [vmem:[#allocation2 + $0x78] sm:$0xcc] %vm8360_vm14, %v634_v33  ;;  %v509_v12 = vsel %vm496_vm6, %v8302_v43, %v508_v37  ;;  %v1254_v55 = vld [vmem:[%s10214_s2 + $0x118] sm:$0xff]  ;;  %v1255_v43 = vld [vmem:[%s10214_s2 + $0x120] sm:$0xff] }
 0x120   : > { %526 = vst.msk [vmem:[#allocation2 + $0x78] sm:$0x33] %vm8170_vm11, %v510_v9  ;;  %649 = vst [vmem:[#allocation2 + $0x70] sm:$0xcc] %v633_v47  ;;  %1436 = vperm.xlu0 %7544, %v1254_v55   ;;  %v6658_v49 = vcombine.high %v1191_v6, %v1199_v25  ;;  %v6657_v17 = vcombine.low %v1191_v6, %v1199_v25 }
 0x121   : > { %525 = vst [vmem:[#allocation2 + $0x70] sm:$0x33] %v509_v12 }
 0x122   : > { %6708 = vmatmul.mubr.msk.bf16.gmra.mxu1 %vm1719_vm8, %v8394_v0  ;;  %v8654_v27 = vld [vmem:[#allocation2 + $0xf8] sm:$0xff] }
 0x123   : > { %2125 = vmatprep.mubr.bf16.mxu1 %v7719_v21  ;;  %v8424_v39 = vld [vmem:[#allocation2 + $0xf0] sm:$0xff]  ;;  %1421 = vperm.xlu1 %7545, %v1251_v51  }
 0x124   : > { %v6677_v62 = vcombine.low %v8414_v16, %v8424_v39  ;;  %1446 = vperm.xlu0 %7544, %v1256_v59   ;;  %v1192_v28 = vld [vmem:[#allocation2 + $0x28] sm:$0xff]  ;;  %v6678_v29 = vcombine.high %v8414_v16, %v8424_v39  ;;  %v6680_v59 = vcombine.high %v8652_v3, %v8654_v27 }
 0x125   : > { %v6660_v30 = vcombine.high %v1192_v28, %v1200_v57  ;;  %v6659_v42 = vcombine.low %v1192_v28, %v1200_v57 }
 0x126   : > { %6689 = vmatmul.mubr.msk.bf16.gmra.mxu0 %vm1719_vm8, %v8421_v10 }
 0x127   : > { %1902 = vmatprep.mubr.bf16.mxu0 %v7719_v21  ;;  %1431 = vperm.xlu1 %7545, %v1253_v48  }
 0x128   : > { %1456 = vperm.xlu0 %7544, %v1258_v5  }
 0x12a   : > { %6709 = vmatmul.mubr.msk.bf16.gmra.mxu1 %vm1719_vm8, %v8421_v10 }
 0x12b   : > { %2135 = vmatprep.mubr.bf16.mxu1 %v7719_v21  ;;  %1441 = vperm.xlu1 %7545, %v1255_v43   ;;  %v6679_v43 = vcombine.low %v8652_v3, %v8654_v27 }
 0x12e   : > { %6690 = vmatmul.mubr.msk.bf16.gmra.mxu0 %vm1719_vm8, %v8442_v7 }
 0x12f   : > { %1912 = vmatprep.mubr.bf16.mxu0 %v7719_v21  ;;  %1451 = vperm.xlu1 %7545, %v1257_v13  }
 0x132   : > { %6710 = vmatmul.mubr.msk.bf16.gmra.mxu1 %vm1719_vm8, %v8442_v7 }
 0x133   : > { %2145 = vmatprep.mubr.bf16.mxu1 %v7719_v21 }
 0x136   : > { %6691 = vmatmul.mubr.msk.bf16.gmra.mxu0 %vm1719_vm8, %v8467_v2 }
 0x137   : > { %1922 = vmatprep.mubr.bf16.mxu0 %v7719_v21 }
 0x13a   : > { %6711 = vmatmul.mubr.msk.bf16.gmra.mxu1 %vm1719_vm8, %v8467_v2 }
 0x13b   : > { %2155 = vmatprep.mubr.bf16.mxu1 %v7719_v21 }
 0x13e   : > { %6692 = vmatmul.mubr.msk.bf16.gmra.mxu0 %vm1719_vm8, %v8500_v20 }
 0x13f   : > { %1932 = vmatprep.mubr.bf16.mxu0 %v7719_v21 }
 0x142   : > { %6712 = vmatmul.mubr.msk.bf16.gmra.mxu1 %vm1719_vm8, %v8500_v20 }
 0x143   : > { %2165 = vmatprep.mubr.bf16.mxu1 %v7719_v21 }
 0x146   : > { %6693 = vmatmul.mubr.msk.bf16.gmra.mxu0 %vm1719_vm8, %v8517_v8 }
 0x147   : > { %1942 = vmatprep.mubr.bf16.mxu0 %v7719_v21 }
 0x14a   : > { %6713 = vmatmul.mubr.msk.bf16.gmra.mxu1 %vm1719_vm8, %v8517_v8 }
 0x14b   : > { %2175 = vmatprep.mubr.bf16.mxu1 %v7719_v21 }
 0x14e   : > { %6694 = vmatmul.mubr.msk.bf16.gmra.mxu0 %vm1719_vm8, %v8534_v35 }
 0x14f   : > { %1952 = vmatprep.mubr.bf16.mxu0 %v7719_v21 }
 0x152   : > { %6714 = vmatmul.mubr.msk.bf16.gmra.mxu1 %vm1719_vm8, %v8534_v35 }
 0x153   : > { %2185 = vmatprep.mubr.bf16.mxu1 %v7719_v21 }
 0x156   : > { %6695 = vmatmul.mubr.msk.bf16.gmra.mxu0 %vm1719_vm8, %v8545_v63 }
 0x157   : > { %1962 = vmatprep.mubr.bf16.mxu0 %v7719_v21 }
 0x15a   : > { %6715 = vmatmul.mubr.msk.bf16.gmra.mxu1 %vm1719_vm8, %v8545_v63 }
 0x15b   : > { %2195 = vmatprep.mubr.bf16.mxu1 %v7719_v21 }
 0x15e   : > { %6696 = vmatmul.mubr.msk.bf16.gmra.mxu0 %vm1719_vm8, %v8556_v46 }
 0x15f   : > { %1972 = vmatprep.mubr.bf16.mxu0 %v7719_v21 }
 0x162   : > { %6716 = vmatmul.mubr.msk.bf16.gmra.mxu1 %vm1719_vm8, %v8556_v46 }
 0x163   : > { %2205 = vmatprep.mubr.bf16.mxu1 %v7719_v21 }
 0x166   : > { %6697 = vmatmul.mubr.msk.bf16.gmra.mxu0 %vm1719_vm8, %v8569_v18 }
 0x167   : > { %1982 = vmatprep.mubr.bf16.mxu0 %v7719_v21 }
 0x16a   : > { %6717 = vmatmul.mubr.msk.bf16.gmra.mxu1 %vm1719_vm8, %v8569_v18 }
 0x16b   : > { %2215 = vmatprep.mubr.bf16.mxu1 %v7719_v21 }
 0x16e   : > { %6698 = vmatmul.mubr.msk.bf16.gmra.mxu0 %vm1719_vm8, %v7569_v31 }
 0x16f   : > { %1992 = vmatprep.mubr.bf16.mxu0 %v7719_v21 }
 0x172   : > { %6718 = vmatmul.mubr.msk.bf16.gmra.mxu1 %vm1719_vm8, %v7569_v31 }
 0x173   : > { %2225 = vmatprep.mubr.bf16.mxu1 %v7719_v21 }
 0x176   : > { %6699 = vmatmul.mubr.msk.bf16.gmra.mxu0 %vm1719_vm8, %v7570_v22 }
 0x177   : > { %2002 = vmatprep.mubr.bf16.mxu0 %v7719_v21 }
 0x17a   : > { %6719 = vmatmul.mubr.msk.bf16.gmra.mxu1 %vm1719_vm8, %v7570_v22 }
 0x17b   : > { %2235 = vmatprep.mubr.bf16.mxu1 %v7719_v21 }
 0x17e   : > { %6700 = vmatmul.mubr.msk.bf16.gmra.mxu0 %vm1719_vm8, %v7571_v54 }
 0x17f   : > { %2278 = vmatprep.mubr.bf16.mxu0 %v7719_v21 }
 0x182   : > { %6720 = vmatmul.mubr.msk.bf16.gmra.mxu1 %vm1719_vm8, %v7571_v54 }
 0x183   : > { %2511 = vmatprep.mubr.bf16.mxu1 %v7719_v21 }
 0x186   : > { %6721 = vmatmul.mubr.msk.bf16.vlgmr.msra.gmra.mxu0 %vm1719_vm8, %v8077_v26 }
 0x187   : > { %2725 = vmatpush1.bf16.msra.mxu0 %v6673_v44  ;;  %2288 = vmatprep.mubr.bf16.mxu0 %v7719_v21 }
 0x188   : > { %2726 = vmatprep.subr.bf16.mxu0 %v6658_v49 }
 0x18a   : > { %6741 = vmatmul.mubr.msk.bf16.vlgmr.msra.gmra.mxu1 %vm1719_vm8, %v8077_v26  ;;  %v8631_v26 = vpop.permute.xlu0 %1261 }
 0x18b   : > { %2727 = vmatpush1.bf16.msra.mxu0 %v6657_v17  ;;  %2958 = vmatpush1.bf16.msra.mxu1 %v6675_v60 }
 0x18c   : > { %3190 = vmatprep.subr.bf16.mxu0 %v6678_v29  ;;  %2521 = vmatprep.mubr.bf16.mxu1 %v7719_v21 }
 0x18d   : > { %2959 = vmatprep.subr.bf16.mxu1 %v6660_v30 }
 0x18e   : > { %6722 = vmatmul.mubr.msk.bf16.gmra.mxu0 %vm1719_vm8, %v8117_v52  ;;  %v8659_v12 = vpop.permute.xlu0 %1276 }
 0x18f   : > { %2298 = vmatprep.mubr.bf16.mxu0 %v7719_v21  ;;  %2960 = vmatpush1.bf16.msra.mxu1 %v6659_v42 }
 0x190   : > { %3423 = vmatprep.subr.bf16.mxu1 %v6680_v59 }
 0x192   : > { %6742 = vmatmul.mubr.msk.bf16.gmra.mxu1 %vm1719_vm8, %v8117_v52 }
 0x193   : > { %2531 = vmatprep.mubr.bf16.mxu1 %v7719_v21 }
 0x196   : > { %6723 = vmatmul.mubr.msk.bf16.gmra.mxu0 %vm1719_vm8, %v8158_v14 }
 0x197   : > { %2308 = vmatprep.mubr.bf16.mxu0 %v7719_v21 }
 0x19a   : > { %6743 = vmatmul.mubr.msk.bf16.gmra.mxu1 %vm1719_vm8, %v8158_v14  ;;  %v8636_v14 = vpop.permute.xlu1 %1266 }
 0x19b   : > { %2541 = vmatprep.mubr.bf16.mxu1 %v7719_v21 }
 0x19e   : > { %6724 = vmatmul.mubr.msk.bf16.gmra.mxu0 %vm1719_vm8, %v8207_v40  ;;  %v8646_v50 = vpop.permute.xlu1 %1271 }
 0x19f   : > { %2318 = vmatprep.mubr.bf16.mxu0 %v7719_v21 }
 0x1a2   : > { %6744 = vmatmul.mubr.msk.bf16.gmra.mxu1 %vm1719_vm8, %v8207_v40  ;;  %v8679_v29 = vpop.permute.xlu1 %1281 }
 0x1a3   : > { %2551 = vmatprep.mubr.bf16.mxu1 %v7719_v21 }
 0x1a6   : > { %v1814_v52 = vpop.f32.mrf.mxu0  ;;  %6725 = vmatmul.mubr.msk.bf16.gmra.mxu0 %vm1719_vm8, %v8248_v32  ;;  %v8701_v59 = vpop.permute.xlu1 %1291 }
 0x1a7   : > { %2328 = vmatprep.mubr.bf16.mxu0 %v7719_v21  ;;  %v1815_v24 = vadd.f32 %v1814_v52, %v8631_v26 }
 0x1a8   : > { %v1816_v38 = vpop.f32.mrf.mxu0 }
 0x1a9   : > { %v1817_v44 = vadd.f32 %v1816_v38, %v8631_v26  ;;  %v3644_v56 = vmax.f32 %v1815_v24, 0.0 }
 0x1aa   : > { %v1818_v19 = vpop.f32.mrf.mxu0  ;;  %v2047_v40 = vpop.f32.mrf.mxu1  ;;  %6745 = vmatmul.mubr.msk.bf16.gmra.mxu1 %vm1719_vm8, %v8248_v32 }
 0x1ab   : > { %2561 = vmatprep.mubr.bf16.mxu1 %v7719_v21  ;;  %v1819_v60 = vadd.f32 %v1818_v19, %v8636_v14  ;;  %v2048_v11 = vadd.f32 %v2047_v40, %v8631_v26  ;;  %v3645_v4 = vmax.f32 %v1817_v44, 0.0 }
 0x1ac   : > { %v1820_v51 = vpop.f32.mrf.mxu0  ;;  %v2049_v53 = vpop.f32.mrf.mxu1 }
 0x1ad   : > { %v1821_v15 = vadd.f32 %v1820_v51, %v8636_v14  ;;  %v2050_v58 = vadd.f32 %v2049_v53, %v8631_v26  ;;  %v3660_v32 = vmax.f32 %v1819_v60, 0.0  ;;  %v3646_v61 = vmax.f32 %v2048_v11, 0.0  ;;  %v8689_v53 = vpop.permute.xlu0 %1286 }
 0x1ae   : > { %v1824_v23 = vpop.f32.mrf.mxu0  ;;  %v2051_v41 = vpop.f32.mrf.mxu1  ;;  %6726 = vmatmul.mubr.msk.bf16.gmra.mxu0 %vm1719_vm8, %v8288_v34  ;;  %v7165_v1 = vpack.c.bf16 %v3645_v4, %v3644_v56 }
 0x1af   : > { %2338 = vmatprep.mubr.bf16.mxu0 %v7719_v21  ;;  %v2052_v33 = vadd.f32 %v2051_v41, %v8636_v14  ;;  %v3661_v37 = vmax.f32 %v1821_v15, 0.0  ;;  %v3647_v9 = vmax.f32 %v2050_v58, 0.0  ;;  %v1825_v47 = vadd.f32 %v1824_v23, %v8646_v50 }
 0x1b0   : > { %v1826_v48 = vpop.f32.mrf.mxu0  ;;  %v2053_v55 = vpop.f32.mrf.mxu1  ;;  %6204 = vst [vmem:[%s8663_s26] sm:$0xff] %v7165_v1 }
 0x1b1   : > { %v2054_v13 = vadd.f32 %v2053_v55, %v8636_v14  ;;  %v7173_v5 = vpack.c.bf16 %v3661_v37, %v3660_v32  ;;  %v7166_v45 = vpack.c.bf16 %v3647_v9, %v3646_v61  ;;  %v1827_v54 = vadd.f32 %v1826_v48, %v8646_v50 }
 0x1b2   : > { %v1828_v31 = vpop.f32.mrf.mxu0  ;;  %v2057_v22 = vpop.f32.mrf.mxu1  ;;  %6746 = vmatmul.mubr.msk.bf16.gmra.mxu1 %vm1719_vm8, %v8288_v34  ;;  %v3676_v6 = vmax.f32 %v1825_v47, 0.0  ;;  %v3662_v25 = vmax.f32 %v2052_v33, 0.0 }
 0x1b3   : > { %v3663_v49 = vmax.f32 %v2054_v13, 0.0  ;;  %6215 = vst [vmem:[%s8663_s26 + $0x40] sm:$0xff] %v7173_v5  ;;  %6205 = vst [vmem:[%s8663_s26 + $0x8] sm:$0xff] %v7166_v45  ;;  %2571 = vmatprep.mubr.bf16.mxu1 %v7719_v21  ;;  %v2058_v28 = vadd.f32 %v2057_v22, %v8646_v50  ;;  %v1829_v57 = vadd.f32 %v1828_v31, %v8659_v12  ;;  %v3677_v34 = vmax.f32 %v1827_v54, 0.0 }
 0x1b4   : > { %v1830_v17 = vpop.f32.mrf.mxu0  ;;  %v2059_v30 = vpop.f32.mrf.mxu1 }
 0x1b5   : > { %v7174_v42 = vpack.c.bf16 %v3663_v49, %v3662_v25  ;;  %v2060_v52 = vadd.f32 %v2059_v30, %v8646_v50  ;;  %v1831_v24 = vadd.f32 %v1830_v17, %v8659_v12  ;;  %v3678_v19 = vmax.f32 %v2058_v28, 0.0 }
 0x1b6   : > { %v1834_v38 = vpop.f32.mrf.mxu0  ;;  %v2061_v44 = vpop.f32.mrf.mxu1  ;;  %6727 = vmatmul.mubr.msk.bf16.gmra.mxu0 %vm1719_vm8, %v8343_v36  ;;  %v7181_v40 = vpack.c.bf16 %v3677_v34, %v3676_v6  ;;  %v3692_v56 = vmax.f32 %v1829_v57, 0.0 }
 0x1b7   : > { %6216 = vst [vmem:[%s8663_s26 + $0x48] sm:$0xff] %v7174_v42  ;;  %2348 = vmatprep.mubr.bf16.mxu0 %v7719_v21  ;;  %v3679_v60 = vmax.f32 %v2060_v52, 0.0  ;;  %v2062_v11 = vadd.f32 %v2061_v44, %v8659_v12  ;;  %v3693_v4 = vmax.f32 %v1831_v24, 0.0  ;;  %v1835_v51 = vadd.f32 %v1834_v38, %v8679_v29  ;;  %v8711_v42 = vpop.permute.xlu0 %1296 }
 0x1b8   : > { %v1836_v15 = vpop.f32.mrf.mxu0  ;;  %v2063_v58 = vpop.f32.mrf.mxu1  ;;  %6223 = vst [vmem:[%s8663_s26 + $0x80] sm:$0xff] %v7181_v40 }
 0x1b9   : > { %v7182_v23 = vpack.c.bf16 %v3679_v60, %v3678_v19  ;;  %v2064_v41 = vadd.f32 %v2063_v58, %v8659_v12  ;;  %v7189_v32 = vpack.c.bf16 %v3693_v4, %v3692_v56  ;;  %v1837_v33 = vadd.f32 %v1836_v15, %v8679_v29 }
 0x1ba   : > { %v1838_v61 = vpop.f32.mrf.mxu0  ;;  %v2067_v1 = vpop.f32.mrf.mxu1  ;;  %6747 = vmatmul.mubr.msk.bf16.gmra.mxu1 %vm1719_vm8, %v8343_v36  ;;  %v3708_v37 = vmax.f32 %v1835_v51, 0.0  ;;  %v3694_v9 = vmax.f32 %v2062_v11, 0.0 }
 0x1bb   : > { %6224 = vst [vmem:[%s8663_s26 + $0x88] sm:$0xff] %v7182_v23  ;;  %v3695_v47 = vmax.f32 %v2064_v41, 0.0  ;;  %6231 = vst [vmem:[%s8663_s26 + $0xc0] sm:$0xff] %v7189_v32  ;;  %2581 = vmatprep.mubr.bf16.mxu1 %v7719_v21  ;;  %v2068_v48 = vadd.f32 %v2067_v1, %v8679_v29  ;;  %v1839_v55 = vadd.f32 %v1838_v61, %v8689_v53  ;;  %v3709_v45 = vmax.f32 %v1837_v33, 0.0  ;;  %v8723_v23 = vpop.permute.xlu1 %1301 }
 0x1bc   : > { %v1840_v13 = vpop.f32.mrf.mxu0  ;;  %v2069_v5 = vpop.f32.mrf.mxu1 }
 0x1bd   : > { %v7190_v36 = vpack.c.bf16 %v3695_v47, %v3694_v9  ;;  %v2070_v31 = vadd.f32 %v2069_v5, %v8679_v29  ;;  %v1841_v22 = vadd.f32 %v1840_v13, %v8689_v53  ;;  %v3710_v25 = vmax.f32 %v2068_v48, 0.0 }
 0x1be   : > { %v1844_v54 = vpop.f32.mrf.mxu0  ;;  %v2071_v6 = vpop.f32.mrf.mxu1  ;;  %6728 = vmatmul.mubr.msk.bf16.gmra.mxu0 %vm1719_vm8, %v8394_v0  ;;  %v7197_v49 = vpack.c.bf16 %v3709_v45, %v3708_v37  ;;  %v3724_v28 = vmax.f32 %v1839_v55, 0.0 }
 0x1bf   : > { %6232 = vst [vmem:[%s8663_s26 + $0xc8] sm:$0xff] %v7190_v36  ;;  %2358 = vmatprep.mubr.bf16.mxu0 %v7719_v21  ;;  %v3711_v57 = vmax.f32 %v2070_v31, 0.0  ;;  %v2072_v17 = vadd.f32 %v2071_v6, %v8689_v53  ;;  %v3725_v30 = vmax.f32 %v1841_v22, 0.0  ;;  %v1845_v34 = vadd.f32 %v1844_v54, %v8701_v59  ;;  %v8733_v31 = vpop.permute.xlu0 %1306 }
 0x1c0   : > { %v1846_v52 = vpop.f32.mrf.mxu0  ;;  %v2073_v24 = vpop.f32.mrf.mxu1  ;;  %6239 = vst [vmem:[%s8663_s26 + $0x100] sm:$0xff] %v7197_v49 }
 0x1c1   : > { %v7198_v38 = vpack.c.bf16 %v3711_v57, %v3710_v25  ;;  %v2074_v44 = vadd.f32 %v2073_v24, %v8689_v53  ;;  %v7205_v19 = vpack.c.bf16 %v3725_v30, %v3724_v28  ;;  %v1847_v60 = vadd.f32 %v1846_v52, %v8701_v59 }
 0x1c2   : > { %v1848_v40 = vpop.f32.mrf.mxu0  ;;  %v2077_v56 = vpop.f32.mrf.mxu1  ;;  %6748 = vmatmul.mubr.msk.bf16.gmra.mxu1 %vm1719_vm8, %v8394_v0  ;;  %v3740_v11 = vmax.f32 %v1845_v34, 0.0  ;;  %v3726_v4 = vmax.f32 %v2072_v17, 0.0 }
 0x1c3   : > { %6240 = vst [vmem:[%s8663_s26 + $0x108] sm:$0xff] %v7198_v38  ;;  %v3727_v51 = vmax.f32 %v2074_v44, 0.0  ;;  %6247 = vst [vmem:[%s8663_s26 + $0x140] sm:$0xff] %v7205_v19  ;;  %2591 = vmatprep.mubr.bf16.mxu1 %v7719_v21  ;;  %v2078_v15 = vadd.f32 %v2077_v56, %v8701_v59  ;;  %v1849_v58 = vadd.f32 %v1848_v40, %v8711_v42  ;;  %v3741_v61 = vmax.f32 %v1847_v60, 0.0  ;;  %v8745_v44 = vpop.permute.xlu1 %1311 }
 0x1c4   : > { %v1850_v41 = vpop.f32.mrf.mxu0  ;;  %v2079_v32 = vpop.f32.mrf.mxu1 }
 0x1c5   : > { %v7206_v0 = vpack.c.bf16 %v3727_v51, %v3726_v4  ;;  %v2080_v1 = vadd.f32 %v2079_v32, %v8701_v59  ;;  %v1851_v33 = vadd.f32 %v1850_v41, %v8711_v42  ;;  %v3742_v47 = vmax.f32 %v2078_v15, 0.0 }
 0x1c6   : > { %v1854_v37 = vpop.f32.mrf.mxu0  ;;  %v2081_v9 = vpop.f32.mrf.mxu1  ;;  %6729 = vmatmul.mubr.msk.bf16.gmra.mxu0 %vm1719_vm8, %v8421_v10  ;;  %v7213_v48 = vpack.c.bf16 %v3741_v61, %v3740_v11  ;;  %v3756_v55 = vmax.f32 %v1849_v58, 0.0 }
 0x1c7   : > { %6248 = vst [vmem:[%s8663_s26 + $0x148] sm:$0xff] %v7206_v0  ;;  %2368 = vmatprep.mubr.bf16.mxu0 %v7719_v21  ;;  %v3743_v13 = vmax.f32 %v2080_v1, 0.0  ;;  %v2082_v5 = vadd.f32 %v2081_v9, %v8711_v42  ;;  %v3757_v45 = vmax.f32 %v1851_v33, 0.0  ;;  %v1855_v36 = vadd.f32 %v1854_v37, %v8723_v23  ;;  %v8755_v33 = vpop.permute.xlu0 %1316 }
 0x1c8   : > { %v1856_v22 = vpop.f32.mrf.mxu0  ;;  %v2083_v54 = vpop.f32.mrf.mxu1  ;;  %6255 = vst [vmem:[%s8663_s26 + $0x180] sm:$0xff] %v7213_v48 }
 0x1c9   : > { %v7214_v6 = vpack.c.bf16 %v3743_v13, %v3742_v47  ;;  %v2084_v25 = vadd.f32 %v2083_v54, %v8711_v42  ;;  %v7221_v49 = vpack.c.bf16 %v3757_v45, %v3756_v55  ;;  %v1857_v17 = vadd.f32 %v1856_v22, %v8723_v23 }
 0x1ca   : > { %v1858_v28 = vpop.f32.mrf.mxu0  ;;  %v2087_v57 = vpop.f32.mrf.mxu1  ;;  %6749 = vmatmul.mubr.msk.bf16.gmra.mxu1 %vm1719_vm8, %v8421_v10  ;;  %v3772_v30 = vmax.f32 %v1855_v36, 0.0  ;;  %v3758_v34 = vmax.f32 %v2082_v5, 0.0 }
 0x1cb   : > { %6256 = vst [vmem:[%s8663_s26 + $0x188] sm:$0xff] %v7214_v6  ;;  %v3759_v52 = vmax.f32 %v2084_v25, 0.0  ;;  %6263 = vst [vmem:[%s8663_s26 + $0x1c0] sm:$0xff] %v7221_v49  ;;  %2601 = vmatprep.mubr.bf16.mxu1 %v7719_v21  ;;  %v2088_v24 = vadd.f32 %v2087_v57, %v8723_v23  ;;  %v1859_v38 = vadd.f32 %v1858_v28, %v8733_v31  ;;  %v3773_v56 = vmax.f32 %v1857_v17, 0.0  ;;  %v8767_v49 = vpop.permute.xlu1 %1321 }
 0x1cc   : > { %v1860_v19 = vpop.f32.mrf.mxu0  ;;  %v2089_v40 = vpop.f32.mrf.mxu1 }
 0x1cd   : > { %v7222_v10 = vpack.c.bf16 %v3759_v52, %v3758_v34  ;;  %v2090_v60 = vadd.f32 %v2089_v40, %v8723_v23  ;;  %v1861_v11 = vadd.f32 %v1860_v19, %v8733_v31  ;;  %v3774_v15 = vmax.f32 %v2088_v24, 0.0 }
 0x1ce   : > { %v1864_v4 = vpop.f32.mrf.mxu0  ;;  %v2091_v51 = vpop.f32.mrf.mxu1  ;;  %6730 = vmatmul.mubr.msk.bf16.gmra.mxu0 %vm1719_vm8, %v8442_v7  ;;  %v7229_v58 = vpack.c.bf16 %v3773_v56, %v3772_v30  ;;  %v3788_v41 = vmax.f32 %v1859_v38, 0.0 }
 0x1cf   : > { %6264 = vst [vmem:[%s8663_s26 + $0x1c8] sm:$0xff] %v7222_v10  ;;  %2378 = vmatprep.mubr.bf16.mxu0 %v7719_v21  ;;  %v3775_v32 = vmax.f32 %v2090_v60, 0.0  ;;  %v2092_v61 = vadd.f32 %v2091_v51, %v8733_v31  ;;  %v3789_v0 = vmax.f32 %v1861_v11, 0.0  ;;  %v1865_v1 = vadd.f32 %v1864_v4, %v8745_v44  ;;  %v8777_v4 = vpop.permute.xlu0 %1326 }
 0x1d0   : > { %v1866_v37 = vpop.f32.mrf.mxu0  ;;  %v2093_v9 = vpop.f32.mrf.mxu1  ;;  %6271 = vst [vmem:[%s8663_s26 + $0x200] sm:$0xff] %v7229_v58 }
 0x1d1   : > { %v7230_v47 = vpack.c.bf16 %v3775_v32, %v3774_v15  ;;  %v2094_v48 = vadd.f32 %v2093_v9, %v8733_v31  ;;  %v7237_v55 = vpack.c.bf16 %v3789_v0, %v3788_v41  ;;  %v1867_v45 = vadd.f32 %v1866_v37, %v8745_v44 }
 0x1d2   : > { %v1868_v13 = vpop.f32.mrf.mxu0  ;;  %v2097_v5 = vpop.f32.mrf.mxu1  ;;  %6750 = vmatmul.mubr.msk.bf16.gmra.mxu1 %vm1719_vm8, %v8442_v7  ;;  %v3804_v36 = vmax.f32 %v1865_v1, 0.0  ;;  %v3790_v22 = vmax.f32 %v2092_v61, 0.0 }
 0x1d3   : > { %6272 = vst [vmem:[%s8663_s26 + $0x208] sm:$0xff] %v7230_v47  ;;  %v3791_v54 = vmax.f32 %v2094_v48, 0.0  ;;  %6279 = vst [vmem:[%s8663_s26 + $0x240] sm:$0xff] %v7237_v55  ;;  %2611 = vmatprep.mubr.bf16.mxu1 %v7719_v21  ;;  %v2098_v6 = vadd.f32 %v2097_v5, %v8745_v44  ;;  %v1869_v25 = vadd.f32 %v1868_v13, %v8755_v33  ;;  %v3805_v17 = vmax.f32 %v1867_v45, 0.0  ;;  %v8789_v13 = vpop.permute.xlu1 %1331 }
 0x1d4   : > { %v1870_v28 = vpop.f32.mrf.mxu0  ;;  %v2099_v57 = vpop.f32.mrf.mxu1 }
 0x1d5   : > { %v7238_v7 = vpack.c.bf16 %v3791_v54, %v3790_v22  ;;  %v2100_v30 = vadd.f32 %v2099_v57, %v8745_v44  ;;  %v1871_v34 = vadd.f32 %v1870_v28, %v8755_v33  ;;  %v3806_v38 = vmax.f32 %v2098_v6, 0.0 }
 0x1d6   : > { %v1874_v52 = vpop.f32.mrf.mxu0  ;;  %v2101_v24 = vpop.f32.mrf.mxu1  ;;  %6731 = vmatmul.mubr.msk.bf16.gmra.mxu0 %vm1719_vm8, %v8467_v2  ;;  %v7245_v19 = vpack.c.bf16 %v3805_v17, %v3804_v36  ;;  %v3820_v40 = vmax.f32 %v1869_v25, 0.0 }
 0x1d7   : > { %6280 = vst [vmem:[%s8663_s26 + $0x248] sm:$0xff] %v7238_v7  ;;  %2388 = vmatprep.mubr.bf16.mxu0 %v7719_v21  ;;  %v3807_v56 = vmax.f32 %v2100_v30, 0.0  ;;  %v2102_v10 = vadd.f32 %v2101_v24, %v8755_v33  ;;  %v3821_v60 = vmax.f32 %v1871_v34, 0.0  ;;  %v1875_v11 = vadd.f32 %v1874_v52, %v8767_v49  ;;  %v8799_v24 = vpop.permute.xlu0 %1336 }
 0x1d8   : > { %v1876_v51 = vpop.f32.mrf.mxu0  ;;  %v2103_v15 = vpop.f32.mrf.mxu1  ;;  %6287 = vst [vmem:[%s8663_s26 + $0x280] sm:$0xff] %v7245_v19 }
 0x1d9   : > { %v7246_v58 = vpack.c.bf16 %v3807_v56, %v3806_v38  ;;  %v2104_v41 = vadd.f32 %v2103_v15, %v8755_v33  ;;  %v7253_v32 = vpack.c.bf16 %v3821_v60, %v3820_v40  ;;  %v1877_v1 = vadd.f32 %v1876_v51, %v8767_v49 }
 0x1da   : > { %v1878_v61 = vpop.f32.mrf.mxu0  ;;  %v2107_v0 = vpop.f32.mrf.mxu1  ;;  %6751 = vmatmul.mubr.msk.bf16.gmra.mxu1 %vm1719_vm8, %v8467_v2  ;;  %v3836_v37 = vmax.f32 %v1875_v11, 0.0  ;;  %v3822_v9 = vmax.f32 %v2102_v10, 0.0 }
 0x1db   : > { %6288 = vst [vmem:[%s8663_s26 + $0x288] sm:$0xff] %v7246_v58  ;;  %v3823_v47 = vmax.f32 %v2104_v41, 0.0  ;;  %6295 = vst [vmem:[%s8663_s26 + $0x2c0] sm:$0xff] %v7253_v32  ;;  %2621 = vmatprep.mubr.bf16.mxu1 %v7719_v21  ;;  %v2108_v48 = vadd.f32 %v2107_v0, %v8767_v49  ;;  %v1879_v55 = vadd.f32 %v1878_v61, %v8777_v4  ;;  %v3837_v36 = vmax.f32 %v1877_v1, 0.0  ;;  %v8811_v0 = vpop.permute.xlu1 %1341 }
 0x1dc   : > { %v1880_v5 = vpop.f32.mrf.mxu0  ;;  %v2109_v45 = vpop.f32.mrf.mxu1 }
 0x1dd   : > { %v7254_v2 = vpack.c.bf16 %v3823_v47, %v3822_v9  ;;  %v2110_v22 = vadd.f32 %v2109_v45, %v8767_v49  ;;  %v1881_v54 = vadd.f32 %v1880_v5, %v8777_v4  ;;  %v3838_v28 = vmax.f32 %v2108_v48, 0.0 }
 0x1de   : > { %v1884_v6 = vpop.f32.mrf.mxu0  ;;  %v2111_v25 = vpop.f32.mrf.mxu1  ;;  %6732 = vmatmul.mubr.msk.bf16.gmra.mxu0 %vm1719_vm8, %v8500_v20  ;;  %v7261_v57 = vpack.c.bf16 %v3837_v36, %v3836_v37  ;;  %v3852_v17 = vmax.f32 %v1879_v55, 0.0 }
 0x1df   : > { %6296 = vst [vmem:[%s8663_s26 + $0x2c8] sm:$0xff] %v7254_v2  ;;  %2398 = vmatprep.mubr.bf16.mxu0 %v7719_v21  ;;  %v3839_v7 = vmax.f32 %v2110_v22, 0.0  ;;  %v2112_v30 = vadd.f32 %v2111_v25, %v8777_v4  ;;  %v3853_v34 = vmax.f32 %v1881_v54, 0.0  ;;  %v1885_v52 = vadd.f32 %v1884_v6, %v8789_v13 }
 0x1e0   : > { %v1886_v38 = vpop.f32.mrf.mxu0  ;;  %v2113_v19 = vpop.f32.mrf.mxu1  ;;  %6303 = vst [vmem:[%s8663_s26 + $0x300] sm:$0xff] %v7261_v57 }
 0x1e1   : > { %v7262_v40 = vpack.c.bf16 %v3839_v7, %v3838_v28  ;;  %v2114_v56 = vadd.f32 %v2113_v19, %v8777_v4  ;;  %v7269_v10 = vpack.c.bf16 %v3853_v34, %v3852_v17  ;;  %v1887_v51 = vadd.f32 %v1886_v38, %v8789_v13  ;;  %v8821_v28 = vpop.permute.xlu0 %1346 }
 0x1e2   : > { %v1888_v60 = vpop.f32.mrf.mxu0  ;;  %v2117_v11 = vpop.f32.mrf.mxu1  ;;  %6752 = vmatmul.mubr.msk.bf16.gmra.mxu1 %vm1719_vm8, %v8500_v20  ;;  %v3868_v15 = vmax.f32 %v1885_v52, 0.0  ;;  %v3854_v58 = vmax.f32 %v2112_v30, 0.0 }
 0x1e3   : > { %6304 = vst [vmem:[%s8663_s26 + $0x308] sm:$0xff] %v7262_v40  ;;  %v3855_v41 = vmax.f32 %v2114_v56, 0.0  ;;  %6311 = vst [vmem:[%s8663_s26 + $0x340] sm:$0xff] %v7269_v10  ;;  %2631 = vmatprep.mubr.bf16.mxu1 %v7719_v21  ;;  %v2118_v32 = vadd.f32 %v2117_v11, %v8789_v13  ;;  %v1889_v61 = vadd.f32 %v1888_v60, %v8799_v24  ;;  %v3869_v9 = vmax.f32 %v1887_v51, 0.0  ;;  %v8833_v51 = vpop.permute.xlu1 %1351 }
 0x1e4   : > { %v1890_v1 = vpop.f32.mrf.mxu0  ;;  %v2119_v37 = vpop.f32.mrf.mxu1 }
 0x1e5   : > { %v7270_v20 = vpack.c.bf16 %v3855_v41, %v3854_v58  ;;  %v2120_v47 = vadd.f32 %v2119_v37, %v8789_v13  ;;  %v1891_v48 = vadd.f32 %v1890_v1, %v8799_v24  ;;  %v3870_v45 = vmax.f32 %v2118_v32, 0.0 }
 0x1e6   : > { %v1894_v55 = vpop.f32.mrf.mxu0  ;;  %v2121_v5 = vpop.f32.mrf.mxu1  ;;  %6733 = vmatmul.mubr.msk.bf16.gmra.mxu0 %vm1719_vm8, %v8517_v8  ;;  %v7277_v36 = vpack.c.bf16 %v3869_v9, %v3868_v15  ;;  %v3884_v2 = vmax.f32 %v1889_v61, 0.0 }
 0x1e7   : > { %6312 = vst [vmem:[%s8663_s26 + $0x348] sm:$0xff] %v7270_v20  ;;  %2408 = vmatprep.mubr.bf16.mxu0 %v7719_v21  ;;  %v3871_v22 = vmax.f32 %v2120_v47, 0.0  ;;  %v2122_v54 = vadd.f32 %v2121_v5, %v8799_v24  ;;  %v3885_v6 = vmax.f32 %v1891_v48, 0.0  ;;  %v1895_v25 = vadd.f32 %v1894_v55, %v8811_v0 }
 0x1e8   : > { %v1896_v57 = vpop.f32.mrf.mxu0  ;;  %v2123_v17 = vpop.f32.mrf.mxu1  ;;  %6319 = vst [vmem:[%s8663_s26 + $0x380] sm:$0xff] %v7277_v36 }
 0x1e9   : > { %v7278_v7 = vpack.c.bf16 %v3871_v22, %v3870_v45  ;;  %v2124_v30 = vadd.f32 %v2123_v17, %v8799_v24  ;;  %v7285_v34 = vpack.c.bf16 %v3885_v6, %v3884_v2  ;;  %v1897_v19 = vadd.f32 %v1896_v57, %v8811_v0  ;;  %v8843_v36 = vpop.permute.xlu0 %1356 }
 0x1ea   : > { %v1898_v52 = vpop.f32.mrf.mxu0  ;;  %v2127_v38 = vpop.f32.mrf.mxu1  ;;  %6753 = vmatmul.mubr.msk.bf16.gmra.mxu1 %vm1719_vm8, %v8517_v8  ;;  %v3900_v40 = vmax.f32 %v1895_v25, 0.0  ;;  %v3886_v56 = vmax.f32 %v2122_v54, 0.0 }
 0x1eb   : > { %6320 = vst [vmem:[%s8663_s26 + $0x388] sm:$0xff] %v7278_v7  ;;  %v3887_v10 = vmax.f32 %v2124_v30, 0.0  ;;  %6327 = vst [vmem:[%s8663_s26 + $0x3c0] sm:$0xff] %v7285_v34  ;;  %2641 = vmatprep.mubr.bf16.mxu1 %v7719_v21  ;;  %v2128_v60 = vadd.f32 %v2127_v38, %v8811_v0  ;;  %v1899_v11 = vadd.f32 %v1898_v52, %v8821_v28  ;;  %v3901_v41 = vmax.f32 %v1897_v19, 0.0 }
 0x1ec   : > { %v1900_v15 = vpop.f32.mrf.mxu0  ;;  %v2129_v58 = vpop.f32.mrf.mxu1 }
 0x1ed   : > { %v7286_v8 = vpack.c.bf16 %v3887_v10, %v3886_v56  ;;  %v2130_v32 = vadd.f32 %v2129_v58, %v8811_v0  ;;  %v1901_v61 = vadd.f32 %v1900_v15, %v8821_v28  ;;  %v3902_v9 = vmax.f32 %v2128_v60, 0.0 }
 0x1ee   : > { %v1904_v1 = vpop.f32.mrf.mxu0  ;;  %v2131_v37 = vpop.f32.mrf.mxu1  ;;  %6734 = vmatmul.mubr.msk.bf16.gmra.mxu0 %vm1719_vm8, %v8534_v35  ;;  %v7293_v20 = vpack.c.bf16 %v3901_v41, %v3900_v40  ;;  %v3916_v47 = vmax.f32 %v1899_v11, 0.0 }
 0x1ef   : > { %6328 = vst [vmem:[%s8663_s26 + $0x3c8] sm:$0xff] %v7286_v8  ;;  %2418 = vmatprep.mubr.bf16.mxu0 %v7719_v21  ;;  %v3903_v48 = vmax.f32 %v2130_v32, 0.0  ;;  %v2132_v55 = vadd.f32 %v2131_v37, %v8821_v28  ;;  %v3917_v5 = vmax.f32 %v1901_v61, 0.0  ;;  %v1905_v45 = vadd.f32 %v1904_v1, %v8833_v51  ;;  %v8855_v40 = vpop.permute.xlu1 %1361 }
 0x1f0   : > { %v1906_v2 = vpop.f32.mrf.mxu0  ;;  %v2133_v22 = vpop.f32.mrf.mxu1  ;;  %6335 = vst [vmem:[%s8663_s26 + $0x400] sm:$0xff] %v7293_v20 }
 0x1f1   : > { %v7294_v54 = vpack.c.bf16 %v3903_v48, %v3902_v9  ;;  %v2134_v6 = vadd.f32 %v2133_v22, %v8821_v28  ;;  %v7301_v25 = vpack.c.bf16 %v3917_v5, %v3916_v47  ;;  %v1907_v7 = vadd.f32 %v1906_v2, %v8833_v51  ;;  %v8865_v47 = vpop.permute.xlu0 %1366 }
 0x1f2   : > { %v1908_v57 = vpop.f32.mrf.mxu0  ;;  %v2137_v17 = vpop.f32.mrf.mxu1  ;;  %6754 = vmatmul.mubr.msk.bf16.gmra.mxu1 %vm1719_vm8, %v8534_v35  ;;  %v3932_v30 = vmax.f32 %v1905_v45, 0.0  ;;  %v3918_v34 = vmax.f32 %v2132_v55, 0.0 }
 0x1f3   : > { %6336 = vst [vmem:[%s8663_s26 + $0x408] sm:$0xff] %v7294_v54  ;;  %v3919_v52 = vmax.f32 %v2134_v6, 0.0  ;;  %6343 = vst [vmem:[%s8663_s26 + $0x440] sm:$0xff] %v7301_v25  ;;  %2651 = vmatprep.mubr.bf16.mxu1 %v7719_v21  ;;  %v2138_v38 = vadd.f32 %v2137_v17, %v8833_v51  ;;  %v1909_v19 = vadd.f32 %v1908_v57, %v8843_v36  ;;  %v3933_v60 = vmax.f32 %v1907_v7, 0.0 }
 0x1f4   : > { %v1910_v56 = vpop.f32.mrf.mxu0  ;;  %v2139_v10 = vpop.f32.mrf.mxu1 }
 0x1f5   : > { %v7302_v35 = vpack.c.bf16 %v3919_v52, %v3918_v34  ;;  %v2140_v11 = vadd.f32 %v2139_v10, %v8833_v51  ;;  %v1911_v15 = vadd.f32 %v1910_v56, %v8843_v36  ;;  %v3934_v8 = vmax.f32 %v2138_v38, 0.0  ;;  %v8877_v34 = vpop.permute.xlu1 %1371 }
 0x1f6   : > { %v1914_v58 = vpop.f32.mrf.mxu0  ;;  %v2141_v41 = vpop.f32.mrf.mxu1  ;;  %6735 = vmatmul.mubr.msk.bf16.gmra.mxu0 %vm1719_vm8, %v8545_v63  ;;  %v7309_v32 = vpack.c.bf16 %v3933_v60, %v3932_v30  ;;  %v3948_v61 = vmax.f32 %v1909_v19, 0.0 }
 0x1f7   : > { %6344 = vst [vmem:[%s8663_s26 + $0x448] sm:$0xff] %v7302_v35  ;;  %2428 = vmatprep.mubr.bf16.mxu0 %v7719_v21  ;;  %v3935_v1 = vmax.f32 %v2140_v11, 0.0  ;;  %v2142_v37 = vadd.f32 %v2141_v41, %v8843_v36  ;;  %v3949_v9 = vmax.f32 %v1911_v15, 0.0  ;;  %v1915_v20 = vadd.f32 %v1914_v58, %v8855_v40 }
 0x1f8   : > { %v1916_v48 = vpop.f32.mrf.mxu0  ;;  %v2143_v55 = vpop.f32.mrf.mxu1  ;;  %6351 = vst [vmem:[%s8663_s26 + $0x480] sm:$0xff] %v7309_v32 }
 0x1f9   : > { %v7310_v5 = vpack.c.bf16 %v3935_v1, %v3934_v8  ;;  %v2144_v45 = vadd.f32 %v2143_v55, %v8843_v36  ;;  %v7317_v2 = vpack.c.bf16 %v3949_v9, %v3948_v61  ;;  %v1917_v6 = vadd.f32 %v1916_v48, %v8855_v40  ;;  %v8887_v1 = vpop.permute.xlu0 %1376 }
 0x1fa   : > { %v1918_v22 = vpop.f32.mrf.mxu0  ;;  %v2147_v54 = vpop.f32.mrf.mxu1  ;;  %6755 = vmatmul.mubr.msk.bf16.gmra.mxu1 %vm1719_vm8, %v8545_v63  ;;  %v3964_v25 = vmax.f32 %v1915_v20, 0.0  ;;  %v3950_v57 = vmax.f32 %v2142_v37, 0.0 }
 0x1fb   : > { %6352 = vst [vmem:[%s8663_s26 + $0x488] sm:$0xff] %v7310_v5  ;;  %v3951_v17 = vmax.f32 %v2144_v45, 0.0  ;;  %6359 = vst [vmem:[%s8663_s26 + $0x4c0] sm:$0xff] %v7317_v2  ;;  %2661 = vmatprep.mubr.bf16.mxu1 %v7719_v21  ;;  %v2148_v7 = vadd.f32 %v2147_v54, %v8855_v40  ;;  %v1919_v30 = vadd.f32 %v1918_v22, %v8865_v47  ;;  %v3965_v19 = vmax.f32 %v1917_v6, 0.0 }
 0x1fc   : > { %v1920_v52 = vpop.f32.mrf.mxu0  ;;  %v2149_v38 = vpop.f32.mrf.mxu1 }
 0x1fd   : > { %v7318_v63 = vpack.c.bf16 %v3951_v17, %v3950_v57  ;;  %v2150_v56 = vadd.f32 %v2149_v38, %v8855_v40  ;;  %v1921_v10 = vadd.f32 %v1920_v52, %v8865_v47  ;;  %v3966_v11 = vmax.f32 %v2148_v7, 0.0  ;;  %v8899_v17 = vpop.permute.xlu1 %1381 }
 0x1fe   : > { %v1924_v60 = vpop.f32.mrf.mxu0  ;;  %v2151_v35 = vpop.f32.mrf.mxu1  ;;  %6736 = vmatmul.mubr.msk.bf16.gmra.mxu0 %vm1719_vm8, %v8556_v46  ;;  %v7325_v15 = vpack.c.bf16 %v3965_v19, %v3964_v25  ;;  %v3980_v58 = vmax.f32 %v1919_v30, 0.0 }
 0x1ff   : > { %6360 = vst [vmem:[%s8663_s26 + $0x4c8] sm:$0xff] %v7318_v63  ;;  %2438 = vmatprep.mubr.bf16.mxu0 %v7719_v21  ;;  %v3967_v41 = vmax.f32 %v2150_v56, 0.0  ;;  %v2152_v8 = vadd.f32 %v2151_v35, %v8865_v47  ;;  %v3981_v32 = vmax.f32 %v1921_v10, 0.0  ;;  %v1925_v61 = vadd.f32 %v1924_v60, %v8877_v34 }
 0x200   : > { %v1926_v37 = vpop.f32.mrf.mxu0  ;;  %v2153_v9 = vpop.f32.mrf.mxu1  ;;  %6367 = vst [vmem:[%s8663_s26 + $0x500] sm:$0xff] %v7325_v15 }
 0x201   : > { %v7326_v20 = vpack.c.bf16 %v3967_v41, %v3966_v11  ;;  %v2154_v48 = vadd.f32 %v2153_v9, %v8865_v47  ;;  %v7333_v55 = vpack.c.bf16 %v3981_v32, %v3980_v58  ;;  %v1927_v2 = vadd.f32 %v1926_v37, %v8877_v34 }
 0x202   : > { %v1928_v5 = vpop.f32.mrf.mxu0  ;;  %v2157_v45 = vpop.f32.mrf.mxu1  ;;  %6756 = vmatmul.mubr.msk.bf16.gmra.mxu1 %vm1719_vm8, %v8556_v46  ;;  %v3996_v22 = vmax.f32 %v1925_v61, 0.0  ;;  %v3982_v54 = vmax.f32 %v2152_v8, 0.0 }
 0x203   : > { %6368 = vst [vmem:[%s8663_s26 + $0x508] sm:$0xff] %v7326_v20  ;;  %v3983_v6 = vmax.f32 %v2154_v48, 0.0  ;;  %6375 = vst [vmem:[%s8663_s26 + $0x540] sm:$0xff] %v7333_v55  ;;  %2671 = vmatprep.mubr.bf16.mxu1 %v7719_v21  ;;  %v2158_v25 = vadd.f32 %v2157_v45, %v8877_v34  ;;  %v1929_v57 = vadd.f32 %v1928_v5, %v8887_v1  ;;  %v3997_v52 = vmax.f32 %v1927_v2, 0.0  ;;  %v8909_v8 = vpop.permute.xlu0 %1386  ;;  %v7572_v55 = vld [vmem:[%s10213_s1 + $0x80] sm:$0xff]  }
 0x204   : > { %v1930_v7 = vpop.f32.mrf.mxu0  ;;  %v2159_v30 = vpop.f32.mrf.mxu1 }
 0x205   : > { %v7334_v46 = vpack.c.bf16 %v3983_v6, %v3982_v54  ;;  %v2160_v38 = vadd.f32 %v2159_v30, %v8877_v34  ;;  %v1931_v19 = vadd.f32 %v1930_v7, %v8887_v1  ;;  %v3998_v10 = vmax.f32 %v2158_v25, 0.0  ;;  %v8923_v25 = vpop.permute.xlu1 %1391 }
 0x206   : > { %v1934_v63 = vpop.f32.mrf.mxu0  ;;  %v2161_v56 = vpop.f32.mrf.mxu1  ;;  %6737 = vmatmul.mubr.msk.bf16.gmra.mxu0 %vm1719_vm8, %v8569_v18  ;;  %v7341_v60 = vpack.c.bf16 %v3997_v52, %v3996_v22  ;;  %v4012_v35 = vmax.f32 %v1929_v57, 0.0 }
 0x207   : > { %6376 = vst [vmem:[%s8663_s26 + $0x548] sm:$0xff] %v7334_v46  ;;  %2448 = vmatprep.mubr.bf16.mxu0 %v7719_v21  ;;  %v3999_v11 = vmax.f32 %v2160_v38, 0.0  ;;  %v2162_v15 = vadd.f32 %v2161_v56, %v8887_v1  ;;  %v4013_v58 = vmax.f32 %v1931_v19, 0.0  ;;  %v1935_v41 = vadd.f32 %v1934_v63, %v8899_v17  ;;  %v7573_v56 = vld [vmem:[%s10213_s1 + $0x88] sm:$0xff]  }
 0x208   : > { %v1936_v32 = vpop.f32.mrf.mxu0  ;;  %v2163_v61 = vpop.f32.mrf.mxu1  ;;  %6383 = vst [vmem:[%s8663_s26 + $0x580] sm:$0xff] %v7341_v60 }
 0x209   : > { %v7342_v18 = vpack.c.bf16 %v3999_v11, %v3998_v10  ;;  %v2164_v37 = vadd.f32 %v2163_v61, %v8887_v1  ;;  %v7349_v9 = vpack.c.bf16 %v4013_v58, %v4012_v35  ;;  %v1937_v5 = vadd.f32 %v1936_v32, %v8899_v17  ;;  %v8935_v32 = vpop.permute.xlu0 %1396 }
 0x20a   : > { %v1938_v20 = vpop.f32.mrf.mxu0  ;;  %v2167_v48 = vpop.f32.mrf.mxu1  ;;  %6757 = vmatmul.mubr.msk.bf16.gmra.mxu1 %vm1719_vm8, %v7572_v55  ;;  %v4028_v45 = vmax.f32 %v1935_v41, 0.0  ;;  %v4014_v2 = vmax.f32 %v2162_v15, 0.0 }
 0x20b   : > { %6384 = vst [vmem:[%s8663_s26 + $0x588] sm:$0xff] %v7342_v18  ;;  %v4015_v22 = vmax.f32 %v2164_v37, 0.0  ;;  %6391 = vst [vmem:[%s8663_s26 + $0x5c0] sm:$0xff] %v7349_v9  ;;  %2681 = vmatprep.mubr.bf16.mxu1 %v7719_v21  ;;  %v2168_v54 = vadd.f32 %v2167_v48, %v8899_v17  ;;  %v1939_v6 = vadd.f32 %v1938_v20, %v8909_v8  ;;  %v4029_v30 = vmax.f32 %v1937_v5, 0.0 }
 0x20c   : > { %v1940_v57 = vpop.f32.mrf.mxu0  ;;  %v2169_v7 = vpop.f32.mrf.mxu1 }
 0x20d   : > { %v7350_v52 = vpack.c.bf16 %v4015_v22, %v4014_v2  ;;  %v2170_v46 = vadd.f32 %v2169_v7, %v8899_v17  ;;  %v1941_v38 = vadd.f32 %v1940_v57, %v8909_v8  ;;  %v4030_v10 = vmax.f32 %v2168_v54, 0.0  ;;  %v8946_v57 = vpop.permute.xlu1 %1401 }
 0x20e   : > { %v1944_v19 = vpop.f32.mrf.mxu0  ;;  %v2171_v63 = vpop.f32.mrf.mxu1  ;;  %6738 = vmatmul.mubr.msk.bf16.gmra.mxu0 %vm1719_vm8, %v7573_v56  ;;  %v7357_v60 = vpack.c.bf16 %v4029_v30, %v4028_v45  ;;  %v4044_v35 = vmax.f32 %v1939_v6, 0.0 }
 0x20f   : > { %6392 = vst [vmem:[%s8663_s26 + $0x5c8] sm:$0xff] %v7350_v52  ;;  %2458 = vmatprep.mubr.bf16.mxu0 %v7719_v21  ;;  %v4031_v11 = vmax.f32 %v2170_v46, 0.0  ;;  %v2172_v15 = vadd.f32 %v2171_v63, %v8909_v8  ;;  %v4045_v58 = vmax.f32 %v1941_v38, 0.0  ;;  %v1945_v41 = vadd.f32 %v1944_v19, %v8923_v25 }
 0x210   : > { %v1946_v61 = vpop.f32.mrf.mxu0  ;;  %v2173_v18 = vpop.f32.mrf.mxu1  ;;  %6399 = vst [vmem:[%s8663_s26 + $0x600] sm:$0xff] %v7357_v60 }
 0x211   : > { %v7358_v37 = vpack.c.bf16 %v4031_v11, %v4030_v10  ;;  %v2174_v9 = vadd.f32 %v2173_v18, %v8909_v8  ;;  %v7365_v20 = vpack.c.bf16 %v4045_v58, %v4044_v35  ;;  %v1947_v5 = vadd.f32 %v1946_v61, %v8923_v25  ;;  %v7574_v10 = vld [vmem:[%s10213_s1 + $0x90] sm:$0xff]   ;;  %v8958_v18 = vpop.permute.xlu0 %1406 }
 0x212   : > { %v1948_v48 = vpop.f32.mrf.mxu0  ;;  %v2177_v55 = vpop.f32.mrf.mxu1  ;;  %6758 = vmatmul.mubr.msk.bf16.gmra.mxu1 %vm1719_vm8, %v7573_v56  ;;  %v4060_v45 = vmax.f32 %v1945_v41, 0.0  ;;  %v4046_v2 = vmax.f32 %v2172_v15, 0.0 }
 0x213   : > { %6400 = vst [vmem:[%s8663_s26 + $0x608] sm:$0xff] %v7358_v37  ;;  %v4047_v22 = vmax.f32 %v2174_v9, 0.0  ;;  %6407 = vst [vmem:[%s8663_s26 + $0x640] sm:$0xff] %v7365_v20  ;;  %2691 = vmatprep.mubr.bf16.mxu1 %v7719_v21  ;;  %v2178_v54 = vadd.f32 %v2177_v55, %v8923_v25  ;;  %v1949_v6 = vadd.f32 %v1948_v48, %v8935_v32  ;;  %v4061_v52 = vmax.f32 %v1947_v5, 0.0 }
 0x214   : > { %v1950_v7 = vpop.f32.mrf.mxu0  ;;  %v2179_v30 = vpop.f32.mrf.mxu1 }
 0x215   : > { %v7366_v46 = vpack.c.bf16 %v4047_v22, %v4046_v2  ;;  %v2180_v38 = vadd.f32 %v2179_v30, %v8923_v25  ;;  %v1951_v19 = vadd.f32 %v1950_v7, %v8935_v32  ;;  %v4062_v60 = vmax.f32 %v2178_v54, 0.0 }
 0x216   : > { %v1954_v63 = vpop.f32.mrf.mxu0  ;;  %v2181_v56 = vpop.f32.mrf.mxu1  ;;  %6739 = vmatmul.mubr.msk.bf16.gmra.mxu0 %vm1719_vm8, %v7574_v10  ;;  %v7373_v35 = vpack.c.bf16 %v4061_v52, %v4060_v45  ;;  %v4076_v11 = vmax.f32 %v1949_v6, 0.0 }
 0x217   : > { %6408 = vst [vmem:[%s8663_s26 + $0x648] sm:$0xff] %v7366_v46  ;;  %2468 = vmatprep.mubr.bf16.mxu0 %v7719_v21  ;;  %v4063_v15 = vmax.f32 %v2180_v38, 0.0  ;;  %v2182_v58 = vadd.f32 %v2181_v56, %v8935_v32  ;;  %v4077_v41 = vmax.f32 %v1951_v19, 0.0  ;;  %v1955_v61 = vadd.f32 %v1954_v63, %v8946_v57  ;;  %v8969_v52 = vpop.permute.xlu1 %1411 }
 0x218   : > { %v1956_v37 = vpop.f32.mrf.mxu0  ;;  %v2183_v9 = vpop.f32.mrf.mxu1  ;;  %6415 = vst [vmem:[%s8663_s26 + $0x680] sm:$0xff] %v7373_v35 }
 0x219   : > { %v7374_v20 = vpack.c.bf16 %v4063_v15, %v4062_v60  ;;  %v2184_v48 = vadd.f32 %v2183_v9, %v8935_v32  ;;  %v7381_v55 = vpack.c.bf16 %v4077_v41, %v4076_v11  ;;  %v1957_v2 = vadd.f32 %v1956_v37, %v8946_v57  ;;  %v7575_v11 = vld [vmem:[%s10213_s1 + $0x98] sm:$0xff]  }
 0x21a   : > { %v1958_v5 = vpop.f32.mrf.mxu0  ;;  %v2187_v45 = vpop.f32.mrf.mxu1  ;;  %6759 = vmatmul.mubr.msk.bf16.gmra.mxu1 %vm1719_vm8, %v7574_v10  ;;  %v4092_v22 = vmax.f32 %v1955_v61, 0.0  ;;  %v4078_v54 = vmax.f32 %v2182_v58, 0.0 }
 0x21b   : > { %6416 = vst [vmem:[%s8663_s26 + $0x688] sm:$0xff] %v7374_v20  ;;  %v4079_v6 = vmax.f32 %v2184_v48, 0.0  ;;  %6423 = vst [vmem:[%s8663_s26 + $0x6c0] sm:$0xff] %v7381_v55  ;;  %2701 = vmatprep.mubr.bf16.mxu1 %v7719_v21  ;;  %v2188_v7 = vadd.f32 %v2187_v45, %v8946_v57  ;;  %v1959_v30 = vadd.f32 %v1958_v5, %v8958_v18  ;;  %v4093_v19 = vmax.f32 %v1957_v2, 0.0  ;;  %v8981_v48 = vpop.permute.xlu0 %1416 }
 0x21c   : > { %v1960_v46 = vpop.f32.mrf.mxu0  ;;  %v2189_v38 = vpop.f32.mrf.mxu1 }
 0x21d   : > { %v7382_v63 = vpack.c.bf16 %v4079_v6, %v4078_v54  ;;  %v2190_v56 = vadd.f32 %v2189_v38, %v8946_v57  ;;  %v1961_v10 = vadd.f32 %v1960_v46, %v8958_v18  ;;  %v4094_v15 = vmax.f32 %v2188_v7, 0.0 }
 0x21e   : > { %v1964_v60 = vpop.f32.mrf.mxu0  ;;  %v2191_v35 = vpop.f32.mrf.mxu1  ;;  %6740 = vmatmul.mubr.msk.bf16.gmra.mxu0 %vm1719_vm8, %v7575_v11  ;;  %v7389_v58 = vpack.c.bf16 %v4093_v19, %v4092_v22  ;;  %v4108_v41 = vmax.f32 %v1959_v30, 0.0  ;;  %v1193_v19 = vld [vmem:[#allocation2 + $0x30] sm:$0xff] }
 0x21f   : > { %6424 = vst [vmem:[%s8663_s26 + $0x6c8] sm:$0xff] %v7382_v63  ;;  %2744 = vmatprep.mubr.bf16.mxu0 %v7719_v21  ;;  %v4095_v61 = vmax.f32 %v2190_v56, 0.0  ;;  %v2192_v37 = vadd.f32 %v2191_v35, %v8958_v18  ;;  %v4109_v9 = vmax.f32 %v1961_v10, 0.0  ;;  %v1965_v20 = vadd.f32 %v1964_v60, %v8969_v52  ;;  %v1201_v63 = vld [vmem:[#allocation2 + $0x70] sm:$0xff]  ;;  %v8992_v60 = vpop.permute.xlu1 %1421 }
 0x220   : > { %v1966_v55 = vpop.f32.mrf.mxu0  ;;  %v2193_v5 = vpop.f32.mrf.mxu1  ;;  %6431 = vst [vmem:[%s8663_s26 + $0x700] sm:$0xff] %v7389_v58  ;;  %v6661_v39 = vcombine.low %v1193_v19, %v1201_v63 }
 0x221   : > { %v7390_v45 = vpack.c.bf16 %v4095_v61, %v4094_v15  ;;  %v2194_v2 = vadd.f32 %v2193_v5, %v8958_v18  ;;  %v7397_v22 = vpack.c.bf16 %v4109_v9, %v4108_v41  ;;  %v1967_v7 = vadd.f32 %v1966_v55, %v8969_v52  ;;  %v8998_v9 = vld [vmem:[#allocation2 + $0x78] sm:$0xff]  ;;  %v7576_v5 = vld [vmem:[%s10213_s1] sm:$0xff]  }
 0x222   : > { %v1968_v54 = vpop.f32.mrf.mxu0  ;;  %v2197_v6 = vpop.f32.mrf.mxu1  ;;  %6760 = vmatmul.mubr.msk.bf16.gmra.mxu1 %vm1719_vm8, %v7575_v11  ;;  %v4124_v30 = vmax.f32 %v1965_v20, 0.0  ;;  %v4110_v46 = vmax.f32 %v2192_v37, 0.0  ;;  %v8996_v37 = vld [vmem:[#allocation2 + $0x38] sm:$0xff] }
 0x223   : > { %6432 = vst [vmem:[%s8663_s26 + $0x708] sm:$0xff] %v7390_v45  ;;  %v4111_v38 = vmax.f32 %v2194_v2, 0.0  ;;  %6439 = vst [vmem:[%s8663_s26 + $0x740] sm:$0xff] %v7397_v22  ;;  %2977 = vmatprep.mubr.bf16.mxu1 %v7719_v21  ;;  %v2198_v56 = vadd.f32 %v2197_v6, %v8969_v52  ;;  %v1969_v10 = vadd.f32 %v1968_v54, %v8981_v48  ;;  %v4125_v11 = vmax.f32 %v1967_v7, 0.0 }
 0x224   : > { %v1970_v35 = vpop.f32.mrf.mxu0  ;;  %v2199_v15 = vpop.f32.mrf.mxu1  ;;  %v6662_v45 = vcombine.high %v1193_v19, %v1201_v63  ;;  %v6664_v16 = vcombine.high %v8996_v37, %v8998_v9 }
 0x225   : > { %v7398_v58 = vpack.c.bf16 %v4111_v38, %v4110_v46  ;;  %v2200_v41 = vadd.f32 %v2199_v15, %v8969_v52  ;;  %v1971_v61 = vadd.f32 %v1970_v35, %v8981_v48  ;;  %v4126_v2 = vmax.f32 %v2198_v56, 0.0  ;;  %v9011_v35 = vpop.permute.xlu0 %1426 }
 0x226   : > { %v1974_v20 = vpop.f32.mrf.mxu0  ;;  %v2201_v55 = vpop.f32.mrf.mxu1  ;;  %6761 = vmatmul.mubr.msk.bf16.vlgmr.msra.gmra.mxu0 %vm1719_vm8, %v7576_v5  ;;  %v7405_v22 = vpack.c.bf16 %v4125_v11, %v4124_v30  ;;  %v4140_v54 = vmax.f32 %v1969_v10, 0.0 }
 0x227   : > { %3191 = vmatpush1.bf16.msra.mxu0 %v6677_v62  ;;  %6440 = vst [vmem:[%s8663_s26 + $0x748] sm:$0xff] %v7398_v58  ;;  %2754 = vmatprep.mubr.bf16.mxu0 %v7719_v21  ;;  %v4127_v6 = vmax.f32 %v2200_v41, 0.0  ;;  %v2202_v7 = vadd.f32 %v2201_v55, %v8981_v48  ;;  %v4141_v46 = vmax.f32 %v1971_v61, 0.0  ;;  %v1975_v38 = vadd.f32 %v1974_v20, %v8992_v60 }
 0x228   : > { %3192 = vmatprep.subr.bf16.mxu0 %v6662_v45  ;;  %v1976_v56 = vpop.f32.mrf.mxu0  ;;  %v2203_v30 = vpop.f32.mrf.mxu1  ;;  %6447 = vst [vmem:[%s8663_s26 + $0x780] sm:$0xff] %v7405_v22  ;;  %v6663_v20 = vcombine.low %v8996_v37, %v8998_v9 }
 0x229   : > { %v7406_v62 = vpack.c.bf16 %v4127_v6, %v4126_v2  ;;  %v2204_v10 = vadd.f32 %v2203_v30, %v8981_v48  ;;  %v7413_v15 = vpack.c.bf16 %v4141_v46, %v4140_v54  ;;  %v1977_v41 = vadd.f32 %v1976_v56, %v8992_v60 }
 0x22a   : > { %v1978_v11 = vpop.f32.mrf.mxu0  ;;  %v2207_v58 = vpop.f32.mrf.mxu1  ;;  %6781 = vmatmul.mubr.msk.bf16.vlgmr.msra.gmra.mxu1 %vm1719_vm8, %v7576_v5  ;;  %v4156_v61 = vmax.f32 %v1975_v38, 0.0  ;;  %v4142_v55 = vmax.f32 %v2202_v7, 0.0 }
 0x22b   : > { %3193 = vmatpush1.bf16.msra.mxu0 %v6661_v39  ;;  %6448 = vst [vmem:[%s8663_s26 + $0x788] sm:$0xff] %v7406_v62  ;;  %v4143_v45 = vmax.f32 %v2204_v10, 0.0  ;;  %6455 = vst [vmem:[%s8663_s26 + $0x7c0] sm:$0xff] %v7413_v15  ;;  %3424 = vmatpush1.bf16.msra.mxu1 %v6679_v43  ;;  %v2208_v19 = vadd.f32 %v2207_v58, %v8992_v60  ;;  %v1979_v63 = vadd.f32 %v1978_v11, %v9011_v35  ;;  %v9028_v5 = vpop.permute.xlu1 %1431  ;;  %v7577_v43 = vld [vmem:[%s10213_s1 + $0x8] sm:$0xff]   ;;  %v9041_v62 = vpop.permute.xlu0 %1436 }
 0x22c   : > { %v1980_v2 = vpop.f32.mrf.mxu0  ;;  %v2209_v22 = vpop.f32.mrf.mxu1  ;;  %2987 = vmatprep.mubr.bf16.mxu1 %v7719_v21  ;;  %v4157_v37 = vmax.f32 %v1977_v41, 0.0  ;;  %3425 = vmatprep.subr.bf16.mxu1 %v6664_v16 }
 0x22d   : > { %v7414_v9 = vpack.c.bf16 %v4143_v45, %v4142_v55  ;;  %v2210_v54 = vadd.f32 %v2209_v22, %v8992_v60  ;;  %v1981_v6 = vadd.f32 %v1980_v2, %v9011_v35  ;;  %v4158_v7 = vmax.f32 %v2208_v19, 0.0 }
 0x22e   : > { %v1984_v3 = vpop.f32.mrf.mxu0  ;;  %v2211_v27 = vpop.f32.mrf.mxu1  ;;  %6762 = vmatmul.mubr.msk.bf16.gmra.mxu0 %vm1719_vm8, %v7577_v43  ;;  %v7421_v46 = vpack.c.bf16 %v4157_v37, %v4156_v61  ;;  %v4172_v38 = vmax.f32 %v1979_v63, 0.0 }
 0x22f   : > { %6456 = vst [vmem:[%s8663_s26 + $0x7c8] sm:$0xff] %v7414_v9  ;;  %2764 = vmatprep.mubr.bf16.mxu0 %v7719_v21  ;;  %v4159_v56 = vmax.f32 %v2210_v54, 0.0  ;;  %v2212_v30 = vadd.f32 %v2211_v27, %v9011_v35  ;;  %v4173_v16 = vmax.f32 %v1981_v6, 0.0  ;;  %v1985_v39 = vadd.f32 %v1984_v3, %v9028_v5  ;;  %3426 = vmatpush1.bf16.msra.mxu1 %v6663_v20  ;;  %v9052_v37 = vpop.permute.xlu1 %1441 }
 0x230   : > { %v1986_v10 = vpop.f32.mrf.mxu0  ;;  %v2213_v15 = vpop.f32.mrf.mxu1  ;;  %6463 = vst [vmem:[%s8663_s26 + $0x800] sm:$0xff] %v7421_v46 }
 0x231   : > { %v7422_v11 = vpack.c.bf16 %v4159_v56, %v4158_v7  ;;  %v2214_v58 = vadd.f32 %v2213_v15, %v9011_v35  ;;  %v7429_v41 = vpack.c.bf16 %v4173_v16, %v4172_v38  ;;  %v1987_v45 = vadd.f32 %v1986_v10, %v9028_v5  ;;  %v7578_v38 = vld [vmem:[%s10213_s1 + $0x10] sm:$0xff]  }
 0x232   : > { %v1988_v61 = vpop.f32.mrf.mxu0  ;;  %v2217_v55 = vpop.f32.mrf.mxu1  ;;  %6782 = vmatmul.mubr.msk.bf16.gmra.mxu1 %vm1719_vm8, %v7577_v43  ;;  %v4188_v19 = vmax.f32 %v1985_v39, 0.0  ;;  %v4174_v63 = vmax.f32 %v2212_v30, 0.0 }
 0x233   : > { %6464 = vst [vmem:[%s8663_s26 + $0x808] sm:$0xff] %v7422_v11  ;;  %v4175_v2 = vmax.f32 %v2214_v58, 0.0  ;;  %6471 = vst [vmem:[%s8663_s26 + $0x840] sm:$0xff] %v7429_v41  ;;  %2997 = vmatprep.mubr.bf16.mxu1 %v7719_v21  ;;  %v2218_v20 = vadd.f32 %v2217_v55, %v9028_v5  ;;  %v1989_v22 = vadd.f32 %v1988_v61, %v9041_v62  ;;  %v4189_v6 = vmax.f32 %v1987_v45, 0.0  ;;  %v9064_v58 = vpop.permute.xlu0 %1446 }
 0x234   : > { %v1990_v9 = vpop.f32.mrf.mxu0  ;;  %v2219_v54 = vpop.f32.mrf.mxu1 }
 0x235   : > { %v7430_v3 = vpack.c.bf16 %v4175_v2, %v4174_v63  ;;  %v2220_v27 = vadd.f32 %v2219_v54, %v9028_v5  ;;  %v1991_v43 = vadd.f32 %v1990_v9, %v9041_v62  ;;  %v4190_v56 = vmax.f32 %v2218_v20, 0.0 }
 0x236   : > { %v1994_v7 = vpop.f32.mrf.mxu0  ;;  %v2221_v46 = vpop.f32.mrf.mxu1  ;;  %6763 = vmatmul.mubr.msk.bf16.gmra.mxu0 %vm1719_vm8, %v7578_v38  ;;  %v7437_v30 = vpack.c.bf16 %v4189_v6, %v4188_v19  ;;  %v4204_v16 = vmax.f32 %v1989_v22, 0.0 }
 0x237   : > { %6472 = vst [vmem:[%s8663_s26 + $0x848] sm:$0xff] %v7430_v3  ;;  %2774 = vmatprep.mubr.bf16.mxu0 %v7719_v21  ;;  %v4191_v39 = vmax.f32 %v2220_v27, 0.0  ;;  %v2222_v10 = vadd.f32 %v2221_v46, %v9041_v62  ;;  %v4205_v15 = vmax.f32 %v1991_v43, 0.0  ;;  %v1995_v11 = vadd.f32 %v1994_v7, %v9052_v37  ;;  %v9075_v27 = vpop.permute.xlu1 %1451 }
 0x238   : > { %v1996_v41 = vpop.f32.mrf.mxu0  ;;  %v2223_v61 = vpop.f32.mrf.mxu1  ;;  %6479 = vst [vmem:[%s8663_s26 + $0x880] sm:$0xff] %v7437_v30 }
 0x239   : > { %v7438_v55 = vpack.c.bf16 %v4191_v39, %v4190_v56  ;;  %v2224_v45 = vadd.f32 %v2223_v61, %v9041_v62  ;;  %v7445_v19 = vpack.c.bf16 %v4205_v15, %v4204_v16  ;;  %v1997_v20 = vadd.f32 %v1996_v41, %v9052_v37 }
 0x23a   : > { %v1998_v63 = vpop.f32.mrf.mxu0  ;;  %v2227_v2 = vpop.f32.mrf.mxu1  ;;  %6783 = vmatmul.mubr.msk.bf16.gmra.mxu1 %vm1719_vm8, %v7578_v38  ;;  %v4220_v22 = vmax.f32 %v1995_v11, 0.0  ;;  %v4206_v9 = vmax.f32 %v2222_v10, 0.0  ;;  %v7579_v10 = vld [vmem:[%s10213_s1 + $0x18] sm:$0xff]  }
 0x23b   : > { %6480 = vst [vmem:[%s8663_s26 + $0x888] sm:$0xff] %v7438_v55  ;;  %v4207_v54 = vmax.f32 %v2224_v45, 0.0  ;;  %6487 = vst [vmem:[%s8663_s26 + $0x8c0] sm:$0xff] %v7445_v19  ;;  %3007 = vmatprep.mubr.bf16.mxu1 %v7719_v21  ;;  %v2228_v6 = vadd.f32 %v2227_v2, %v9052_v37  ;;  %v1999_v3 = vadd.f32 %v1998_v63, %v9064_v58  ;;  %v4221_v46 = vmax.f32 %v1997_v20, 0.0 }
 0x23c   : > { %v2000_v43 = vpop.f32.mrf.mxu0  ;;  %v2229_v7 = vpop.f32.mrf.mxu1 }
 0x23d   : > { %v7446_v38 = vpack.c.bf16 %v4207_v54, %v4206_v9  ;;  %v2230_v56 = vadd.f32 %v2229_v7, %v9052_v37  ;;  %v2001_v30 = vadd.f32 %v2000_v43, %v9064_v58  ;;  %v4222_v15 = vmax.f32 %v2228_v6, 0.0 }
 0x23e   : > { %v2004_v16 = vpop.f32.mrf.mxu0  ;;  %v2231_v39 = vpop.f32.mrf.mxu1  ;;  %6764 = vmatmul.mubr.msk.bf16.gmra.mxu0 %vm1719_vm8, %v7579_v10  ;;  %v7453_v11 = vpack.c.bf16 %v4221_v46, %v4220_v22  ;;  %v4236_v41 = vmax.f32 %v1999_v3, 0.0 }
 0x23f   : > { %6488 = vst [vmem:[%s8663_s26 + $0x8c8] sm:$0xff] %v7446_v38  ;;  %2784 = vmatprep.mubr.bf16.mxu0 %v7719_v21  ;;  %v4223_v61 = vmax.f32 %v2230_v56, 0.0  ;;  %v2232_v55 = vadd.f32 %v2231_v39, %v9064_v58  ;;  %v4237_v45 = vmax.f32 %v2001_v30, 0.0  ;;  %v2005_v19 = vadd.f32 %v2004_v16, %v9075_v27  ;;  %v9089_v22 = vpop.permute.xlu0 %1456 }
 0x240   : > { %v2006_v63 = vpop.f32.mrf.mxu0  ;;  %v2233_v2 = vpop.f32.mrf.mxu1  ;;  %6495 = vst [vmem:[%s8663_s26 + $0x900] sm:$0xff] %v7453_v11 }
 0x241   : > { %v7454_v20 = vpack.c.bf16 %v4223_v61, %v4222_v15  ;;  %v2234_v9 = vadd.f32 %v2233_v2, %v9064_v58  ;;  %v7461_v54 = vpack.c.bf16 %v4237_v45, %v4236_v41  ;;  %v2007_v43 = vadd.f32 %v2006_v63, %v9075_v27  ;;  %v7580_v45 = vld [vmem:[%s10213_s1 + $0x20] sm:$0xff]  }
 0x242   : > { %v2008_v6 = vpop.f32.mrf.mxu0  ;;  %v2237_v3 = vpop.f32.mrf.mxu1  ;;  %6784 = vmatmul.mubr.msk.bf16.gmra.mxu1 %vm1719_vm8, %v7579_v10  ;;  %v4252_v7 = vmax.f32 %v2005_v19, 0.0  ;;  %v4238_v46 = vmax.f32 %v2232_v55, 0.0 }
 0x243   : > { %6496 = vst [vmem:[%s8663_s26 + $0x908] sm:$0xff] %v7454_v20  ;;  %v4239_v38 = vmax.f32 %v2234_v9, 0.0  ;;  %6503 = vst [vmem:[%s8663_s26 + $0x940] sm:$0xff] %v7461_v54  ;;  %3017 = vmatprep.mubr.bf16.mxu1 %v7719_v21  ;;  %v2238_v56 = vadd.f32 %v2237_v3, %v9075_v27  ;;  %v4253_v39 = vmax.f32 %v2007_v43, 0.0  ;;  %v2009_v15 = vadd.f32 %v2008_v6, %v9089_v22 }
 0x244   : > { %v2010_v30 = vpop.f32.mrf.mxu0  ;;  %v2239_v16 = vpop.f32.mrf.mxu1 }
 0x245   : > { %v7462_v11 = vpack.c.bf16 %v4239_v38, %v4238_v46  ;;  %v2240_v10 = vadd.f32 %v2239_v16, %v9075_v27  ;;  %v2011_v41 = vadd.f32 %v2010_v30, %v9089_v22  ;;  %v7469_v19 = vpack.c.bf16 %v4253_v39, %v4252_v7 }
 0x246   : > { %v2241_v61 = vpop.f32.mrf.mxu1  ;;  %v2280_v55 = vpop.f32.mrf.mxu0  ;;  %6765 = vmatmul.mubr.msk.bf16.gmra.mxu0 %vm1719_vm8, %v7580_v45  ;;  %v4254_v2 = vmax.f32 %v2238_v56, 0.0  ;;  %v4268_v43 = vmax.f32 %v2009_v15, 0.0 }
 0x247   : > { %v2281_v63 = vadd.f32 %v2280_v55, %v8631_v26  ;;  %6504 = vst [vmem:[%s8663_s26 + $0x948] sm:$0xff] %v7462_v11  ;;  %2794 = vmatprep.mubr.bf16.mxu0 %v7719_v21  ;;  %v4255_v20 = vmax.f32 %v2240_v10, 0.0  ;;  %v4269_v9 = vmax.f32 %v2011_v41, 0.0  ;;  %6511 = vst [vmem:[%s8663_s26 + $0x980] sm:$0xff] %v7469_v19  ;;  %v2242_v3 = vadd.f32 %v2241_v61, %v9089_v22 }
 0x248   : > { %v2243_v54 = vpop.f32.mrf.mxu1  ;;  %v2282_v6 = vpop.f32.mrf.mxu0 }
 0x249   : > { %v3648_v46 = vmax.f32 %v2281_v63, 0.0  ;;  %v2283_v38 = vadd.f32 %v2282_v6, %v8631_v26  ;;  %v7470_v7 = vpack.c.bf16 %v4255_v20, %v4254_v2  ;;  %v2244_v30 = vadd.f32 %v2243_v54, %v9089_v22  ;;  %v7581_v54 = vld [vmem:[%s10213_s1 + $0x28] sm:$0xff]  }
 0x24a   : > { %v2284_v16 = vpop.f32.mrf.mxu0  ;;  %v2513_v39 = vpop.f32.mrf.mxu1  ;;  %6785 = vmatmul.mubr.msk.bf16.gmra.mxu1 %vm1719_vm8, %v7580_v45  ;;  %v7477_v56 = vpack.c.bf16 %v4269_v9, %v4268_v43  ;;  %v4270_v19 = vmax.f32 %v2242_v3, 0.0 }
 0x24b   : > { %v3649_v11 = vmax.f32 %v2283_v38, 0.0  ;;  %v2285_v10 = vadd.f32 %v2284_v16, %v8636_v14  ;;  %6512 = vst [vmem:[%s8663_s26 + $0x988] sm:$0xff] %v7470_v7  ;;  %v4271_v41 = vmax.f32 %v2244_v30, 0.0  ;;  %3027 = vmatprep.mubr.bf16.mxu1 %v7719_v21  ;;  %v2514_v15 = vadd.f32 %v2513_v39, %v8631_v26 }
 0x24c   : > { %v2286_v61 = vpop.f32.mrf.mxu0  ;;  %v2515_v55 = vpop.f32.mrf.mxu1  ;;  %6519 = vst [vmem:[%s8663_s26 + $0x9c0] sm:$0xff] %v7477_v56 }
 0x24d   : > { %v7167_v63 = vpack.c.bf16 %v3649_v11, %v3648_v46  ;;  %v2287_v2 = vadd.f32 %v2286_v61, %v8636_v14  ;;  %v2516_v45 = vadd.f32 %v2515_v55, %v8631_v26  ;;  %v7478_v6 = vpack.c.bf16 %v4271_v41, %v4270_v19 }
 0x24e   : > { %v2290_v20 = vpop.f32.mrf.mxu0  ;;  %v2517_v9 = vpop.f32.mrf.mxu1  ;;  %6766 = vmatmul.mubr.msk.bf16.gmra.mxu0 %vm1719_vm8, %v7581_v54  ;;  %v3664_v43 = vmax.f32 %v2285_v10, 0.0  ;;  %v3650_v46 = vmax.f32 %v2514_v15, 0.0 }
 0x24f   : > { %6206 = vst [vmem:[%s8663_s26 + $0x10] sm:$0xff] %v7167_v63  ;;  %v3665_v38 = vmax.f32 %v2287_v2, 0.0  ;;  %v2291_v3 = vadd.f32 %v2290_v20, %v8646_v50  ;;  %2804 = vmatprep.mubr.bf16.mxu0 %v7719_v21  ;;  %v3651_v7 = vmax.f32 %v2516_v45, 0.0  ;;  %v2518_v30 = vadd.f32 %v2517_v9, %v8636_v14  ;;  %6520 = vst [vmem:[%s8663_s26 + $0x9c8] sm:$0xff] %v7478_v6 }
 0x250   : > { %v2292_v16 = vpop.f32.mrf.mxu0  ;;  %v2519_v39 = vpop.f32.mrf.mxu1 }
 0x251   : > { %v7175_v56 = vpack.c.bf16 %v3665_v38, %v3664_v43  ;;  %v3680_v11 = vmax.f32 %v2291_v3, 0.0  ;;  %v2293_v41 = vadd.f32 %v2292_v16, %v8646_v50  ;;  %v7168_v61 = vpack.c.bf16 %v3651_v7, %v3650_v46  ;;  %v7582_v16 = vld [vmem:[%s10213_s1 + $0x30] sm:$0xff]  }
 0x252   : > { %v2520_v10 = vadd.f32 %v2519_v39, %v8636_v14  ;;  %v2294_v55 = vpop.f32.mrf.mxu0  ;;  %v2523_v19 = vpop.f32.mrf.mxu1  ;;  %6786 = vmatmul.mubr.msk.bf16.gmra.mxu1 %vm1719_vm8, %v7581_v54  ;;  %v3666_v2 = vmax.f32 %v2518_v30, 0.0 }
 0x253   : > { %6217 = vst [vmem:[%s8663_s26 + $0x50] sm:$0xff] %v7175_v56  ;;  %v3681_v15 = vmax.f32 %v2293_v41, 0.0  ;;  %v2295_v63 = vadd.f32 %v2294_v55, %v8659_v12  ;;  %3037 = vmatprep.mubr.bf16.mxu1 %v7719_v21  ;;  %6207 = vst [vmem:[%s8663_s26 + $0x18] sm:$0xff] %v7168_v61  ;;  %v2524_v20 = vadd.f32 %v2523_v19, %v8646_v50 }
 0x254   : > { %v3667_v45 = vmax.f32 %v2520_v10, 0.0  ;;  %v2296_v9 = vpop.f32.mrf.mxu0  ;;  %v2525_v6 = vpop.f32.mrf.mxu1 }
 0x255   : > { %v7183_v43 = vpack.c.bf16 %v3681_v15, %v3680_v11  ;;  %v2297_v38 = vadd.f32 %v2296_v9, %v8659_v12  ;;  %v2526_v54 = vadd.f32 %v2525_v6, %v8646_v50  ;;  %v3696_v30 = vmax.f32 %v2295_v63, 0.0 }
 0x256   : > { %v7176_v3 = vpack.c.bf16 %v3667_v45, %v3666_v2  ;;  %v2300_v46 = vpop.f32.mrf.mxu0  ;;  %v2527_v7 = vpop.f32.mrf.mxu1  ;;  %6767 = vmatmul.mubr.msk.bf16.gmra.mxu0 %vm1719_vm8, %v7582_v16  ;;  %v3682_v11 = vmax.f32 %v2524_v20, 0.0 }
 0x257   : > { %6225 = vst [vmem:[%s8663_s26 + $0x90] sm:$0xff] %v7183_v43  ;;  %v3697_v39 = vmax.f32 %v2297_v38, 0.0  ;;  %v2301_v56 = vadd.f32 %v2300_v46, %v8679_v29  ;;  %2814 = vmatprep.mubr.bf16.mxu0 %v7719_v21  ;;  %v3683_v41 = vmax.f32 %v2526_v54, 0.0  ;;  %v2528_v61 = vadd.f32 %v2527_v7, %v8659_v12 }
 0x258   : > { %6218 = vst [vmem:[%s8663_s26 + $0x58] sm:$0xff] %v7176_v3  ;;  %v2302_v10 = vpop.f32.mrf.mxu0  ;;  %v2529_v55 = vpop.f32.mrf.mxu1 }
 0x259   : > { %v7191_v19 = vpack.c.bf16 %v3697_v39, %v3696_v30  ;;  %v3712_v15 = vmax.f32 %v2301_v56, 0.0  ;;  %v2303_v2 = vadd.f32 %v2302_v10, %v8679_v29  ;;  %v7184_v45 = vpack.c.bf16 %v3683_v41, %v3682_v11  ;;  %v7583_v10 = vld [vmem:[%s10213_s1 + $0x38] sm:$0xff]  }
 0x25a   : > { %v2530_v63 = vadd.f32 %v2529_v55, %v8659_v12  ;;  %v2304_v9 = vpop.f32.mrf.mxu0  ;;  %v2533_v6 = vpop.f32.mrf.mxu1  ;;  %6787 = vmatmul.mubr.msk.bf16.gmra.mxu1 %vm1719_vm8, %v7582_v16  ;;  %v3698_v38 = vmax.f32 %v2528_v61, 0.0 }
 0x25b   : > { %6233 = vst [vmem:[%s8663_s26 + $0xd0] sm:$0xff] %v7191_v19  ;;  %v3713_v43 = vmax.f32 %v2303_v2, 0.0  ;;  %v2305_v20 = vadd.f32 %v2304_v9, %v8689_v53  ;;  %3047 = vmatprep.mubr.bf16.mxu1 %v7719_v21  ;;  %6226 = vst [vmem:[%s8663_s26 + $0x98] sm:$0xff] %v7184_v45  ;;  %v2534_v54 = vadd.f32 %v2533_v6, %v8679_v29 }
 0x25c   : > { %v3699_v3 = vmax.f32 %v2530_v63, 0.0  ;;  %v2306_v46 = vpop.f32.mrf.mxu0  ;;  %v2535_v7 = vpop.f32.mrf.mxu1 }
 0x25d   : > { %v7199_v30 = vpack.c.bf16 %v3713_v43, %v3712_v15  ;;  %v2307_v39 = vadd.f32 %v2306_v46, %v8689_v53  ;;  %v2536_v16 = vadd.f32 %v2535_v7, %v8679_v29  ;;  %v3728_v61 = vmax.f32 %v2305_v20, 0.0 }
 0x25e   : > { %v7192_v56 = vpack.c.bf16 %v3699_v3, %v3698_v38  ;;  %v2310_v11 = vpop.f32.mrf.mxu0  ;;  %v2537_v41 = vpop.f32.mrf.mxu1  ;;  %6768 = vmatmul.mubr.msk.bf16.gmra.mxu0 %vm1719_vm8, %v7583_v10  ;;  %v3714_v15 = vmax.f32 %v2534_v54, 0.0 }
 0x25f   : > { %6241 = vst [vmem:[%s8663_s26 + $0x110] sm:$0xff] %v7199_v30  ;;  %v3729_v55 = vmax.f32 %v2307_v39, 0.0  ;;  %v2311_v19 = vadd.f32 %v2310_v11, %v8701_v59  ;;  %2824 = vmatprep.mubr.bf16.mxu0 %v7719_v21  ;;  %v3715_v2 = vmax.f32 %v2536_v16, 0.0  ;;  %v2538_v45 = vadd.f32 %v2537_v41, %v8689_v53 }
 0x260   : > { %6234 = vst [vmem:[%s8663_s26 + $0xd8] sm:$0xff] %v7192_v56  ;;  %v2312_v63 = vpop.f32.mrf.mxu0  ;;  %v2539_v9 = vpop.f32.mrf.mxu1 }
 0x261   : > { %v7207_v6 = vpack.c.bf16 %v3729_v55, %v3728_v61  ;;  %v3744_v43 = vmax.f32 %v2311_v19, 0.0  ;;  %v2313_v38 = vadd.f32 %v2312_v63, %v8701_v59  ;;  %v7200_v3 = vpack.c.bf16 %v3715_v2, %v3714_v15  ;;  %v7584_v63 = vld [vmem:[%s10213_s1 + $0x40] sm:$0xff]  }
 0x262   : > { %v2540_v20 = vadd.f32 %v2539_v9, %v8689_v53  ;;  %v2314_v46 = vpop.f32.mrf.mxu0  ;;  %v2543_v7 = vpop.f32.mrf.mxu1  ;;  %6788 = vmatmul.mubr.msk.bf16.gmra.mxu1 %vm1719_vm8, %v7583_v10  ;;  %v3730_v39 = vmax.f32 %v2538_v45, 0.0 }
 0x263   : > { %6249 = vst [vmem:[%s8663_s26 + $0x150] sm:$0xff] %v7207_v6  ;;  %v3745_v30 = vmax.f32 %v2313_v38, 0.0  ;;  %v2315_v54 = vadd.f32 %v2314_v46, %v8711_v42  ;;  %3057 = vmatprep.mubr.bf16.mxu1 %v7719_v21  ;;  %6242 = vst [vmem:[%s8663_s26 + $0x118] sm:$0xff] %v7200_v3  ;;  %v2544_v16 = vadd.f32 %v2543_v7, %v8701_v59 }
 0x264   : > { %v3731_v56 = vmax.f32 %v2540_v20, 0.0  ;;  %v2316_v11 = vpop.f32.mrf.mxu0  ;;  %v2545_v41 = vpop.f32.mrf.mxu1 }
 0x265   : > { %v7215_v61 = vpack.c.bf16 %v3745_v30, %v3744_v43  ;;  %v2317_v55 = vadd.f32 %v2316_v11, %v8711_v42  ;;  %v2546_v10 = vadd.f32 %v2545_v41, %v8701_v59  ;;  %v3760_v45 = vmax.f32 %v2315_v54, 0.0 }
 0x266   : > { %v7208_v19 = vpack.c.bf16 %v3731_v56, %v3730_v39  ;;  %v2320_v15 = vpop.f32.mrf.mxu0  ;;  %v2547_v2 = vpop.f32.mrf.mxu1  ;;  %6769 = vmatmul.mubr.msk.bf16.gmra.mxu0 %vm1719_vm8, %v7584_v63  ;;  %v3746_v43 = vmax.f32 %v2544_v16, 0.0 }
 0x267   : > { %6257 = vst [vmem:[%s8663_s26 + $0x190] sm:$0xff] %v7215_v61  ;;  %v3761_v9 = vmax.f32 %v2317_v55, 0.0  ;;  %v2321_v6 = vadd.f32 %v2320_v15, %v8723_v23  ;;  %2834 = vmatprep.mubr.bf16.mxu0 %v7719_v21  ;;  %v3747_v38 = vmax.f32 %v2546_v10, 0.0  ;;  %v2548_v3 = vadd.f32 %v2547_v2, %v8711_v42 }
 0x268   : > { %6250 = vst [vmem:[%s8663_s26 + $0x158] sm:$0xff] %v7208_v19  ;;  %v2322_v20 = vpop.f32.mrf.mxu0  ;;  %v2549_v46 = vpop.f32.mrf.mxu1 }
 0x269   : > { %v7223_v7 = vpack.c.bf16 %v3761_v9, %v3760_v45  ;;  %v3776_v30 = vmax.f32 %v2321_v6, 0.0  ;;  %v2323_v39 = vadd.f32 %v2322_v20, %v8723_v23  ;;  %v7216_v56 = vpack.c.bf16 %v3747_v38, %v3746_v43  ;;  %v7585_v20 = vld [vmem:[%s10213_s1 + $0x48] sm:$0xff]  }
 0x26a   : > { %v2550_v54 = vadd.f32 %v2549_v46, %v8711_v42  ;;  %v2324_v11 = vpop.f32.mrf.mxu0  ;;  %v2553_v41 = vpop.f32.mrf.mxu1  ;;  %6789 = vmatmul.mubr.msk.bf16.gmra.mxu1 %vm1719_vm8, %v7584_v63  ;;  %v3762_v55 = vmax.f32 %v2548_v3, 0.0 }
 0x26b   : > { %6265 = vst [vmem:[%s8663_s26 + $0x1d0] sm:$0xff] %v7223_v7  ;;  %v3777_v61 = vmax.f32 %v2323_v39, 0.0  ;;  %v2325_v16 = vadd.f32 %v2324_v11, %v8733_v31  ;;  %3067 = vmatprep.mubr.bf16.mxu1 %v7719_v21  ;;  %6258 = vst [vmem:[%s8663_s26 + $0x198] sm:$0xff] %v7216_v56  ;;  %v2554_v10 = vadd.f32 %v2553_v41, %v8723_v23 }
 0x26c   : > { %v3763_v19 = vmax.f32 %v2550_v54, 0.0  ;;  %v2326_v15 = vpop.f32.mrf.mxu0  ;;  %v2555_v2 = vpop.f32.mrf.mxu1 }
 0x26d   : > { %v7231_v45 = vpack.c.bf16 %v3777_v61, %v3776_v30  ;;  %v2327_v9 = vadd.f32 %v2326_v15, %v8733_v31  ;;  %v2556_v63 = vadd.f32 %v2555_v2, %v8723_v23  ;;  %v3792_v3 = vmax.f32 %v2325_v16, 0.0 }
 0x26e   : > { %v7224_v6 = vpack.c.bf16 %v3763_v19, %v3762_v55  ;;  %v2330_v43 = vpop.f32.mrf.mxu0  ;;  %v2557_v38 = vpop.f32.mrf.mxu1  ;;  %6770 = vmatmul.mubr.msk.bf16.gmra.mxu0 %vm1719_vm8, %v7585_v20  ;;  %v3778_v30 = vmax.f32 %v2554_v10, 0.0 }
 0x26f   : > { %6273 = vst [vmem:[%s8663_s26 + $0x210] sm:$0xff] %v7231_v45  ;;  %v3793_v46 = vmax.f32 %v2327_v9, 0.0  ;;  %v2331_v7 = vadd.f32 %v2330_v43, %v8745_v44  ;;  %2844 = vmatprep.mubr.bf16.mxu0 %v7719_v21  ;;  %v3779_v39 = vmax.f32 %v2556_v63, 0.0  ;;  %v2558_v56 = vadd.f32 %v2557_v38, %v8733_v31 }
 0x270   : > { %6266 = vst [vmem:[%s8663_s26 + $0x1d8] sm:$0xff] %v7224_v6  ;;  %v2332_v54 = vpop.f32.mrf.mxu0  ;;  %v2559_v11 = vpop.f32.mrf.mxu1 }
 0x271   : > { %v7239_v41 = vpack.c.bf16 %v3793_v46, %v3792_v3  ;;  %v3808_v61 = vmax.f32 %v2331_v7, 0.0  ;;  %v2333_v55 = vadd.f32 %v2332_v54, %v8745_v44  ;;  %v7232_v19 = vpack.c.bf16 %v3779_v39, %v3778_v30  ;;  %v7586_v54 = vld [vmem:[%s10213_s1 + $0x50] sm:$0xff]  }
 0x272   : > { %v2560_v16 = vadd.f32 %v2559_v11, %v8733_v31  ;;  %v2334_v15 = vpop.f32.mrf.mxu0  ;;  %v2563_v2 = vpop.f32.mrf.mxu1  ;;  %6790 = vmatmul.mubr.msk.bf16.gmra.mxu1 %vm1719_vm8, %v7585_v20  ;;  %v3794_v9 = vmax.f32 %v2558_v56, 0.0 }
 0x273   : > { %6281 = vst [vmem:[%s8663_s26 + $0x250] sm:$0xff] %v7239_v41  ;;  %v3809_v45 = vmax.f32 %v2333_v55, 0.0  ;;  %v2335_v10 = vadd.f32 %v2334_v15, %v8755_v33  ;;  %3077 = vmatprep.mubr.bf16.mxu1 %v7719_v21  ;;  %6274 = vst [vmem:[%s8663_s26 + $0x218] sm:$0xff] %v7232_v19  ;;  %v2564_v63 = vadd.f32 %v2563_v2, %v8745_v44 }
 0x274   : > { %v3795_v6 = vmax.f32 %v2560_v16, 0.0  ;;  %v2336_v43 = vpop.f32.mrf.mxu0  ;;  %v2565_v38 = vpop.f32.mrf.mxu1 }
 0x275   : > { %v7247_v3 = vpack.c.bf16 %v3809_v45, %v3808_v61  ;;  %v2337_v46 = vadd.f32 %v2336_v43, %v8755_v33  ;;  %v2566_v20 = vadd.f32 %v2565_v38, %v8745_v44  ;;  %v3824_v56 = vmax.f32 %v2335_v10, 0.0 }
 0x276   : > { %v7240_v7 = vpack.c.bf16 %v3795_v6, %v3794_v9  ;;  %v2340_v30 = vpop.f32.mrf.mxu0  ;;  %v2567_v39 = vpop.f32.mrf.mxu1  ;;  %6771 = vmatmul.mubr.msk.bf16.gmra.mxu0 %vm1719_vm8, %v7586_v54  ;;  %v3810_v61 = vmax.f32 %v2564_v63, 0.0 }
 0x277   : > { %6289 = vst [vmem:[%s8663_s26 + $0x290] sm:$0xff] %v7247_v3  ;;  %v3825_v11 = vmax.f32 %v2337_v46, 0.0  ;;  %v2341_v41 = vadd.f32 %v2340_v30, %v8767_v49  ;;  %2854 = vmatprep.mubr.bf16.mxu0 %v7719_v21  ;;  %v3811_v55 = vmax.f32 %v2566_v20, 0.0  ;;  %v2568_v19 = vadd.f32 %v2567_v39, %v8755_v33 }
 0x278   : > { %6282 = vst [vmem:[%s8663_s26 + $0x258] sm:$0xff] %v7240_v7  ;;  %v2342_v16 = vpop.f32.mrf.mxu0  ;;  %v2569_v15 = vpop.f32.mrf.mxu1 }
 0x279   : > { %v7255_v2 = vpack.c.bf16 %v3825_v11, %v3824_v56  ;;  %v3840_v45 = vmax.f32 %v2341_v41, 0.0  ;;  %v2343_v9 = vadd.f32 %v2342_v16, %v8767_v49  ;;  %v7248_v6 = vpack.c.bf16 %v3811_v55, %v3810_v61  ;;  %v7587_v16 = vld [vmem:[%s10213_s1 + $0x58] sm:$0xff]  }
 0x27a   : > { %v2570_v10 = vadd.f32 %v2569_v15, %v8755_v33  ;;  %v2344_v43 = vpop.f32.mrf.mxu0  ;;  %v2573_v38 = vpop.f32.mrf.mxu1  ;;  %6791 = vmatmul.mubr.msk.bf16.gmra.mxu1 %vm1719_vm8, %v7586_v54  ;;  %v3826_v46 = vmax.f32 %v2568_v19, 0.0 }
 0x27b   : > { %6297 = vst [vmem:[%s8663_s26 + $0x2d0] sm:$0xff] %v7255_v2  ;;  %v3841_v3 = vmax.f32 %v2343_v9, 0.0  ;;  %v2345_v63 = vadd.f32 %v2344_v43, %v8777_v4  ;;  %3087 = vmatprep.mubr.bf16.mxu1 %v7719_v21  ;;  %6290 = vst [vmem:[%s8663_s26 + $0x298] sm:$0xff] %v7248_v6  ;;  %v2574_v20 = vadd.f32 %v2573_v38, %v8767_v49 }
 0x27c   : > { %v3827_v7 = vmax.f32 %v2570_v10, 0.0  ;;  %v2346_v30 = vpop.f32.mrf.mxu0  ;;  %v2575_v39 = vpop.f32.mrf.mxu1 }
 0x27d   : > { %v7263_v56 = vpack.c.bf16 %v3841_v3, %v3840_v45  ;;  %v2347_v11 = vadd.f32 %v2346_v30, %v8777_v4  ;;  %v2576_v54 = vadd.f32 %v2575_v39, %v8767_v49  ;;  %v3856_v19 = vmax.f32 %v2345_v63, 0.0 }
 0x27e   : > { %v7256_v41 = vpack.c.bf16 %v3827_v7, %v3826_v46  ;;  %v2350_v61 = vpop.f32.mrf.mxu0  ;;  %v2577_v55 = vpop.f32.mrf.mxu1  ;;  %6772 = vmatmul.mubr.msk.bf16.gmra.mxu0 %vm1719_vm8, %v7587_v16  ;;  %v3842_v45 = vmax.f32 %v2574_v20, 0.0 }
 0x27f   : > { %6305 = vst [vmem:[%s8663_s26 + $0x310] sm:$0xff] %v7263_v56  ;;  %v3857_v15 = vmax.f32 %v2347_v11, 0.0  ;;  %v2351_v2 = vadd.f32 %v2350_v61, %v8789_v13  ;;  %2864 = vmatprep.mubr.bf16.mxu0 %v7719_v21  ;;  %v3843_v9 = vmax.f32 %v2576_v54, 0.0  ;;  %v2578_v6 = vadd.f32 %v2577_v55, %v8777_v4 }
 0x280   : > { %6298 = vst [vmem:[%s8663_s26 + $0x2d8] sm:$0xff] %v7256_v41  ;;  %v2352_v10 = vpop.f32.mrf.mxu0  ;;  %v2579_v43 = vpop.f32.mrf.mxu1 }
 0x281   : > { %v7271_v38 = vpack.c.bf16 %v3857_v15, %v3856_v19  ;;  %v3872_v3 = vmax.f32 %v2351_v2, 0.0  ;;  %v2353_v46 = vadd.f32 %v2352_v10, %v8789_v13  ;;  %v7264_v7 = vpack.c.bf16 %v3843_v9, %v3842_v45  ;;  %v7588_v10 = vld [vmem:[%s10213_s1 + $0x60] sm:$0xff]  }
 0x282   : > { %v2580_v63 = vadd.f32 %v2579_v43, %v8777_v4  ;;  %v2354_v30 = vpop.f32.mrf.mxu0  ;;  %v2583_v39 = vpop.f32.mrf.mxu1  ;;  %6792 = vmatmul.mubr.msk.bf16.gmra.mxu1 %vm1719_vm8, %v7587_v16  ;;  %v3858_v11 = vmax.f32 %v2578_v6, 0.0 }
 0x283   : > { %6313 = vst [vmem:[%s8663_s26 + $0x350] sm:$0xff] %v7271_v38  ;;  %v3873_v56 = vmax.f32 %v2353_v46, 0.0  ;;  %v2355_v20 = vadd.f32 %v2354_v30, %v8799_v24  ;;  %3097 = vmatprep.mubr.bf16.mxu1 %v7719_v21  ;;  %6306 = vst [vmem:[%s8663_s26 + $0x318] sm:$0xff] %v7264_v7  ;;  %v2584_v54 = vadd.f32 %v2583_v39, %v8789_v13 }
 0x284   : > { %v3859_v41 = vmax.f32 %v2580_v63, 0.0  ;;  %v2356_v61 = vpop.f32.mrf.mxu0  ;;  %v2585_v55 = vpop.f32.mrf.mxu1 }
 0x285   : > { %v7279_v19 = vpack.c.bf16 %v3873_v56, %v3872_v3  ;;  %v2357_v15 = vadd.f32 %v2356_v61, %v8799_v24  ;;  %v2586_v16 = vadd.f32 %v2585_v55, %v8789_v13  ;;  %v3888_v6 = vmax.f32 %v2355_v20, 0.0 }
 0x286   : > { %v7272_v2 = vpack.c.bf16 %v3859_v41, %v3858_v11  ;;  %v2360_v45 = vpop.f32.mrf.mxu0  ;;  %v2587_v9 = vpop.f32.mrf.mxu1  ;;  %6773 = vmatmul.mubr.msk.bf16.gmra.mxu0 %vm1719_vm8, %v7588_v10  ;;  %v3874_v3 = vmax.f32 %v2584_v54, 0.0 }
 0x287   : > { %6321 = vst [vmem:[%s8663_s26 + $0x390] sm:$0xff] %v7279_v19  ;;  %v3889_v43 = vmax.f32 %v2357_v15, 0.0  ;;  %v2361_v38 = vadd.f32 %v2360_v45, %v8811_v0  ;;  %2874 = vmatprep.mubr.bf16.mxu0 %v7719_v21  ;;  %v3875_v46 = vmax.f32 %v2586_v16, 0.0  ;;  %v2588_v7 = vadd.f32 %v2587_v9, %v8799_v24 }
 0x288   : > { %6314 = vst [vmem:[%s8663_s26 + $0x358] sm:$0xff] %v7272_v2  ;;  %v2362_v63 = vpop.f32.mrf.mxu0  ;;  %v2589_v30 = vpop.f32.mrf.mxu1 }
 0x289   : > { %v7287_v39 = vpack.c.bf16 %v3889_v43, %v3888_v6  ;;  %v3904_v56 = vmax.f32 %v2361_v38, 0.0  ;;  %v2363_v11 = vadd.f32 %v2362_v63, %v8811_v0  ;;  %v7280_v41 = vpack.c.bf16 %v3875_v46, %v3874_v3  ;;  %v7589_v63 = vld [vmem:[%s10213_s1 + $0x68] sm:$0xff]  }
 0x28a   : > { %v2590_v20 = vadd.f32 %v2589_v30, %v8799_v24  ;;  %v2364_v61 = vpop.f32.mrf.mxu0  ;;  %v2593_v55 = vpop.f32.mrf.mxu1  ;;  %6793 = vmatmul.mubr.msk.bf16.gmra.mxu1 %vm1719_vm8, %v7588_v10  ;;  %v3890_v15 = vmax.f32 %v2588_v7, 0.0 }
 0x28b   : > { %6329 = vst [vmem:[%s8663_s26 + $0x3d0] sm:$0xff] %v7287_v39  ;;  %v3905_v19 = vmax.f32 %v2363_v11, 0.0  ;;  %v2365_v54 = vadd.f32 %v2364_v61, %v8821_v28  ;;  %3107 = vmatprep.mubr.bf16.mxu1 %v7719_v21  ;;  %6322 = vst [vmem:[%s8663_s26 + $0x398] sm:$0xff] %v7280_v41  ;;  %v2594_v16 = vadd.f32 %v2593_v55, %v8811_v0 }
 0x28c   : > { %v3891_v2 = vmax.f32 %v2590_v20, 0.0  ;;  %v2366_v45 = vpop.f32.mrf.mxu0  ;;  %v2595_v9 = vpop.f32.mrf.mxu1 }
 0x28d   : > { %v7295_v6 = vpack.c.bf16 %v3905_v19, %v3904_v56  ;;  %v2367_v43 = vadd.f32 %v2366_v45, %v8821_v28  ;;  %v2596_v10 = vadd.f32 %v2595_v9, %v8811_v0  ;;  %v3920_v7 = vmax.f32 %v2365_v54, 0.0 }
 0x28e   : > { %v7288_v38 = vpack.c.bf16 %v3891_v2, %v3890_v15  ;;  %v2370_v3 = vpop.f32.mrf.mxu0  ;;  %v2597_v46 = vpop.f32.mrf.mxu1  ;;  %6774 = vmatmul.mubr.msk.bf16.gmra.mxu0 %vm1719_vm8, %v7589_v63  ;;  %v3906_v56 = vmax.f32 %v2594_v16, 0.0 }
 0x28f   : > { %6337 = vst [vmem:[%s8663_s26 + $0x410] sm:$0xff] %v7295_v6  ;;  %v3921_v30 = vmax.f32 %v2367_v43, 0.0  ;;  %v2371_v39 = vadd.f32 %v2370_v3, %v8833_v51  ;;  %2884 = vmatprep.mubr.bf16.mxu0 %v7719_v21  ;;  %v3907_v11 = vmax.f32 %v2596_v10, 0.0  ;;  %v2598_v41 = vadd.f32 %v2597_v46, %v8821_v28 }
 0x290   : > { %6330 = vst [vmem:[%s8663_s26 + $0x3d8] sm:$0xff] %v7288_v38  ;;  %v2372_v20 = vpop.f32.mrf.mxu0  ;;  %v2599_v61 = vpop.f32.mrf.mxu1 }
 0x291   : > { %v7303_v55 = vpack.c.bf16 %v3921_v30, %v3920_v7  ;;  %v3936_v19 = vmax.f32 %v2371_v39, 0.0  ;;  %v2373_v15 = vadd.f32 %v2372_v20, %v8833_v51  ;;  %v7296_v2 = vpack.c.bf16 %v3907_v11, %v3906_v56  ;;  %v7590_v20 = vld [vmem:[%s10213_s1 + $0x70] sm:$0xff]  }
 0x292   : > { %v2600_v54 = vadd.f32 %v2599_v61, %v8821_v28  ;;  %v2374_v45 = vpop.f32.mrf.mxu0  ;;  %v2603_v9 = vpop.f32.mrf.mxu1  ;;  %6794 = vmatmul.mubr.msk.bf16.gmra.mxu1 %vm1719_vm8, %v7589_v63  ;;  %v3922_v43 = vmax.f32 %v2598_v41, 0.0 }
 0x293   : > { %6345 = vst [vmem:[%s8663_s26 + $0x450] sm:$0xff] %v7303_v55  ;;  %v3937_v6 = vmax.f32 %v2373_v15, 0.0  ;;  %v2375_v16 = vadd.f32 %v2374_v45, %v8843_v36  ;;  %3117 = vmatprep.mubr.bf16.mxu1 %v7719_v21  ;;  %6338 = vst [vmem:[%s8663_s26 + $0x418] sm:$0xff] %v7296_v2  ;;  %v2604_v10 = vadd.f32 %v2603_v9, %v8833_v51 }
 0x294   : > { %v3923_v38 = vmax.f32 %v2600_v54, 0.0  ;;  %v2376_v3 = vpop.f32.mrf.mxu0  ;;  %v2605_v46 = vpop.f32.mrf.mxu1 }
 0x295   : > { %v7311_v7 = vpack.c.bf16 %v3937_v6, %v3936_v19  ;;  %v2377_v30 = vadd.f32 %v2376_v3, %v8843_v36  ;;  %v2606_v63 = vadd.f32 %v2605_v46, %v8833_v51  ;;  %v3952_v41 = vmax.f32 %v2375_v16, 0.0 }
 0x296   : > { %v7304_v39 = vpack.c.bf16 %v3923_v38, %v3922_v43  ;;  %v2380_v56 = vpop.f32.mrf.mxu0  ;;  %v2607_v11 = vpop.f32.mrf.mxu1  ;;  %6775 = vmatmul.mubr.msk.bf16.gmra.mxu0 %vm1719_vm8, %v7590_v20  ;;  %v3938_v19 = vmax.f32 %v2604_v10, 0.0 }
 0x297   : > { %6353 = vst [vmem:[%s8663_s26 + $0x490] sm:$0xff] %v7311_v7  ;;  %v3953_v61 = vmax.f32 %v2377_v30, 0.0  ;;  %v2381_v55 = vadd.f32 %v2380_v56, %v8855_v40  ;;  %2894 = vmatprep.mubr.bf16.mxu0 %v7719_v21  ;;  %v3939_v15 = vmax.f32 %v2606_v63, 0.0  ;;  %v2608_v2 = vadd.f32 %v2607_v11, %v8843_v36 }
 0x298   : > { %6346 = vst [vmem:[%s8663_s26 + $0x458] sm:$0xff] %v7304_v39  ;;  %v2382_v54 = vpop.f32.mrf.mxu0  ;;  %v2609_v45 = vpop.f32.mrf.mxu1 }
 0x299   : > { %v7319_v9 = vpack.c.bf16 %v3953_v61, %v3952_v41  ;;  %v3968_v6 = vmax.f32 %v2381_v55, 0.0  ;;  %v2383_v43 = vadd.f32 %v2382_v54, %v8855_v40  ;;  %v7312_v38 = vpack.c.bf16 %v3939_v15, %v3938_v19  ;;  %v7591_v54 = vld [vmem:[%s10213_s1 + $0x78] sm:$0xff]  }
 0x29a   : > { %v2610_v16 = vadd.f32 %v2609_v45, %v8843_v36  ;;  %v2384_v3 = vpop.f32.mrf.mxu0  ;;  %v2613_v46 = vpop.f32.mrf.mxu1  ;;  %6795 = vmatmul.mubr.msk.bf16.gmra.mxu1 %vm1719_vm8, %v7590_v20  ;;  %v3954_v30 = vmax.f32 %v2608_v2, 0.0 }
 0x29b   : > { %6361 = vst [vmem:[%s8663_s26 + $0x4d0] sm:$0xff] %v7319_v9  ;;  %v3969_v7 = vmax.f32 %v2383_v43, 0.0  ;;  %v2385_v10 = vadd.f32 %v2384_v3, %v8865_v47  ;;  %3127 = vmatprep.mubr.bf16.mxu1 %v7719_v21  ;;  %6354 = vst [vmem:[%s8663_s26 + $0x498] sm:$0xff] %v7312_v38  ;;  %v2614_v63 = vadd.f32 %v2613_v46, %v8855_v40 }
 0x29c   : > { %v3955_v39 = vmax.f32 %v2610_v16, 0.0  ;;  %v2386_v56 = vpop.f32.mrf.mxu0  ;;  %v2615_v11 = vpop.f32.mrf.mxu1 }
 0x29d   : > { %v7327_v41 = vpack.c.bf16 %v3969_v7, %v3968_v6  ;;  %v2387_v61 = vadd.f32 %v2386_v56, %v8865_v47  ;;  %v2616_v20 = vadd.f32 %v2615_v11, %v8855_v40  ;;  %v3984_v2 = vmax.f32 %v2385_v10, 0.0 }
 0x29e   : > { %v7320_v55 = vpack.c.bf16 %v3955_v39, %v3954_v30  ;;  %v2390_v19 = vpop.f32.mrf.mxu0  ;;  %v2617_v15 = vpop.f32.mrf.mxu1  ;;  %6776 = vmatmul.mubr.msk.bf16.gmra.mxu0 %vm1719_vm8, %v7591_v54  ;;  %v3970_v6 = vmax.f32 %v2614_v63, 0.0 }
 0x29f   : > { %6369 = vst [vmem:[%s8663_s26 + $0x510] sm:$0xff] %v7327_v41  ;;  %v3985_v45 = vmax.f32 %v2387_v61, 0.0  ;;  %v2391_v9 = vadd.f32 %v2390_v19, %v8877_v34  ;;  %2904 = vmatprep.mubr.bf16.mxu0 %v7719_v21  ;;  %v3971_v43 = vmax.f32 %v2616_v20, 0.0  ;;  %v2618_v38 = vadd.f32 %v2617_v15, %v8865_v47 }
 0x2a0   : > { %6362 = vst [vmem:[%s8663_s26 + $0x4d8] sm:$0xff] %v7320_v55  ;;  %v2392_v16 = vpop.f32.mrf.mxu0  ;;  %v2619_v3 = vpop.f32.mrf.mxu1 }
 0x2a1   : > { %v7335_v46 = vpack.c.bf16 %v3985_v45, %v3984_v2  ;;  %v4000_v7 = vmax.f32 %v2391_v9, 0.0  ;;  %v2393_v30 = vadd.f32 %v2392_v16, %v8877_v34  ;;  %v7328_v39 = vpack.c.bf16 %v3971_v43, %v3970_v6  ;;  %v7592_v16 = vld [vmem:[%s10213_s1 + $0x80] sm:$0xff]  }
 0x2a2   : > { %v2620_v10 = vadd.f32 %v2619_v3, %v8865_v47  ;;  %v2394_v56 = vpop.f32.mrf.mxu0  ;;  %v2623_v11 = vpop.f32.mrf.mxu1  ;;  %6796 = vmatmul.mubr.msk.bf16.gmra.mxu1 %vm1719_vm8, %v7591_v54  ;;  %v3986_v61 = vmax.f32 %v2618_v38, 0.0 }
 0x2a3   : > { %6377 = vst [vmem:[%s8663_s26 + $0x550] sm:$0xff] %v7335_v46  ;;  %v4001_v41 = vmax.f32 %v2393_v30, 0.0  ;;  %v2395_v63 = vadd.f32 %v2394_v56, %v8887_v1  ;;  %3137 = vmatprep.mubr.bf16.mxu1 %v7719_v21  ;;  %6370 = vst [vmem:[%s8663_s26 + $0x518] sm:$0xff] %v7328_v39  ;;  %v2624_v20 = vadd.f32 %v2623_v11, %v8877_v34 }
 0x2a4   : > { %v3987_v55 = vmax.f32 %v2620_v10, 0.0  ;;  %v2396_v19 = vpop.f32.mrf.mxu0  ;;  %v2625_v15 = vpop.f32.mrf.mxu1 }
 0x2a5   : > { %v7343_v2 = vpack.c.bf16 %v4001_v41, %v4000_v7  ;;  %v2397_v45 = vadd.f32 %v2396_v19, %v8887_v1  ;;  %v2626_v54 = vadd.f32 %v2625_v15, %v8877_v34  ;;  %v4016_v38 = vmax.f32 %v2395_v63, 0.0 }
 0x2a6   : > { %v7336_v9 = vpack.c.bf16 %v3987_v55, %v3986_v61  ;;  %v2400_v6 = vpop.f32.mrf.mxu0  ;;  %v2627_v43 = vpop.f32.mrf.mxu1  ;;  %6777 = vmatmul.mubr.msk.bf16.gmra.mxu0 %vm1719_vm8, %v7592_v16  ;;  %v4002_v7 = vmax.f32 %v2624_v20, 0.0 }
 0x2a7   : > { %6385 = vst [vmem:[%s8663_s26 + $0x590] sm:$0xff] %v7343_v2  ;;  %v4017_v3 = vmax.f32 %v2397_v45, 0.0  ;;  %v2401_v46 = vadd.f32 %v2400_v6, %v8899_v17  ;;  %2914 = vmatprep.mubr.bf16.mxu0 %v7719_v21  ;;  %v4003_v30 = vmax.f32 %v2626_v54, 0.0  ;;  %v2628_v39 = vadd.f32 %v2627_v43, %v8887_v1 }
 0x2a8   : > { %6378 = vst [vmem:[%s8663_s26 + $0x558] sm:$0xff] %v7336_v9  ;;  %v2402_v10 = vpop.f32.mrf.mxu0  ;;  %v2629_v56 = vpop.f32.mrf.mxu1 }
 0x2a9   : > { %v7351_v11 = vpack.c.bf16 %v4017_v3, %v4016_v38  ;;  %v4032_v41 = vmax.f32 %v2401_v46, 0.0  ;;  %v2403_v61 = vadd.f32 %v2402_v10, %v8899_v17  ;;  %v7344_v55 = vpack.c.bf16 %v4003_v30, %v4002_v7  ;;  %v7593_v10 = vld [vmem:[%s10213_s1 + $0x88] sm:$0xff]  }
 0x2aa   : > { %v2630_v63 = vadd.f32 %v2629_v56, %v8887_v1  ;;  %v2404_v19 = vpop.f32.mrf.mxu0  ;;  %v2633_v15 = vpop.f32.mrf.mxu1  ;;  %6797 = vmatmul.mubr.msk.bf16.gmra.mxu1 %vm1719_vm8, %v7592_v16  ;;  %v4018_v45 = vmax.f32 %v2628_v39, 0.0 }
 0x2ab   : > { %6393 = vst [vmem:[%s8663_s26 + $0x5d0] sm:$0xff] %v7351_v11  ;;  %v4033_v2 = vmax.f32 %v2403_v61, 0.0  ;;  %v2405_v20 = vadd.f32 %v2404_v19, %v8909_v8  ;;  %3147 = vmatprep.mubr.bf16.mxu1 %v7719_v21  ;;  %6386 = vst [vmem:[%s8663_s26 + $0x598] sm:$0xff] %v7344_v55  ;;  %v2634_v54 = vadd.f32 %v2633_v15, %v8899_v17 }
 0x2ac   : > { %v4019_v9 = vmax.f32 %v2630_v63, 0.0  ;;  %v2406_v6 = vpop.f32.mrf.mxu0  ;;  %v2635_v43 = vpop.f32.mrf.mxu1 }
 0x2ad   : > { %v7359_v38 = vpack.c.bf16 %v4033_v2, %v4032_v41  ;;  %v2407_v3 = vadd.f32 %v2406_v6, %v8909_v8  ;;  %v2636_v16 = vadd.f32 %v2635_v43, %v8899_v17  ;;  %v4048_v39 = vmax.f32 %v2405_v20, 0.0 }
 0x2ae   : > { %v7352_v46 = vpack.c.bf16 %v4019_v9, %v4018_v45  ;;  %v2410_v7 = vpop.f32.mrf.mxu0  ;;  %v2637_v30 = vpop.f32.mrf.mxu1  ;;  %6778 = vmatmul.mubr.msk.bf16.gmra.mxu0 %vm1719_vm8, %v7593_v10  ;;  %v4034_v41 = vmax.f32 %v2634_v54, 0.0 }
 0x2af   : > { %6401 = vst [vmem:[%s8663_s26 + $0x610] sm:$0xff] %v7359_v38  ;;  %v4049_v56 = vmax.f32 %v2407_v3, 0.0  ;;  %v2411_v11 = vadd.f32 %v2410_v7, %v8923_v25  ;;  %2924 = vmatprep.mubr.bf16.mxu0 %v7719_v21  ;;  %v4035_v61 = vmax.f32 %v2636_v16, 0.0  ;;  %v2638_v55 = vadd.f32 %v2637_v30, %v8909_v8 }
 0x2b0   : > { %6394 = vst [vmem:[%s8663_s26 + $0x5d8] sm:$0xff] %v7352_v46  ;;  %v2412_v63 = vpop.f32.mrf.mxu0  ;;  %v2639_v19 = vpop.f32.mrf.mxu1 }
 0x2b1   : > { %v7367_v15 = vpack.c.bf16 %v4049_v56, %v4048_v39  ;;  %v4064_v2 = vmax.f32 %v2411_v11, 0.0  ;;  %v2413_v45 = vadd.f32 %v2412_v63, %v8923_v25  ;;  %v7360_v9 = vpack.c.bf16 %v4035_v61, %v4034_v41  ;;  %v7594_v63 = vld [vmem:[%s10213_s1 + $0x90] sm:$0xff]  }
 0x2b2   : > { %v2640_v20 = vadd.f32 %v2639_v19, %v8909_v8  ;;  %v2414_v6 = vpop.f32.mrf.mxu0  ;;  %v2643_v43 = vpop.f32.mrf.mxu1  ;;  %6798 = vmatmul.mubr.msk.bf16.gmra.mxu1 %vm1719_vm8, %v7593_v10  ;;  %v4050_v3 = vmax.f32 %v2638_v55, 0.0 }
 0x2b3   : > { %6409 = vst [vmem:[%s8663_s26 + $0x650] sm:$0xff] %v7367_v15  ;;  %v4065_v38 = vmax.f32 %v2413_v45, 0.0  ;;  %v2415_v54 = vadd.f32 %v2414_v6, %v8935_v32  ;;  %3157 = vmatprep.mubr.bf16.mxu1 %v7719_v21  ;;  %6402 = vst [vmem:[%s8663_s26 + $0x618] sm:$0xff] %v7360_v9  ;;  %v2644_v16 = vadd.f32 %v2643_v43, %v8923_v25 }
 0x2b4   : > { %v4051_v46 = vmax.f32 %v2640_v20, 0.0  ;;  %v2416_v7 = vpop.f32.mrf.mxu0  ;;  %v2645_v30 = vpop.f32.mrf.mxu1 }
 0x2b5   : > { %v7375_v39 = vpack.c.bf16 %v4065_v38, %v4064_v2  ;;  %v2417_v56 = vadd.f32 %v2416_v7, %v8935_v32  ;;  %v2646_v10 = vadd.f32 %v2645_v30, %v8923_v25  ;;  %v4080_v55 = vmax.f32 %v2415_v54, 0.0 }
 0x2b6   : > { %v7368_v11 = vpack.c.bf16 %v4051_v46, %v4050_v3  ;;  %v2420_v41 = vpop.f32.mrf.mxu0  ;;  %v2647_v61 = vpop.f32.mrf.mxu1  ;;  %6779 = vmatmul.mubr.msk.bf16.gmra.mxu0 %vm1719_vm8, %v7594_v63  ;;  %v4066_v2 = vmax.f32 %v2644_v16, 0.0 }
 0x2b7   : > { %6417 = vst [vmem:[%s8663_s26 + $0x690] sm:$0xff] %v7375_v39  ;;  %v4081_v19 = vmax.f32 %v2417_v56, 0.0  ;;  %v2421_v15 = vadd.f32 %v2420_v41, %v8946_v57  ;;  %2934 = vmatprep.mubr.bf16.mxu0 %v7719_v21  ;;  %v4067_v45 = vmax.f32 %v2646_v10, 0.0  ;;  %v2648_v9 = vadd.f32 %v2647_v61, %v8935_v32 }
 0x2b8   : > { %6410 = vst [vmem:[%s8663_s26 + $0x658] sm:$0xff] %v7368_v11  ;;  %v2422_v20 = vpop.f32.mrf.mxu0  ;;  %v2649_v6 = vpop.f32.mrf.mxu1 }
 0x2b9   : > { %v7383_v43 = vpack.c.bf16 %v4081_v19, %v4080_v55  ;;  %v4096_v38 = vmax.f32 %v2421_v15, 0.0  ;;  %v2423_v3 = vadd.f32 %v2422_v20, %v8946_v57  ;;  %v7376_v46 = vpack.c.bf16 %v4067_v45, %v4066_v2  ;;  %v7595_v20 = vld [vmem:[%s10213_s1 + $0x98] sm:$0xff]  }
 0x2ba   : > { %v2650_v54 = vadd.f32 %v2649_v6, %v8935_v32  ;;  %v2424_v7 = vpop.f32.mrf.mxu0  ;;  %v2653_v30 = vpop.f32.mrf.mxu1  ;;  %6799 = vmatmul.mubr.msk.bf16.gmra.mxu1 %vm1719_vm8, %v7594_v63  ;;  %v4082_v56 = vmax.f32 %v2648_v9, 0.0 }
 0x2bb   : > { %6425 = vst [vmem:[%s8663_s26 + $0x6d0] sm:$0xff] %v7383_v43  ;;  %v4097_v39 = vmax.f32 %v2423_v3, 0.0  ;;  %v2425_v16 = vadd.f32 %v2424_v7, %v8958_v18  ;;  %3167 = vmatprep.mubr.bf16.mxu1 %v7719_v21  ;;  %6418 = vst [vmem:[%s8663_s26 + $0x698] sm:$0xff] %v7376_v46  ;;  %v2654_v10 = vadd.f32 %v2653_v30, %v8946_v57 }
 0x2bc   : > { %v4083_v11 = vmax.f32 %v2650_v54, 0.0  ;;  %v2426_v41 = vpop.f32.mrf.mxu0  ;;  %v2655_v61 = vpop.f32.mrf.mxu1 }
 0x2bd   : > { %v7391_v55 = vpack.c.bf16 %v4097_v39, %v4096_v38  ;;  %v2427_v19 = vadd.f32 %v2426_v41, %v8958_v18  ;;  %v2656_v63 = vadd.f32 %v2655_v61, %v8946_v57  ;;  %v4112_v9 = vmax.f32 %v2425_v16, 0.0 }
 0x2be   : > { %v7384_v15 = vpack.c.bf16 %v4083_v11, %v4082_v56  ;;  %v2430_v2 = vpop.f32.mrf.mxu0  ;;  %v2657_v45 = vpop.f32.mrf.mxu1  ;;  %6780 = vmatmul.mubr.msk.bf16.gmra.mxu0 %vm1719_vm8, %v7595_v20  ;;  %v4098_v38 = vmax.f32 %v2654_v10, 0.0 }
 0x2bf   : > { %6433 = vst [vmem:[%s8663_s26 + $0x710] sm:$0xff] %v7391_v55  ;;  %v4113_v6 = vmax.f32 %v2427_v19, 0.0  ;;  %v2431_v43 = vadd.f32 %v2430_v2, %v8969_v52  ;;  %3210 = vmatprep.mubr.bf16.mxu0 %v7719_v21  ;;  %v4099_v3 = vmax.f32 %v2656_v63, 0.0  ;;  %v2658_v46 = vadd.f32 %v2657_v45, %v8958_v18 }
 0x2c0   : > { %6426 = vst [vmem:[%s8663_s26 + $0x6d8] sm:$0xff] %v7384_v15  ;;  %v2432_v54 = vpop.f32.mrf.mxu0  ;;  %v2659_v7 = vpop.f32.mrf.mxu1 }
 0x2c1   : > { %v7399_v30 = vpack.c.bf16 %v4113_v6, %v4112_v9  ;;  %v4128_v39 = vmax.f32 %v2431_v43, 0.0  ;;  %v2433_v56 = vadd.f32 %v2432_v54, %v8969_v52  ;;  %v7392_v11 = vpack.c.bf16 %v4099_v3, %v4098_v38  ;;  %v7596_v54 = vld [vmem:[%s10213_s1] sm:$0xff]  }
 0x2c2   : > { %v2660_v16 = vadd.f32 %v2659_v7, %v8958_v18  ;;  %v2434_v41 = vpop.f32.mrf.mxu0  ;;  %v2663_v61 = vpop.f32.mrf.mxu1  ;;  %6800 = vmatmul.mubr.msk.bf16.gmra.mxu1 %vm1719_vm8, %v7595_v20  ;;  %v4114_v19 = vmax.f32 %v2658_v46, 0.0 }
 0x2c3   : > { %6441 = vst [vmem:[%s8663_s26 + $0x750] sm:$0xff] %v7399_v30  ;;  %v4129_v55 = vmax.f32 %v2433_v56, 0.0  ;;  %v2435_v10 = vadd.f32 %v2434_v41, %v8981_v48  ;;  %3443 = vmatprep.mubr.bf16.mxu1 %v7719_v21  ;;  %6434 = vst [vmem:[%s8663_s26 + $0x718] sm:$0xff] %v7392_v11  ;;  %v2664_v63 = vadd.f32 %v2663_v61, %v8969_v52 }
 0x2c4   : > { %v4115_v15 = vmax.f32 %v2660_v16, 0.0  ;;  %v2436_v2 = vpop.f32.mrf.mxu0  ;;  %v2665_v45 = vpop.f32.mrf.mxu1 }
 0x2c5   : > { %v7407_v9 = vpack.c.bf16 %v4129_v55, %v4128_v39  ;;  %v2437_v6 = vadd.f32 %v2436_v2, %v8981_v48  ;;  %v2666_v20 = vadd.f32 %v2665_v45, %v8969_v52  ;;  %v4144_v46 = vmax.f32 %v2435_v10, 0.0 }
 0x2c6   : > { %v7400_v43 = vpack.c.bf16 %v4115_v15, %v4114_v19  ;;  %v2440_v38 = vpop.f32.mrf.mxu0  ;;  %v2667_v3 = vpop.f32.mrf.mxu1  ;;  %6801 = vmatmul.mubr.msk.bf16.vlgmr.msra.gmra.mxu0 %vm1719_vm8, %v7596_v54  ;;  %v4130_v39 = vmax.f32 %v2664_v63, 0.0 }
 0x2c7   : > { %6449 = vst [vmem:[%s8663_s26 + $0x790] sm:$0xff] %v7407_v9  ;;  %v4145_v7 = vmax.f32 %v2437_v6, 0.0  ;;  %v2441_v30 = vadd.f32 %v2440_v38, %v8992_v60  ;;  %3220 = vmatprep.mubr.bf16.mxu0 %v7719_v21  ;;  %v4131_v56 = vmax.f32 %v2666_v20, 0.0  ;;  %v2668_v11 = vadd.f32 %v2667_v3, %v8981_v48 }
 0x2c8   : > { %6442 = vst [vmem:[%s8663_s26 + $0x758] sm:$0xff] %v7400_v43  ;;  %v2442_v16 = vpop.f32.mrf.mxu0  ;;  %v2669_v41 = vpop.f32.mrf.mxu1 }
 0x2c9   : > { %v7415_v61 = vpack.c.bf16 %v4145_v7, %v4144_v46  ;;  %v4160_v55 = vmax.f32 %v2441_v30, 0.0  ;;  %v2443_v19 = vadd.f32 %v2442_v16, %v8992_v60  ;;  %v7408_v15 = vpack.c.bf16 %v4131_v56, %v4130_v39  ;;  %v7597_v16 = vld [vmem:[%s10213_s1 + $0x8] sm:$0xff]  }
 0x2ca   : > { %v2670_v10 = vadd.f32 %v2669_v41, %v8981_v48  ;;  %v2444_v2 = vpop.f32.mrf.mxu0  ;;  %v2673_v45 = vpop.f32.mrf.mxu1  ;;  %6821 = vmatmul.mubr.msk.bf16.vlgmr.msra.gmra.mxu1 %vm1719_vm8, %v7596_v54  ;;  %v4146_v6 = vmax.f32 %v2668_v11, 0.0 }
 0x2cb   : > { %6457 = vst [vmem:[%s8663_s26 + $0x7d0] sm:$0xff] %v7415_v61  ;;  %v4161_v9 = vmax.f32 %v2443_v19, 0.0  ;;  %v2445_v63 = vadd.f32 %v2444_v2, %v9011_v35  ;;  %3453 = vmatprep.mubr.bf16.mxu1 %v7719_v21  ;;  %6450 = vst [vmem:[%s8663_s26 + $0x798] sm:$0xff] %v7408_v15  ;;  %v2674_v20 = vadd.f32 %v2673_v45, %v8992_v60 }
 0x2cc   : > { %v4147_v43 = vmax.f32 %v2670_v10, 0.0  ;;  %v2446_v38 = vpop.f32.mrf.mxu0  ;;  %v2675_v3 = vpop.f32.mrf.mxu1 }
 0x2cd   : > { %v7423_v46 = vpack.c.bf16 %v4161_v9, %v4160_v55  ;;  %v2447_v7 = vadd.f32 %v2446_v38, %v9011_v35  ;;  %v2676_v54 = vadd.f32 %v2675_v3, %v8992_v60  ;;  %v4176_v11 = vmax.f32 %v2445_v63, 0.0 }
 0x2ce   : > { %v7416_v30 = vpack.c.bf16 %v4147_v43, %v4146_v6  ;;  %v2450_v39 = vpop.f32.mrf.mxu0  ;;  %v2677_v56 = vpop.f32.mrf.mxu1  ;;  %6802 = vmatmul.mubr.msk.bf16.gmra.mxu0 %vm1719_vm8, %v7597_v16  ;;  %v4162_v55 = vmax.f32 %v2674_v20, 0.0 }
 0x2cf   : > { %6465 = vst [vmem:[%s8663_s26 + $0x810] sm:$0xff] %v7423_v46  ;;  %v4177_v41 = vmax.f32 %v2447_v7, 0.0  ;;  %v2451_v61 = vadd.f32 %v2450_v39, %v9028_v5  ;;  %3230 = vmatprep.mubr.bf16.mxu0 %v7719_v21  ;;  %v4163_v19 = vmax.f32 %v2676_v54, 0.0  ;;  %v2678_v15 = vadd.f32 %v2677_v56, %v9011_v35 }
 0x2d0   : > { %6458 = vst [vmem:[%s8663_s26 + $0x7d8] sm:$0xff] %v7416_v30  ;;  %v2452_v10 = vpop.f32.mrf.mxu0  ;;  %v2679_v2 = vpop.f32.mrf.mxu1 }
 0x2d1   : > { %v7431_v45 = vpack.c.bf16 %v4177_v41, %v4176_v11  ;;  %v4192_v9 = vmax.f32 %v2451_v61, 0.0  ;;  %v2453_v6 = vadd.f32 %v2452_v10, %v9028_v5  ;;  %v7424_v43 = vpack.c.bf16 %v4163_v19, %v4162_v55  ;;  %v7598_v10 = vld [vmem:[%s10213_s1 + $0x10] sm:$0xff]  }
 0x2d2   : > { %v2680_v63 = vadd.f32 %v2679_v2, %v9011_v35  ;;  %v2454_v38 = vpop.f32.mrf.mxu0  ;;  %v2683_v3 = vpop.f32.mrf.mxu1  ;;  %6822 = vmatmul.mubr.msk.bf16.gmra.mxu1 %vm1719_vm8, %v7597_v16  ;;  %v4178_v7 = vmax.f32 %v2678_v15, 0.0 }
 0x2d3   : > { %6473 = vst [vmem:[%s8663_s26 + $0x850] sm:$0xff] %v7431_v45  ;;  %v4193_v46 = vmax.f32 %v2453_v6, 0.0  ;;  %v2455_v20 = vadd.f32 %v2454_v38, %v9041_v62  ;;  %3463 = vmatprep.mubr.bf16.mxu1 %v7719_v21  ;;  %6466 = vst [vmem:[%s8663_s26 + $0x818] sm:$0xff] %v7424_v43  ;;  %v2684_v54 = vadd.f32 %v2683_v3, %v9028_v5 }
 0x2d4   : > { %v4179_v30 = vmax.f32 %v2680_v63, 0.0  ;;  %v2456_v39 = vpop.f32.mrf.mxu0  ;;  %v2685_v56 = vpop.f32.mrf.mxu1 }
 0x2d5   : > { %v7439_v11 = vpack.c.bf16 %v4193_v46, %v4192_v9  ;;  %v2457_v41 = vadd.f32 %v2456_v39, %v9041_v62  ;;  %v2686_v16 = vadd.f32 %v2685_v56, %v9028_v5  ;;  %v4208_v15 = vmax.f32 %v2455_v20, 0.0 }
 0x2d6   : > { %v7432_v61 = vpack.c.bf16 %v4179_v30, %v4178_v7  ;;  %v2460_v55 = vpop.f32.mrf.mxu0  ;;  %v2687_v19 = vpop.f32.mrf.mxu1  ;;  %6803 = vmatmul.mubr.msk.bf16.gmra.mxu0 %vm1719_vm8, %v7598_v10  ;;  %v4194_v9 = vmax.f32 %v2684_v54, 0.0 }
 0x2d7   : > { %6481 = vst [vmem:[%s8663_s26 + $0x890] sm:$0xff] %v7439_v11  ;;  %v4209_v2 = vmax.f32 %v2457_v41, 0.0  ;;  %v2461_v45 = vadd.f32 %v2460_v55, %v9052_v37  ;;  %3240 = vmatprep.mubr.bf16.mxu0 %v7719_v21  ;;  %v4195_v6 = vmax.f32 %v2686_v16, 0.0  ;;  %v2688_v43 = vadd.f32 %v2687_v19, %v9041_v62 }
 0x2d8   : > { %6474 = vst [vmem:[%s8663_s26 + $0x858] sm:$0xff] %v7432_v61  ;;  %v2462_v63 = vpop.f32.mrf.mxu0  ;;  %v2689_v38 = vpop.f32.mrf.mxu1 }
 0x2d9   : > { %v7447_v3 = vpack.c.bf16 %v4209_v2, %v4208_v15  ;;  %v4224_v46 = vmax.f32 %v2461_v45, 0.0  ;;  %v2463_v7 = vadd.f32 %v2462_v63, %v9052_v37  ;;  %v7440_v30 = vpack.c.bf16 %v4195_v6, %v4194_v9  ;;  %v7599_v63 = vld [vmem:[%s10213_s1 + $0x18] sm:$0xff]  }
 0x2da   : > { %v2690_v20 = vadd.f32 %v2689_v38, %v9041_v62  ;;  %v2464_v39 = vpop.f32.mrf.mxu0  ;;  %v2693_v56 = vpop.f32.mrf.mxu1  ;;  %6823 = vmatmul.mubr.msk.bf16.gmra.mxu1 %vm1719_vm8, %v7598_v10  ;;  %v4210_v41 = vmax.f32 %v2688_v43, 0.0 }
 0x2db   : > { %6489 = vst [vmem:[%s8663_s26 + $0x8d0] sm:$0xff] %v7447_v3  ;;  %v4225_v11 = vmax.f32 %v2463_v7, 0.0  ;;  %v2465_v54 = vadd.f32 %v2464_v39, %v9064_v58  ;;  %3473 = vmatprep.mubr.bf16.mxu1 %v7719_v21  ;;  %6482 = vst [vmem:[%s8663_s26 + $0x898] sm:$0xff] %v7440_v30  ;;  %v2694_v16 = vadd.f32 %v2693_v56, %v9052_v37 }
 0x2dc   : > { %v4211_v61 = vmax.f32 %v2690_v20, 0.0  ;;  %v2466_v55 = vpop.f32.mrf.mxu0  ;;  %v2695_v19 = vpop.f32.mrf.mxu1 }
 0x2dd   : > { %v7455_v15 = vpack.c.bf16 %v4225_v11, %v4224_v46  ;;  %v2467_v2 = vadd.f32 %v2466_v55, %v9064_v58  ;;  %v2696_v10 = vadd.f32 %v2695_v19, %v9052_v37  ;;  %v4240_v43 = vmax.f32 %v2465_v54, 0.0 }
 0x2de   : > { %v7448_v45 = vpack.c.bf16 %v4211_v61, %v4210_v41  ;;  %v2470_v9 = vpop.f32.mrf.mxu0  ;;  %v2697_v6 = vpop.f32.mrf.mxu1  ;;  %6804 = vmatmul.mubr.msk.bf16.gmra.mxu0 %vm1719_vm8, %v7599_v63  ;;  %v4226_v46 = vmax.f32 %v2694_v16, 0.0 }
 0x2df   : > { %6497 = vst [vmem:[%s8663_s26 + $0x910] sm:$0xff] %v7455_v15  ;;  %v4241_v38 = vmax.f32 %v2467_v2, 0.0  ;;  %v2471_v3 = vadd.f32 %v2470_v9, %v9075_v27  ;;  %3250 = vmatprep.mubr.bf16.mxu0 %v7719_v21  ;;  %v4227_v7 = vmax.f32 %v2696_v10, 0.0  ;;  %v2698_v30 = vadd.f32 %v2697_v6, %v9064_v58 }
 0x2e0   : > { %6490 = vst [vmem:[%s8663_s26 + $0x8d8] sm:$0xff] %v7448_v45  ;;  %v2472_v20 = vpop.f32.mrf.mxu0  ;;  %v2699_v39 = vpop.f32.mrf.mxu1 }
 0x2e1   : > { %v7463_v56 = vpack.c.bf16 %v4241_v38, %v4240_v43  ;;  %v4256_v11 = vmax.f32 %v2471_v3, 0.0  ;;  %v2473_v41 = vadd.f32 %v2472_v20, %v9075_v27  ;;  %v7456_v61 = vpack.c.bf16 %v4227_v7, %v4226_v46  ;;  %v7600_v20 = vld [vmem:[%s10213_s1 + $0x20] sm:$0xff]  }
 0x2e2   : > { %v2700_v54 = vadd.f32 %v2699_v39, %v9064_v58  ;;  %v2474_v55 = vpop.f32.mrf.mxu0  ;;  %v2703_v19 = vpop.f32.mrf.mxu1  ;;  %6824 = vmatmul.mubr.msk.bf16.gmra.mxu1 %vm1719_vm8, %v7599_v63  ;;  %v4242_v2 = vmax.f32 %v2698_v30, 0.0 }
 0x2e3   : > { %6505 = vst [vmem:[%s8663_s26 + $0x950] sm:$0xff] %v7463_v56  ;;  %v4257_v15 = vmax.f32 %v2473_v41, 0.0  ;;  %v2475_v16 = vadd.f32 %v2474_v55, %v9089_v22  ;;  %3483 = vmatprep.mubr.bf16.mxu1 %v7719_v21  ;;  %6498 = vst [vmem:[%s8663_s26 + $0x918] sm:$0xff] %v7456_v61  ;;  %v2704_v10 = vadd.f32 %v2703_v19, %v9075_v27 }
 0x2e4   : > { %v4243_v45 = vmax.f32 %v2700_v54, 0.0  ;;  %v2476_v9 = vpop.f32.mrf.mxu0  ;;  %v2705_v6 = vpop.f32.mrf.mxu1 }
 0x2e5   : > { %v7471_v43 = vpack.c.bf16 %v4257_v15, %v4256_v11  ;;  %v2477_v38 = vadd.f32 %v2476_v9, %v9089_v22  ;;  %v2706_v63 = vadd.f32 %v2705_v6, %v9075_v27  ;;  %v4272_v30 = vmax.f32 %v2475_v16, 0.0 }
 0x2e6   : > { %v7464_v3 = vpack.c.bf16 %v4243_v45, %v4242_v2  ;;  %v2707_v46 = vpop.f32.mrf.mxu1  ;;  %v2746_v7 = vpop.f32.mrf.mxu0  ;;  %6805 = vmatmul.mubr.msk.bf16.gmra.mxu0 %vm1719_vm8, %v7600_v20  ;;  %v4258_v41 = vmax.f32 %v2704_v10, 0.0 }
 0x2e7   : > { %6513 = vst [vmem:[%s8663_s26 + $0x990] sm:$0xff] %v7471_v43  ;;  %v4273_v39 = vmax.f32 %v2477_v38, 0.0  ;;  %v2708_v56 = vadd.f32 %v2707_v46, %v9089_v22  ;;  %v2747_v11 = vadd.f32 %v2746_v7, %v8631_v26  ;;  %3260 = vmatprep.mubr.bf16.mxu0 %v7719_v21  ;;  %v4259_v61 = vmax.f32 %v2706_v63, 0.0 }
 0x2e8   : > { %6506 = vst [vmem:[%s8663_s26 + $0x958] sm:$0xff] %v7464_v3  ;;  %v2709_v54 = vpop.f32.mrf.mxu1  ;;  %v2748_v55 = vpop.f32.mrf.mxu0 }
 0x2e9   : > { %v7479_v19 = vpack.c.bf16 %v4273_v39, %v4272_v30  ;;  %v2710_v15 = vadd.f32 %v2709_v54, %v9089_v22  ;;  %v7472_v2 = vpack.c.bf16 %v4259_v61, %v4258_v41  ;;  %v3652_v45 = vmax.f32 %v2747_v11, 0.0  ;;  %v7601_v61 = vld [vmem:[%s10213_s1 + $0x28] sm:$0xff]  }
 0x2ea   : > { %v2749_v16 = vadd.f32 %v2748_v55, %v8631_v26  ;;  %v2750_v9 = vpop.f32.mrf.mxu0  ;;  %v2979_v6 = vpop.f32.mrf.mxu1  ;;  %6825 = vmatmul.mubr.msk.bf16.gmra.mxu1 %vm1719_vm8, %v7600_v20  ;;  %v4274_v43 = vmax.f32 %v2708_v56, 0.0 }
 0x2eb   : > { %6521 = vst [vmem:[%s8663_s26 + $0x9d0] sm:$0xff] %v7479_v19  ;;  %v4275_v38 = vmax.f32 %v2710_v15, 0.0  ;;  %v2751_v10 = vadd.f32 %v2750_v9, %v8636_v14  ;;  %3493 = vmatprep.mubr.bf16.mxu1 %v7719_v21  ;;  %6514 = vst [vmem:[%s8663_s26 + $0x998] sm:$0xff] %v7472_v2  ;;  %v2980_v63 = vadd.f32 %v2979_v6, %v8631_v26 }
 0x2ec   : > { %v3653_v3 = vmax.f32 %v2749_v16, 0.0  ;;  %v2752_v46 = vpop.f32.mrf.mxu0  ;;  %v2981_v7 = vpop.f32.mrf.mxu1 }
 0x2ed   : > { %v7480_v30 = vpack.c.bf16 %v4275_v38, %v4274_v43  ;;  %v2753_v39 = vadd.f32 %v2752_v46, %v8636_v14  ;;  %v2982_v20 = vadd.f32 %v2981_v7, %v8631_v26  ;;  %v3668_v54 = vmax.f32 %v2751_v10, 0.0 }
 0x2ee   : > { %v7169_v11 = vpack.c.bf16 %v3653_v3, %v3652_v45  ;;  %v2756_v56 = vpop.f32.mrf.mxu0  ;;  %v2983_v41 = vpop.f32.mrf.mxu1  ;;  %6806 = vmatmul.mubr.msk.bf16.gmra.mxu0 %vm1719_vm8, %v7601_v61  ;;  %v3654_v15 = vmax.f32 %v2980_v63, 0.0 }
 0x2ef   : > { %6522 = vst [vmem:[%s8663_s26 + $0x9d8] sm:$0xff] %v7480_v30  ;;  %v3669_v55 = vmax.f32 %v2753_v39, 0.0  ;;  %v2757_v19 = vadd.f32 %v2756_v56, %v8646_v50  ;;  %3270 = vmatprep.mubr.bf16.mxu0 %v7719_v21  ;;  %v3655_v2 = vmax.f32 %v2982_v20, 0.0  ;;  %v2984_v45 = vadd.f32 %v2983_v41, %v8636_v14 }
 0x2f0   : > { %6208 = vst [vmem:[%s8663_s26 + $0x20] sm:$0xff] %v7169_v11  ;;  %v2758_v16 = vpop.f32.mrf.mxu0  ;;  %v2985_v9 = vpop.f32.mrf.mxu1 }
 0x2f1   : > { %v7177_v6 = vpack.c.bf16 %v3669_v55, %v3668_v54  ;;  %v3684_v43 = vmax.f32 %v2757_v19, 0.0  ;;  %v2759_v38 = vadd.f32 %v2758_v16, %v8646_v50  ;;  %v7170_v3 = vpack.c.bf16 %v3655_v2, %v3654_v15  ;;  %v7602_v16 = vld [vmem:[%s10213_s1 + $0x30] sm:$0xff]  }
 0x2f2   : > { %v2986_v10 = vadd.f32 %v2985_v9, %v8636_v14  ;;  %v2760_v46 = vpop.f32.mrf.mxu0  ;;  %v2989_v7 = vpop.f32.mrf.mxu1  ;;  %6826 = vmatmul.mubr.msk.bf16.gmra.mxu1 %vm1719_vm8, %v7601_v61  ;;  %v3670_v39 = vmax.f32 %v2984_v45, 0.0 }
 0x2f3   : > { %6219 = vst [vmem:[%s8663_s26 + $0x60] sm:$0xff] %v7177_v6  ;;  %v3685_v30 = vmax.f32 %v2759_v38, 0.0  ;;  %v2761_v63 = vadd.f32 %v2760_v46, %v8659_v12  ;;  %3503 = vmatprep.mubr.bf16.mxu1 %v7719_v21  ;;  %6209 = vst [vmem:[%s8663_s26 + $0x28] sm:$0xff] %v7170_v3  ;;  %v2990_v20 = vadd.f32 %v2989_v7, %v8646_v50 }
 0x2f4   : > { %v3671_v11 = vmax.f32 %v2986_v10, 0.0  ;;  %v2762_v56 = vpop.f32.mrf.mxu0  ;;  %v2991_v41 = vpop.f32.mrf.mxu1 }
 0x2f5   : > { %v7185_v54 = vpack.c.bf16 %v3685_v30, %v3684_v43  ;;  %v2763_v55 = vadd.f32 %v2762_v56, %v8659_v12  ;;  %v2992_v61 = vadd.f32 %v2991_v41, %v8646_v50  ;;  %v3700_v45 = vmax.f32 %v2761_v63, 0.0 }
 0x2f6   : > { %v7178_v19 = vpack.c.bf16 %v3671_v11, %v3670_v39  ;;  %v2766_v15 = vpop.f32.mrf.mxu0  ;;  %v2993_v2 = vpop.f32.mrf.mxu1  ;;  %6807 = vmatmul.mubr.msk.bf16.gmra.mxu0 %vm1719_vm8, %v7602_v16  ;;  %v3686_v43 = vmax.f32 %v2990_v20, 0.0 }
 0x2f7   : > { %6227 = vst [vmem:[%s8663_s26 + $0xa0] sm:$0xff] %v7185_v54  ;;  %v3701_v9 = vmax.f32 %v2763_v55, 0.0  ;;  %v2767_v6 = vadd.f32 %v2766_v15, %v8679_v29  ;;  %3280 = vmatprep.mubr.bf16.mxu0 %v7719_v21  ;;  %v3687_v38 = vmax.f32 %v2992_v61, 0.0  ;;  %v2994_v3 = vadd.f32 %v2993_v2, %v8659_v12 }
 0x2f8   : > { %6220 = vst [vmem:[%s8663_s26 + $0x68] sm:$0xff] %v7178_v19  ;;  %v2768_v10 = vpop.f32.mrf.mxu0  ;;  %v2995_v46 = vpop.f32.mrf.mxu1 }
 0x2f9   : > { %v7193_v7 = vpack.c.bf16 %v3701_v9, %v3700_v45  ;;  %v3716_v30 = vmax.f32 %v2767_v6, 0.0  ;;  %v2769_v39 = vadd.f32 %v2768_v10, %v8679_v29  ;;  %v7186_v11 = vpack.c.bf16 %v3687_v38, %v3686_v43  ;;  %v7603_v10 = vld [vmem:[%s10213_s1 + $0x38] sm:$0xff]  }
 0x2fa   : > { %v2996_v63 = vadd.f32 %v2995_v46, %v8659_v12  ;;  %v2770_v56 = vpop.f32.mrf.mxu0  ;;  %v2999_v41 = vpop.f32.mrf.mxu1  ;;  %6827 = vmatmul.mubr.msk.bf16.gmra.mxu1 %vm1719_vm8, %v7602_v16  ;;  %v3702_v55 = vmax.f32 %v2994_v3, 0.0 }
 0x2fb   : > { %6235 = vst [vmem:[%s8663_s26 + $0xe0] sm:$0xff] %v7193_v7  ;;  %v3717_v54 = vmax.f32 %v2769_v39, 0.0  ;;  %v2771_v20 = vadd.f32 %v2770_v56, %v8689_v53  ;;  %3513 = vmatprep.mubr.bf16.mxu1 %v7719_v21  ;;  %6228 = vst [vmem:[%s8663_s26 + $0xa8] sm:$0xff] %v7186_v11  ;;  %v3000_v61 = vadd.f32 %v2999_v41, %v8679_v29 }
 0x2fc   : > { %v3703_v19 = vmax.f32 %v2996_v63, 0.0  ;;  %v2772_v15 = vpop.f32.mrf.mxu0  ;;  %v3001_v2 = vpop.f32.mrf.mxu1 }
 0x2fd   : > { %v7201_v45 = vpack.c.bf16 %v3717_v54, %v3716_v30  ;;  %v2773_v9 = vadd.f32 %v2772_v15, %v8689_v53  ;;  %v3002_v16 = vadd.f32 %v3001_v2, %v8679_v29  ;;  %v3732_v3 = vmax.f32 %v2771_v20, 0.0 }
 0x2fe   : > { %v7194_v6 = vpack.c.bf16 %v3703_v19, %v3702_v55  ;;  %v2776_v43 = vpop.f32.mrf.mxu0  ;;  %v3003_v38 = vpop.f32.mrf.mxu1  ;;  %6808 = vmatmul.mubr.msk.bf16.gmra.mxu0 %vm1719_vm8, %v7603_v10  ;;  %v3718_v30 = vmax.f32 %v3000_v61, 0.0 }
 0x2ff   : > { %6243 = vst [vmem:[%s8663_s26 + $0x120] sm:$0xff] %v7201_v45  ;;  %v3733_v46 = vmax.f32 %v2773_v9, 0.0  ;;  %v2777_v7 = vadd.f32 %v2776_v43, %v8701_v59  ;;  %3290 = vmatprep.mubr.bf16.mxu0 %v7719_v21  ;;  %v3719_v39 = vmax.f32 %v3002_v16, 0.0  ;;  %v3004_v11 = vadd.f32 %v3003_v38, %v8689_v53 }
 0x300   : > { %6236 = vst [vmem:[%s8663_s26 + $0xe8] sm:$0xff] %v7194_v6  ;;  %v2778_v63 = vpop.f32.mrf.mxu0  ;;  %v3005_v56 = vpop.f32.mrf.mxu1 }
 0x301   : > { %v7209_v41 = vpack.c.bf16 %v3733_v46, %v3732_v3  ;;  %v3748_v54 = vmax.f32 %v2777_v7, 0.0  ;;  %v2779_v55 = vadd.f32 %v2778_v63, %v8701_v59  ;;  %v7202_v19 = vpack.c.bf16 %v3719_v39, %v3718_v30  ;;  %v7604_v63 = vld [vmem:[%s10213_s1 + $0x40] sm:$0xff]  }
 0x302   : > { %v3006_v20 = vadd.f32 %v3005_v56, %v8689_v53  ;;  %v2780_v15 = vpop.f32.mrf.mxu0  ;;  %v3009_v2 = vpop.f32.mrf.mxu1  ;;  %6828 = vmatmul.mubr.msk.bf16.gmra.mxu1 %vm1719_vm8, %v7603_v10  ;;  %v3734_v9 = vmax.f32 %v3004_v11, 0.0 }
 0x303   : > { %6251 = vst [vmem:[%s8663_s26 + $0x160] sm:$0xff] %v7209_v41  ;;  %v3749_v45 = vmax.f32 %v2779_v55, 0.0  ;;  %v2781_v61 = vadd.f32 %v2780_v15, %v8711_v42  ;;  %3523 = vmatprep.mubr.bf16.mxu1 %v7719_v21  ;;  %6244 = vst [vmem:[%s8663_s26 + $0x128] sm:$0xff] %v7202_v19  ;;  %v3010_v16 = vadd.f32 %v3009_v2, %v8701_v59 }
 0x304   : > { %v3735_v6 = vmax.f32 %v3006_v20, 0.0  ;;  %v2782_v43 = vpop.f32.mrf.mxu0  ;;  %v3011_v38 = vpop.f32.mrf.mxu1 }
 0x305   : > { %v7217_v3 = vpack.c.bf16 %v3749_v45, %v3748_v54  ;;  %v2783_v46 = vadd.f32 %v2782_v43, %v8711_v42  ;;  %v3012_v10 = vadd.f32 %v3011_v38, %v8701_v59  ;;  %v3764_v11 = vmax.f32 %v2781_v61, 0.0 }
 0x306   : > { %v7210_v7 = vpack.c.bf16 %v3735_v6, %v3734_v9  ;;  %v2786_v30 = vpop.f32.mrf.mxu0  ;;  %v3013_v39 = vpop.f32.mrf.mxu1  ;;  %6809 = vmatmul.mubr.msk.bf16.gmra.mxu0 %vm1719_vm8, %v7604_v63  ;;  %v3750_v54 = vmax.f32 %v3010_v16, 0.0 }
 0x307   : > { %6259 = vst [vmem:[%s8663_s26 + $0x1a0] sm:$0xff] %v7217_v3  ;;  %v3765_v56 = vmax.f32 %v2783_v46, 0.0  ;;  %v2787_v41 = vadd.f32 %v2786_v30, %v8723_v23  ;;  %3300 = vmatprep.mubr.bf16.mxu0 %v7719_v21  ;;  %v3751_v55 = vmax.f32 %v3012_v10, 0.0  ;;  %v3014_v19 = vadd.f32 %v3013_v39, %v8711_v42 }
 0x308   : > { %6252 = vst [vmem:[%s8663_s26 + $0x168] sm:$0xff] %v7210_v7  ;;  %v2788_v20 = vpop.f32.mrf.mxu0  ;;  %v3015_v15 = vpop.f32.mrf.mxu1 }
 0x309   : > { %v7225_v2 = vpack.c.bf16 %v3765_v56, %v3764_v11  ;;  %v3780_v45 = vmax.f32 %v2787_v41, 0.0  ;;  %v2789_v9 = vadd.f32 %v2788_v20, %v8723_v23  ;;  %v7218_v6 = vpack.c.bf16 %v3751_v55, %v3750_v54  ;;  %v7605_v20 = vld [vmem:[%s10213_s1 + $0x48] sm:$0xff]  }
 0x30a   : > { %v3016_v61 = vadd.f32 %v3015_v15, %v8711_v42  ;;  %v2790_v43 = vpop.f32.mrf.mxu0  ;;  %v3019_v38 = vpop.f32.mrf.mxu1  ;;  %6829 = vmatmul.mubr.msk.bf16.gmra.mxu1 %vm1719_vm8, %v7604_v63  ;;  %v3766_v46 = vmax.f32 %v3014_v19, 0.0 }
 0x30b   : > { %6267 = vst [vmem:[%s8663_s26 + $0x1e0] sm:$0xff] %v7225_v2  ;;  %v3781_v3 = vmax.f32 %v2789_v9, 0.0  ;;  %v2791_v16 = vadd.f32 %v2790_v43, %v8733_v31  ;;  %3533 = vmatprep.mubr.bf16.mxu1 %v7719_v21  ;;  %6260 = vst [vmem:[%s8663_s26 + $0x1a8] sm:$0xff] %v7218_v6  ;;  %v3020_v10 = vadd.f32 %v3019_v38, %v8723_v23 }
 0x30c   : > { %v3767_v7 = vmax.f32 %v3016_v61, 0.0  ;;  %v2792_v30 = vpop.f32.mrf.mxu0  ;;  %v3021_v39 = vpop.f32.mrf.mxu1 }
 0x30d   : > { %v7233_v11 = vpack.c.bf16 %v3781_v3, %v3780_v45  ;;  %v2793_v56 = vadd.f32 %v2792_v30, %v8733_v31  ;;  %v3022_v63 = vadd.f32 %v3021_v39, %v8723_v23  ;;  %v3796_v19 = vmax.f32 %v2791_v16, 0.0 }
 0x30e   : > { %v7226_v41 = vpack.c.bf16 %v3767_v7, %v3766_v46  ;;  %v2796_v54 = vpop.f32.mrf.mxu0  ;;  %v3023_v55 = vpop.f32.mrf.mxu1  ;;  %6810 = vmatmul.mubr.msk.bf16.gmra.mxu0 %vm1719_vm8, %v7605_v20  ;;  %v3782_v45 = vmax.f32 %v3020_v10, 0.0 }
 0x30f   : > { %6275 = vst [vmem:[%s8663_s26 + $0x220] sm:$0xff] %v7233_v11  ;;  %v3797_v15 = vmax.f32 %v2793_v56, 0.0  ;;  %v2797_v2 = vadd.f32 %v2796_v54, %v8745_v44  ;;  %3310 = vmatprep.mubr.bf16.mxu0 %v7719_v21  ;;  %v3783_v9 = vmax.f32 %v3022_v63, 0.0  ;;  %v3024_v6 = vadd.f32 %v3023_v55, %v8733_v31 }
 0x310   : > { %6268 = vst [vmem:[%s8663_s26 + $0x1e8] sm:$0xff] %v7226_v41  ;;  %v2798_v61 = vpop.f32.mrf.mxu0  ;;  %v3025_v43 = vpop.f32.mrf.mxu1 }
 0x311   : > { %v7241_v38 = vpack.c.bf16 %v3797_v15, %v3796_v19  ;;  %v3812_v3 = vmax.f32 %v2797_v2, 0.0  ;;  %v2799_v46 = vadd.f32 %v2798_v61, %v8745_v44  ;;  %v7234_v7 = vpack.c.bf16 %v3783_v9, %v3782_v45  ;;  %v7606_v61 = vld [vmem:[%s10213_s1 + $0x50] sm:$0xff]  }
 0x312   : > { %v3026_v16 = vadd.f32 %v3025_v43, %v8733_v31  ;;  %v2800_v30 = vpop.f32.mrf.mxu0  ;;  %v3029_v39 = vpop.f32.mrf.mxu1  ;;  %6830 = vmatmul.mubr.msk.bf16.gmra.mxu1 %vm1719_vm8, %v7605_v20  ;;  %v3798_v56 = vmax.f32 %v3024_v6, 0.0 }
 0x313   : > { %6283 = vst [vmem:[%s8663_s26 + $0x260] sm:$0xff] %v7241_v38  ;;  %v3813_v11 = vmax.f32 %v2799_v46, 0.0  ;;  %v2801_v10 = vadd.f32 %v2800_v30, %v8755_v33  ;;  %3543 = vmatprep.mubr.bf16.mxu1 %v7719_v21  ;;  %6276 = vst [vmem:[%s8663_s26 + $0x228] sm:$0xff] %v7234_v7  ;;  %v3030_v63 = vadd.f32 %v3029_v39, %v8745_v44 }
 0x314   : > { %v3799_v41 = vmax.f32 %v3026_v16, 0.0  ;;  %v2802_v54 = vpop.f32.mrf.mxu0  ;;  %v3031_v55 = vpop.f32.mrf.mxu1 }
 0x315   : > { %v7249_v19 = vpack.c.bf16 %v3813_v11, %v3812_v3  ;;  %v2803_v15 = vadd.f32 %v2802_v54, %v8755_v33  ;;  %v3032_v20 = vadd.f32 %v3031_v55, %v8745_v44  ;;  %v3828_v6 = vmax.f32 %v2801_v10, 0.0 }
 0x316   : > { %v7242_v2 = vpack.c.bf16 %v3799_v41, %v3798_v56  ;;  %v2806_v45 = vpop.f32.mrf.mxu0  ;;  %v3033_v9 = vpop.f32.mrf.mxu1  ;;  %6811 = vmatmul.mubr.msk.bf16.gmra.mxu0 %vm1719_vm8, %v7606_v61  ;;  %v3814_v3 = vmax.f32 %v3030_v63, 0.0 }
 0x317   : > { %6291 = vst [vmem:[%s8663_s26 + $0x2a0] sm:$0xff] %v7249_v19  ;;  %v3829_v43 = vmax.f32 %v2803_v15, 0.0  ;;  %v2807_v38 = vadd.f32 %v2806_v45, %v8767_v49  ;;  %3320 = vmatprep.mubr.bf16.mxu0 %v7719_v21  ;;  %v3815_v46 = vmax.f32 %v3032_v20, 0.0  ;;  %v3034_v7 = vadd.f32 %v3033_v9, %v8755_v33 }
 0x318   : > { %6284 = vst [vmem:[%s8663_s26 + $0x268] sm:$0xff] %v7242_v2  ;;  %v2808_v16 = vpop.f32.mrf.mxu0  ;;  %v3035_v30 = vpop.f32.mrf.mxu1 }
 0x319   : > { %v7257_v39 = vpack.c.bf16 %v3829_v43, %v3828_v6  ;;  %v3844_v11 = vmax.f32 %v2807_v38, 0.0  ;;  %v2809_v56 = vadd.f32 %v2808_v16, %v8767_v49  ;;  %v7250_v41 = vpack.c.bf16 %v3815_v46, %v3814_v3  ;;  %v7607_v16 = vld [vmem:[%s10213_s1 + $0x58] sm:$0xff]  }
 0x31a   : > { %v3036_v10 = vadd.f32 %v3035_v30, %v8755_v33  ;;  %v2810_v54 = vpop.f32.mrf.mxu0  ;;  %v3039_v55 = vpop.f32.mrf.mxu1  ;;  %6831 = vmatmul.mubr.msk.bf16.gmra.mxu1 %vm1719_vm8, %v7606_v61  ;;  %v3830_v15 = vmax.f32 %v3034_v7, 0.0 }
 0x31b   : > { %6299 = vst [vmem:[%s8663_s26 + $0x2e0] sm:$0xff] %v7257_v39  ;;  %v3845_v19 = vmax.f32 %v2809_v56, 0.0  ;;  %v2811_v63 = vadd.f32 %v2810_v54, %v8777_v4  ;;  %3553 = vmatprep.mubr.bf16.mxu1 %v7719_v21  ;;  %6292 = vst [vmem:[%s8663_s26 + $0x2a8] sm:$0xff] %v7250_v41  ;;  %v3040_v20 = vadd.f32 %v3039_v55, %v8767_v49 }
 0x31c   : > { %v3831_v2 = vmax.f32 %v3036_v10, 0.0  ;;  %v2812_v45 = vpop.f32.mrf.mxu0  ;;  %v3041_v9 = vpop.f32.mrf.mxu1 }
 0x31d   : > { %v7265_v6 = vpack.c.bf16 %v3845_v19, %v3844_v11  ;;  %v2813_v43 = vadd.f32 %v2812_v45, %v8777_v4  ;;  %v3042_v61 = vadd.f32 %v3041_v9, %v8767_v49  ;;  %v3860_v7 = vmax.f32 %v2811_v63, 0.0 }
 0x31e   : > { %v7258_v38 = vpack.c.bf16 %v3831_v2, %v3830_v15  ;;  %v2816_v3 = vpop.f32.mrf.mxu0  ;;  %v3043_v46 = vpop.f32.mrf.mxu1  ;;  %6812 = vmatmul.mubr.msk.bf16.gmra.mxu0 %vm1719_vm8, %v7607_v16  ;;  %v3846_v11 = vmax.f32 %v3040_v20, 0.0 }
 0x31f   : > { %6307 = vst [vmem:[%s8663_s26 + $0x320] sm:$0xff] %v7265_v6  ;;  %v3861_v30 = vmax.f32 %v2813_v43, 0.0  ;;  %v2817_v39 = vadd.f32 %v2816_v3, %v8789_v13  ;;  %3330 = vmatprep.mubr.bf16.mxu0 %v7719_v21  ;;  %v3847_v56 = vmax.f32 %v3042_v61, 0.0  ;;  %v3044_v41 = vadd.f32 %v3043_v46, %v8777_v4 }
 0x320   : > { %6300 = vst [vmem:[%s8663_s26 + $0x2e8] sm:$0xff] %v7258_v38  ;;  %v2818_v10 = vpop.f32.mrf.mxu0  ;;  %v3045_v54 = vpop.f32.mrf.mxu1 }
 0x321   : > { %v7273_v55 = vpack.c.bf16 %v3861_v30, %v3860_v7  ;;  %v3876_v19 = vmax.f32 %v2817_v39, 0.0  ;;  %v2819_v15 = vadd.f32 %v2818_v10, %v8789_v13  ;;  %v7266_v2 = vpack.c.bf16 %v3847_v56, %v3846_v11  ;;  %v7608_v10 = vld [vmem:[%s10213_s1 + $0x60] sm:$0xff]  }
 0x322   : > { %v3046_v63 = vadd.f32 %v3045_v54, %v8777_v4  ;;  %v2820_v45 = vpop.f32.mrf.mxu0  ;;  %v3049_v9 = vpop.f32.mrf.mxu1  ;;  %6832 = vmatmul.mubr.msk.bf16.gmra.mxu1 %vm1719_vm8, %v7607_v16  ;;  %v3862_v43 = vmax.f32 %v3044_v41, 0.0 }
 0x323   : > { %6315 = vst [vmem:[%s8663_s26 + $0x360] sm:$0xff] %v7273_v55  ;;  %v3877_v6 = vmax.f32 %v2819_v15, 0.0  ;;  %v2821_v20 = vadd.f32 %v2820_v45, %v8799_v24  ;;  %3563 = vmatprep.mubr.bf16.mxu1 %v7719_v21  ;;  %6308 = vst [vmem:[%s8663_s26 + $0x328] sm:$0xff] %v7266_v2  ;;  %v3050_v61 = vadd.f32 %v3049_v9, %v8789_v13 }
 0x324   : > { %v3863_v38 = vmax.f32 %v3046_v63, 0.0  ;;  %v2822_v3 = vpop.f32.mrf.mxu0  ;;  %v3051_v46 = vpop.f32.mrf.mxu1 }
 0x325   : > { %v7281_v7 = vpack.c.bf16 %v3877_v6, %v3876_v19  ;;  %v2823_v30 = vadd.f32 %v2822_v3, %v8799_v24  ;;  %v3052_v16 = vadd.f32 %v3051_v46, %v8789_v13  ;;  %v3892_v41 = vmax.f32 %v2821_v20, 0.0 }
 0x326   : > { %v7274_v39 = vpack.c.bf16 %v3863_v38, %v3862_v43  ;;  %v2826_v11 = vpop.f32.mrf.mxu0  ;;  %v3053_v56 = vpop.f32.mrf.mxu1  ;;  %6813 = vmatmul.mubr.msk.bf16.gmra.mxu0 %vm1719_vm8, %v7608_v10  ;;  %v3878_v19 = vmax.f32 %v3050_v61, 0.0 }
 0x327   : > { %6323 = vst [vmem:[%s8663_s26 + $0x3a0] sm:$0xff] %v7281_v7  ;;  %v3893_v54 = vmax.f32 %v2823_v30, 0.0  ;;  %v2827_v55 = vadd.f32 %v2826_v11, %v8811_v0  ;;  %3340 = vmatprep.mubr.bf16.mxu0 %v7719_v21  ;;  %v3879_v15 = vmax.f32 %v3052_v16, 0.0  ;;  %v3054_v2 = vadd.f32 %v3053_v56, %v8799_v24 }
 0x328   : > { %6316 = vst [vmem:[%s8663_s26 + $0x368] sm:$0xff] %v7274_v39  ;;  %v2828_v63 = vpop.f32.mrf.mxu0  ;;  %v3055_v45 = vpop.f32.mrf.mxu1 }
 0x329   : > { %v7289_v9 = vpack.c.bf16 %v3893_v54, %v3892_v41  ;;  %v3908_v6 = vmax.f32 %v2827_v55, 0.0  ;;  %v2829_v43 = vadd.f32 %v2828_v63, %v8811_v0  ;;  %v7282_v38 = vpack.c.bf16 %v3879_v15, %v3878_v19  ;;  %v7609_v63 = vld [vmem:[%s10213_s1 + $0x68] sm:$0xff]  }
 0x32a   : > { %v3056_v20 = vadd.f32 %v3055_v45, %v8799_v24  ;;  %v2830_v3 = vpop.f32.mrf.mxu0  ;;  %v3059_v46 = vpop.f32.mrf.mxu1  ;;  %6833 = vmatmul.mubr.msk.bf16.gmra.mxu1 %vm1719_vm8, %v7608_v10  ;;  %v3894_v30 = vmax.f32 %v3054_v2, 0.0 }
 0x32b   : > { %6331 = vst [vmem:[%s8663_s26 + $0x3e0] sm:$0xff] %v7289_v9  ;;  %v3909_v7 = vmax.f32 %v2829_v43, 0.0  ;;  %v2831_v61 = vadd.f32 %v2830_v3, %v8821_v28  ;;  %3573 = vmatprep.mubr.bf16.mxu1 %v7719_v21  ;;  %6324 = vst [vmem:[%s8663_s26 + $0x3a8] sm:$0xff] %v7282_v38  ;;  %v3060_v16 = vadd.f32 %v3059_v46, %v8811_v0 }
 0x32c   : > { %v3895_v39 = vmax.f32 %v3056_v20, 0.0  ;;  %v2832_v11 = vpop.f32.mrf.mxu0  ;;  %v3061_v56 = vpop.f32.mrf.mxu1 }
 0x32d   : > { %v7297_v41 = vpack.c.bf16 %v3909_v7, %v3908_v6  ;;  %v2833_v54 = vadd.f32 %v2832_v11, %v8821_v28  ;;  %v3062_v10 = vadd.f32 %v3061_v56, %v8811_v0  ;;  %v3924_v2 = vmax.f32 %v2831_v61, 0.0 }
 0x32e   : > { %v7290_v55 = vpack.c.bf16 %v3895_v39, %v3894_v30  ;;  %v2836_v19 = vpop.f32.mrf.mxu0  ;;  %v3063_v15 = vpop.f32.mrf.mxu1  ;;  %6814 = vmatmul.mubr.msk.bf16.gmra.mxu0 %vm1719_vm8, %v7609_v63  ;;  %v3910_v6 = vmax.f32 %v3060_v16, 0.0 }
 0x32f   : > { %6339 = vst [vmem:[%s8663_s26 + $0x420] sm:$0xff] %v7297_v41  ;;  %v3925_v45 = vmax.f32 %v2833_v54, 0.0  ;;  %v2837_v9 = vadd.f32 %v2836_v19, %v8833_v51  ;;  %3350 = vmatprep.mubr.bf16.mxu0 %v7719_v21  ;;  %v3911_v43 = vmax.f32 %v3062_v10, 0.0  ;;  %v3064_v38 = vadd.f32 %v3063_v15, %v8821_v28 }
 0x330   : > { %6332 = vst [vmem:[%s8663_s26 + $0x3e8] sm:$0xff] %v7290_v55  ;;  %v2838_v20 = vpop.f32.mrf.mxu0  ;;  %v3065_v3 = vpop.f32.mrf.mxu1 }
 0x331   : > { %v7305_v46 = vpack.c.bf16 %v3925_v45, %v3924_v2  ;;  %v3940_v7 = vmax.f32 %v2837_v9, 0.0  ;;  %v2839_v30 = vadd.f32 %v2838_v20, %v8833_v51  ;;  %v7298_v39 = vpack.c.bf16 %v3911_v43, %v3910_v6  ;;  %v7610_v20 = vld [vmem:[%s10213_s1 + $0x70] sm:$0xff]  }
 0x332   : > { %v3066_v61 = vadd.f32 %v3065_v3, %v8821_v28  ;;  %v2840_v11 = vpop.f32.mrf.mxu0  ;;  %v3069_v56 = vpop.f32.mrf.mxu1  ;;  %6834 = vmatmul.mubr.msk.bf16.gmra.mxu1 %vm1719_vm8, %v7609_v63  ;;  %v3926_v54 = vmax.f32 %v3064_v38, 0.0 }
 0x333   : > { %6347 = vst [vmem:[%s8663_s26 + $0x460] sm:$0xff] %v7305_v46  ;;  %v3941_v41 = vmax.f32 %v2839_v30, 0.0  ;;  %v2841_v16 = vadd.f32 %v2840_v11, %v8843_v36  ;;  %3583 = vmatprep.mubr.bf16.mxu1 %v7719_v21  ;;  %6340 = vst [vmem:[%s8663_s26 + $0x428] sm:$0xff] %v7298_v39  ;;  %v3070_v10 = vadd.f32 %v3069_v56, %v8833_v51 }
 0x334   : > { %v3927_v55 = vmax.f32 %v3066_v61, 0.0  ;;  %v2842_v19 = vpop.f32.mrf.mxu0  ;;  %v3071_v15 = vpop.f32.mrf.mxu1 }
 0x335   : > { %v7313_v2 = vpack.c.bf16 %v3941_v41, %v3940_v7  ;;  %v2843_v45 = vadd.f32 %v2842_v19, %v8843_v36  ;;  %v3072_v63 = vadd.f32 %v3071_v15, %v8833_v51  ;;  %v3956_v38 = vmax.f32 %v2841_v16, 0.0 }
 0x336   : > { %v7306_v9 = vpack.c.bf16 %v3927_v55, %v3926_v54  ;;  %v2846_v6 = vpop.f32.mrf.mxu0  ;;  %v3073_v43 = vpop.f32.mrf.mxu1  ;;  %6815 = vmatmul.mubr.msk.bf16.gmra.mxu0 %vm1719_vm8, %v7610_v20  ;;  %v3942_v7 = vmax.f32 %v3070_v10, 0.0 }
 0x337   : > { %6355 = vst [vmem:[%s8663_s26 + $0x4a0] sm:$0xff] %v7313_v2  ;;  %v3957_v3 = vmax.f32 %v2843_v45, 0.0  ;;  %v2847_v46 = vadd.f32 %v2846_v6, %v8855_v40  ;;  %3360 = vmatprep.mubr.bf16.mxu0 %v7719_v21  ;;  %v3943_v30 = vmax.f32 %v3072_v63, 0.0  ;;  %v3074_v39 = vadd.f32 %v3073_v43, %v8843_v36 }
 0x338   : > { %6348 = vst [vmem:[%s8663_s26 + $0x468] sm:$0xff] %v7306_v9  ;;  %v2848_v61 = vpop.f32.mrf.mxu0  ;;  %v3075_v11 = vpop.f32.mrf.mxu1 }
 0x339   : > { %v7321_v56 = vpack.c.bf16 %v3957_v3, %v3956_v38  ;;  %v3972_v41 = vmax.f32 %v2847_v46, 0.0  ;;  %v2849_v54 = vadd.f32 %v2848_v61, %v8855_v40  ;;  %v7314_v55 = vpack.c.bf16 %v3943_v30, %v3942_v7  ;;  %v7611_v61 = vld [vmem:[%s10213_s1 + $0x78] sm:$0xff]  }
 0x33a   : > { %v3076_v16 = vadd.f32 %v3075_v11, %v8843_v36  ;;  %v2850_v19 = vpop.f32.mrf.mxu0  ;;  %v3079_v15 = vpop.f32.mrf.mxu1  ;;  %6835 = vmatmul.mubr.msk.bf16.gmra.mxu1 %vm1719_vm8, %v7610_v20  ;;  %v3958_v45 = vmax.f32 %v3074_v39, 0.0 }
 0x33b   : > { %6363 = vst [vmem:[%s8663_s26 + $0x4e0] sm:$0xff] %v7321_v56  ;;  %v3973_v2 = vmax.f32 %v2849_v54, 0.0  ;;  %v2851_v10 = vadd.f32 %v2850_v19, %v8865_v47  ;;  %3593 = vmatprep.mubr.bf16.mxu1 %v7719_v21  ;;  %6356 = vst [vmem:[%s8663_s26 + $0x4a8] sm:$0xff] %v7314_v55  ;;  %v3080_v63 = vadd.f32 %v3079_v15, %v8855_v40 }
 0x33c   : > { %v3959_v9 = vmax.f32 %v3076_v16, 0.0  ;;  %v2852_v6 = vpop.f32.mrf.mxu0  ;;  %v3081_v43 = vpop.f32.mrf.mxu1 }
 0x33d   : > { %v7329_v38 = vpack.c.bf16 %v3973_v2, %v3972_v41  ;;  %v2853_v3 = vadd.f32 %v2852_v6, %v8865_v47  ;;  %v3082_v20 = vadd.f32 %v3081_v43, %v8855_v40  ;;  %v3988_v39 = vmax.f32 %v2851_v10, 0.0 }
 0x33e   : > { %v7322_v46 = vpack.c.bf16 %v3959_v9, %v3958_v45  ;;  %v2856_v7 = vpop.f32.mrf.mxu0  ;;  %v3083_v30 = vpop.f32.mrf.mxu1  ;;  %6816 = vmatmul.mubr.msk.bf16.gmra.mxu0 %vm1719_vm8, %v7611_v61  ;;  %v3974_v41 = vmax.f32 %v3080_v63, 0.0 }
 0x33f   : > { %6371 = vst [vmem:[%s8663_s26 + $0x520] sm:$0xff] %v7329_v38  ;;  %v3989_v11 = vmax.f32 %v2853_v3, 0.0  ;;  %v2857_v56 = vadd.f32 %v2856_v7, %v8877_v34  ;;  %3370 = vmatprep.mubr.bf16.mxu0 %v7719_v21  ;;  %v3975_v54 = vmax.f32 %v3082_v20, 0.0  ;;  %v3084_v55 = vadd.f32 %v3083_v30, %v8865_v47 }
 0x340   : > { %6364 = vst [vmem:[%s8663_s26 + $0x4e8] sm:$0xff] %v7322_v46  ;;  %v2858_v16 = vpop.f32.mrf.mxu0  ;;  %v3085_v19 = vpop.f32.mrf.mxu1 }
 0x341   : > { %v7337_v15 = vpack.c.bf16 %v3989_v11, %v3988_v39  ;;  %v4004_v2 = vmax.f32 %v2857_v56, 0.0  ;;  %v2859_v45 = vadd.f32 %v2858_v16, %v8877_v34  ;;  %v7330_v9 = vpack.c.bf16 %v3975_v54, %v3974_v41  ;;  %v7612_v16 = vld [vmem:[%s10213_s1 + $0x80] sm:$0xff]  }
 0x342   : > { %v3086_v10 = vadd.f32 %v3085_v19, %v8865_v47  ;;  %v2860_v6 = vpop.f32.mrf.mxu0  ;;  %v3089_v43 = vpop.f32.mrf.mxu1  ;;  %6836 = vmatmul.mubr.msk.bf16.gmra.mxu1 %vm1719_vm8, %v7611_v61  ;;  %v3990_v3 = vmax.f32 %v3084_v55, 0.0 }
 0x343   : > { %6379 = vst [vmem:[%s8663_s26 + $0x560] sm:$0xff] %v7337_v15  ;;  %v4005_v38 = vmax.f32 %v2859_v45, 0.0  ;;  %v2861_v63 = vadd.f32 %v2860_v6, %v8887_v1  ;;  %3603 = vmatprep.mubr.bf16.mxu1 %v7719_v21  ;;  %6372 = vst [vmem:[%s8663_s26 + $0x528] sm:$0xff] %v7330_v9  ;;  %v3090_v20 = vadd.f32 %v3089_v43, %v8877_v34 }
 0x344   : > { %v3991_v46 = vmax.f32 %v3086_v10, 0.0  ;;  %v2862_v7 = vpop.f32.mrf.mxu0  ;;  %v3091_v30 = vpop.f32.mrf.mxu1 }
 0x345   : > { %v7345_v39 = vpack.c.bf16 %v4005_v38, %v4004_v2  ;;  %v2863_v11 = vadd.f32 %v2862_v7, %v8887_v1  ;;  %v3092_v61 = vadd.f32 %v3091_v30, %v8877_v34  ;;  %v4020_v55 = vmax.f32 %v2861_v63, 0.0 }
 0x346   : > { %v7338_v56 = vpack.c.bf16 %v3991_v46, %v3990_v3  ;;  %v2866_v41 = vpop.f32.mrf.mxu0  ;;  %v3093_v54 = vpop.f32.mrf.mxu1  ;;  %6817 = vmatmul.mubr.msk.bf16.gmra.mxu0 %vm1719_vm8, %v7612_v16  ;;  %v4006_v2 = vmax.f32 %v3090_v20, 0.0 }
 0x347   : > { %6387 = vst [vmem:[%s8663_s26 + $0x5a0] sm:$0xff] %v7345_v39  ;;  %v4021_v19 = vmax.f32 %v2863_v11, 0.0  ;;  %v2867_v15 = vadd.f32 %v2866_v41, %v8899_v17  ;;  %3380 = vmatprep.mubr.bf16.mxu0 %v7719_v21  ;;  %v4007_v45 = vmax.f32 %v3092_v61, 0.0  ;;  %v3094_v9 = vadd.f32 %v3093_v54, %v8887_v1 }
 0x348   : > { %6380 = vst [vmem:[%s8663_s26 + $0x568] sm:$0xff] %v7338_v56  ;;  %v2868_v10 = vpop.f32.mrf.mxu0  ;;  %v3095_v6 = vpop.f32.mrf.mxu1 }
 0x349   : > { %v7353_v43 = vpack.c.bf16 %v4021_v19, %v4020_v55  ;;  %v4036_v38 = vmax.f32 %v2867_v15, 0.0  ;;  %v2869_v3 = vadd.f32 %v2868_v10, %v8899_v17  ;;  %v7346_v46 = vpack.c.bf16 %v4007_v45, %v4006_v2  ;;  %v7613_v10 = vld [vmem:[%s10213_s1 + $0x88] sm:$0xff]  }
 0x34a   : > { %v3096_v63 = vadd.f32 %v3095_v6, %v8887_v1  ;;  %v2870_v7 = vpop.f32.mrf.mxu0  ;;  %v3099_v30 = vpop.f32.mrf.mxu1  ;;  %6837 = vmatmul.mubr.msk.bf16.gmra.mxu1 %vm1719_vm8, %v7612_v16  ;;  %v4022_v11 = vmax.f32 %v3094_v9, 0.0 }
 0x34b   : > { %6395 = vst [vmem:[%s8663_s26 + $0x5e0] sm:$0xff] %v7353_v43  ;;  %v4037_v39 = vmax.f32 %v2869_v3, 0.0  ;;  %v2871_v20 = vadd.f32 %v2870_v7, %v8909_v8  ;;  %3613 = vmatprep.mubr.bf16.mxu1 %v7719_v21  ;;  %6388 = vst [vmem:[%s8663_s26 + $0x5a8] sm:$0xff] %v7346_v46  ;;  %v3100_v61 = vadd.f32 %v3099_v30, %v8899_v17 }
 0x34c   : > { %v4023_v56 = vmax.f32 %v3096_v63, 0.0  ;;  %v2872_v41 = vpop.f32.mrf.mxu0  ;;  %v3101_v54 = vpop.f32.mrf.mxu1 }
 0x34d   : > { %v7361_v55 = vpack.c.bf16 %v4037_v39, %v4036_v38  ;;  %v2873_v19 = vadd.f32 %v2872_v41, %v8909_v8  ;;  %v3102_v16 = vadd.f32 %v3101_v54, %v8899_v17  ;;  %v4052_v9 = vmax.f32 %v2871_v20, 0.0 }
 0x34e   : > { %v7354_v15 = vpack.c.bf16 %v4023_v56, %v4022_v11  ;;  %v2876_v2 = vpop.f32.mrf.mxu0  ;;  %v3103_v45 = vpop.f32.mrf.mxu1  ;;  %6818 = vmatmul.mubr.msk.bf16.gmra.mxu0 %vm1719_vm8, %v7613_v10  ;;  %v4038_v38 = vmax.f32 %v3100_v61, 0.0 }
 0x34f   : > { %6403 = vst [vmem:[%s8663_s26 + $0x620] sm:$0xff] %v7361_v55  ;;  %v4053_v6 = vmax.f32 %v2873_v19, 0.0  ;;  %v2877_v43 = vadd.f32 %v2876_v2, %v8923_v25  ;;  %3390 = vmatprep.mubr.bf16.mxu0 %v7719_v21  ;;  %v4039_v3 = vmax.f32 %v3102_v16, 0.0  ;;  %v3104_v46 = vadd.f32 %v3103_v45, %v8909_v8 }
 0x350   : > { %6396 = vst [vmem:[%s8663_s26 + $0x5e8] sm:$0xff] %v7354_v15  ;;  %v2878_v63 = vpop.f32.mrf.mxu0  ;;  %v3105_v7 = vpop.f32.mrf.mxu1 }
 0x351   : > { %v7369_v30 = vpack.c.bf16 %v4053_v6, %v4052_v9  ;;  %v4068_v39 = vmax.f32 %v2877_v43, 0.0  ;;  %v2879_v11 = vadd.f32 %v2878_v63, %v8923_v25  ;;  %v7362_v56 = vpack.c.bf16 %v4039_v3, %v4038_v38  ;;  %v7614_v63 = vld [vmem:[%s10213_s1 + $0x90] sm:$0xff]  }
 0x352   : > { %v3106_v20 = vadd.f32 %v3105_v7, %v8909_v8  ;;  %v2880_v41 = vpop.f32.mrf.mxu0  ;;  %v3109_v54 = vpop.f32.mrf.mxu1  ;;  %6838 = vmatmul.mubr.msk.bf16.gmra.mxu1 %vm1719_vm8, %v7613_v10  ;;  %v4054_v19 = vmax.f32 %v3104_v46, 0.0 }
 0x353   : > { %6411 = vst [vmem:[%s8663_s26 + $0x660] sm:$0xff] %v7369_v30  ;;  %v4069_v55 = vmax.f32 %v2879_v11, 0.0  ;;  %v2881_v61 = vadd.f32 %v2880_v41, %v8935_v32  ;;  %3623 = vmatprep.mubr.bf16.mxu1 %v7719_v21  ;;  %6404 = vst [vmem:[%s8663_s26 + $0x628] sm:$0xff] %v7362_v56  ;;  %v3110_v16 = vadd.f32 %v3109_v54, %v8923_v25 }
 0x354   : > { %v4055_v15 = vmax.f32 %v3106_v20, 0.0  ;;  %v2882_v2 = vpop.f32.mrf.mxu0  ;;  %v3111_v45 = vpop.f32.mrf.mxu1 }
 0x355   : > { %v7377_v9 = vpack.c.bf16 %v4069_v55, %v4068_v39  ;;  %v2883_v6 = vadd.f32 %v2882_v2, %v8935_v32  ;;  %v3112_v10 = vadd.f32 %v3111_v45, %v8923_v25  ;;  %v4084_v46 = vmax.f32 %v2881_v61, 0.0 }
 0x356   : > { %v7370_v43 = vpack.c.bf16 %v4055_v15, %v4054_v19  ;;  %v2886_v38 = vpop.f32.mrf.mxu0  ;;  %v3113_v3 = vpop.f32.mrf.mxu1  ;;  %6819 = vmatmul.mubr.msk.bf16.gmra.mxu0 %vm1719_vm8, %v7614_v63  ;;  %v4070_v39 = vmax.f32 %v3110_v16, 0.0 }
 0x357   : > { %6419 = vst [vmem:[%s8663_s26 + $0x6a0] sm:$0xff] %v7377_v9  ;;  %v4085_v7 = vmax.f32 %v2883_v6, 0.0  ;;  %v2887_v30 = vadd.f32 %v2886_v38, %v8946_v57  ;;  %3400 = vmatprep.mubr.bf16.mxu0 %v7719_v21  ;;  %v4071_v11 = vmax.f32 %v3112_v10, 0.0  ;;  %v3114_v56 = vadd.f32 %v3113_v3, %v8935_v32 }
 0x358   : > { %6412 = vst [vmem:[%s8663_s26 + $0x668] sm:$0xff] %v7370_v43  ;;  %v2888_v20 = vpop.f32.mrf.mxu0  ;;  %v3115_v41 = vpop.f32.mrf.mxu1 }
 0x359   : > { %v7385_v54 = vpack.c.bf16 %v4085_v7, %v4084_v46  ;;  %v4100_v55 = vmax.f32 %v2887_v30, 0.0  ;;  %v2889_v19 = vadd.f32 %v2888_v20, %v8946_v57  ;;  %v7378_v15 = vpack.c.bf16 %v4071_v11, %v4070_v39 }
 0x35a   : > { %v3116_v61 = vadd.f32 %v3115_v41, %v8935_v32  ;;  %v2890_v2 = vpop.f32.mrf.mxu0  ;;  %v3119_v45 = vpop.f32.mrf.mxu1  ;;  %6839 = vmatmul.mubr.msk.bf16.gmra.mxu1 %vm1719_vm8, %v7614_v63  ;;  %v4086_v6 = vmax.f32 %v3114_v56, 0.0 }
 0x35b   : > { %6427 = vst [vmem:[%s8663_s26 + $0x6e0] sm:$0xff] %v7385_v54  ;;  %v4101_v9 = vmax.f32 %v2889_v19, 0.0  ;;  %v2891_v16 = vadd.f32 %v2890_v2, %v8958_v18  ;;  %3633 = vmatprep.mubr.bf16.mxu1 %v7719_v21  ;;  %6420 = vst [vmem:[%s8663_s26 + $0x6a8] sm:$0xff] %v7378_v15  ;;  %v3120_v10 = vadd.f32 %v3119_v45, %v8946_v57  ;;  %v7615_v21 = vld [vmem:[%s10213_s1 + $0x98] sm:$0xff]  }
 0x35c   : > { %v4087_v43 = vmax.f32 %v3116_v61, 0.0  ;;  %v2892_v38 = vpop.f32.mrf.mxu0  ;;  %v3121_v3 = vpop.f32.mrf.mxu1 }
 0x35d   : > { %v7393_v46 = vpack.c.bf16 %v4101_v9, %v4100_v55  ;;  %v2893_v7 = vadd.f32 %v2892_v38, %v8958_v18  ;;  %v3122_v63 = vadd.f32 %v3121_v3, %v8946_v57  ;;  %v4116_v56 = vmax.f32 %v2891_v16, 0.0 }
 0x35e   : > { %v7386_v30 = vpack.c.bf16 %v4087_v43, %v4086_v6  ;;  %v2896_v39 = vpop.f32.mrf.mxu0  ;;  %v3123_v11 = vpop.f32.mrf.mxu1  ;;  %6820 = vmatmul.mubr.msk.bf16.gmra.mxu0 %vm1719_vm8, %v7615_v21  ;;  %v4102_v54 = vmax.f32 %v3120_v10, 0.0 }
 0x35f   : > { %6435 = vst [vmem:[%s8663_s26 + $0x720] sm:$0xff] %v7393_v46  ;;  %v4117_v20 = vmax.f32 %v2893_v7, 0.0  ;;  %v2897_v41 = vadd.f32 %v2896_v39, %v8969_v52  ;;  %v4103_v55 = vmax.f32 %v3122_v63, 0.0  ;;  %v3124_v19 = vadd.f32 %v3123_v11, %v8958_v18 }
 0x360   : > { %6428 = vst [vmem:[%s8663_s26 + $0x6e8] sm:$0xff] %v7386_v30  ;;  %v2898_v15 = vpop.f32.mrf.mxu0  ;;  %v3125_v61 = vpop.f32.mrf.mxu1 }
 0x361   : > { %v7401_v2 = vpack.c.bf16 %v4117_v20, %v4116_v56  ;;  %v4132_v45 = vmax.f32 %v2897_v41, 0.0  ;;  %v2899_v9 = vadd.f32 %v2898_v15, %v8969_v52  ;;  %v7394_v6 = vpack.c.bf16 %v4103_v55, %v4102_v54 }
 0x362   : > { %v3126_v43 = vadd.f32 %v3125_v61, %v8958_v18  ;;  %v2900_v16 = vpop.f32.mrf.mxu0  ;;  %v3129_v38 = vpop.f32.mrf.mxu1  ;;  %6840 = vmatmul.mubr.msk.bf16.gmra.mxu1 %vm1719_vm8, %v7615_v21  ;;  %v4118_v46 = vmax.f32 %v3124_v19, 0.0 }
 0x363   : > { %6443 = vst [vmem:[%s8663_s26 + $0x760] sm:$0xff] %v7401_v2  ;;  %v4133_v10 = vmax.f32 %v2899_v9, 0.0  ;;  %v2901_v3 = vadd.f32 %v2900_v16, %v8981_v48  ;;  %6436 = vst [vmem:[%s8663_s26 + $0x728] sm:$0xff] %v7394_v6  ;;  %v3130_v30 = vadd.f32 %v3129_v38, %v8969_v52 }
 0x364   : > { %v4119_v7 = vmax.f32 %v3126_v43, 0.0  ;;  %v2902_v63 = vpop.f32.mrf.mxu0  ;;  %v3131_v39 = vpop.f32.mrf.mxu1 }
 0x365   : > { %v7409_v11 = vpack.c.bf16 %v4133_v10, %v4132_v45  ;;  %v2903_v56 = vadd.f32 %v2902_v63, %v8981_v48  ;;  %v3132_v41 = vadd.f32 %v3131_v39, %v8969_v52  ;;  %v4148_v55 = vmax.f32 %v2901_v3, 0.0 }
 0x366   : > { %v7402_v20 = vpack.c.bf16 %v4119_v7, %v4118_v46  ;;  %v2906_v21 = vpop.f32.mrf.mxu0  ;;  %v3133_v54 = vpop.f32.mrf.mxu1  ;;  %v4134_v19 = vmax.f32 %v3130_v30, 0.0 }
 0x367   : > { %6451 = vst [vmem:[%s8663_s26 + $0x7a0] sm:$0xff] %v7409_v11  ;;  %v4149_v15 = vmax.f32 %v2903_v56, 0.0  ;;  %v2907_v61 = vadd.f32 %v2906_v21, %v8992_v60  ;;  %v4135_v2 = vmax.f32 %v3132_v41, 0.0  ;;  %v3134_v9 = vadd.f32 %v3133_v54, %v8981_v48 }
 0x368   : > { %6444 = vst [vmem:[%s8663_s26 + $0x768] sm:$0xff] %v7402_v20  ;;  %v2908_v45 = vpop.f32.mrf.mxu0  ;;  %v3135_v6 = vpop.f32.mrf.mxu1 }
 0x369   : > { %v7417_v43 = vpack.c.bf16 %v4149_v15, %v4148_v55  ;;  %v4164_v16 = vmax.f32 %v2907_v61, 0.0  ;;  %v2909_v38 = vadd.f32 %v2908_v45, %v8992_v60  ;;  %v7410_v10 = vpack.c.bf16 %v4135_v2, %v4134_v19 }
 0x36a   : > { %v3136_v46 = vadd.f32 %v3135_v6, %v8981_v48  ;;  %v2910_v3 = vpop.f32.mrf.mxu0  ;;  %v3139_v7 = vpop.f32.mrf.mxu1  ;;  %v4150_v30 = vmax.f32 %v3134_v9, 0.0 }
 0x36b   : > { %6459 = vst [vmem:[%s8663_s26 + $0x7e0] sm:$0xff] %v7417_v43  ;;  %v4165_v63 = vmax.f32 %v2909_v38, 0.0  ;;  %v2911_v39 = vadd.f32 %v2910_v3, %v9011_v35  ;;  %6452 = vst [vmem:[%s8663_s26 + $0x7a8] sm:$0xff] %v7410_v10  ;;  %v3140_v56 = vadd.f32 %v3139_v7, %v8992_v60 }
 0x36c   : > { %v4151_v11 = vmax.f32 %v3136_v46, 0.0  ;;  %v2912_v20 = vpop.f32.mrf.mxu0  ;;  %v3141_v41 = vpop.f32.mrf.mxu1 }
 0x36d   : > { %v7425_v21 = vpack.c.bf16 %v4165_v63, %v4164_v16  ;;  %v2913_v54 = vadd.f32 %v2912_v20, %v9011_v35  ;;  %v3142_v15 = vadd.f32 %v3141_v41, %v8992_v60  ;;  %v4180_v2 = vmax.f32 %v2911_v39, 0.0 }
 0x36e   : > { %v7418_v55 = vpack.c.bf16 %v4151_v11, %v4150_v30  ;;  %v2916_v61 = vpop.f32.mrf.mxu0  ;;  %v3143_v19 = vpop.f32.mrf.mxu1  ;;  %v4166_v9 = vmax.f32 %v3140_v56, 0.0 }
 0x36f   : > { %6467 = vst [vmem:[%s8663_s26 + $0x820] sm:$0xff] %v7425_v21  ;;  %v4181_v45 = vmax.f32 %v2913_v54, 0.0  ;;  %v2917_v6 = vadd.f32 %v2916_v61, %v9028_v5  ;;  %v4167_v43 = vmax.f32 %v3142_v15, 0.0  ;;  %v3144_v38 = vadd.f32 %v3143_v19, %v9011_v35 }
 0x370   : > { %6460 = vst [vmem:[%s8663_s26 + $0x7e8] sm:$0xff] %v7418_v55  ;;  %v2918_v16 = vpop.f32.mrf.mxu0  ;;  %v3145_v10 = vpop.f32.mrf.mxu1 }
 0x371   : > { %v7433_v46 = vpack.c.bf16 %v4181_v45, %v4180_v2  ;;  %v4196_v3 = vmax.f32 %v2917_v6, 0.0  ;;  %v2919_v7 = vadd.f32 %v2918_v16, %v9028_v5  ;;  %v7426_v63 = vpack.c.bf16 %v4167_v43, %v4166_v9 }
 0x372   : > { %v3146_v30 = vadd.f32 %v3145_v10, %v9011_v35  ;;  %v2920_v39 = vpop.f32.mrf.mxu0  ;;  %v3149_v11 = vpop.f32.mrf.mxu1  ;;  %v4182_v56 = vmax.f32 %v3144_v38, 0.0 }
 0x373   : > { %6475 = vst [vmem:[%s8663_s26 + $0x860] sm:$0xff] %v7433_v46  ;;  %v4197_v20 = vmax.f32 %v2919_v7, 0.0  ;;  %v2921_v41 = vadd.f32 %v2920_v39, %v9041_v62  ;;  %6468 = vst [vmem:[%s8663_s26 + $0x828] sm:$0xff] %v7426_v63  ;;  %v3150_v54 = vadd.f32 %v3149_v11, %v9028_v5 }
 0x374   : > { %v4183_v21 = vmax.f32 %v3146_v30, 0.0  ;;  %v2922_v55 = vpop.f32.mrf.mxu0  ;;  %v3151_v15 = vpop.f32.mrf.mxu1 }
 0x375   : > { %v7441_v61 = vpack.c.bf16 %v4197_v20, %v4196_v3  ;;  %v2923_v19 = vadd.f32 %v2922_v55, %v9041_v62  ;;  %v3152_v45 = vadd.f32 %v3151_v15, %v9028_v5  ;;  %v4212_v43 = vmax.f32 %v2921_v41, 0.0 }
 0x376   : > { %v7434_v2 = vpack.c.bf16 %v4183_v21, %v4182_v56  ;;  %v2926_v6 = vpop.f32.mrf.mxu0  ;;  %v3153_v9 = vpop.f32.mrf.mxu1  ;;  %v4198_v38 = vmax.f32 %v3150_v54, 0.0 }
 0x377   : > { %6483 = vst [vmem:[%s8663_s26 + $0x8a0] sm:$0xff] %v7441_v61  ;;  %v4213_v16 = vmax.f32 %v2923_v19, 0.0  ;;  %v2927_v10 = vadd.f32 %v2926_v6, %v9052_v37  ;;  %v4199_v46 = vmax.f32 %v3152_v45, 0.0  ;;  %v3154_v7 = vadd.f32 %v3153_v9, %v9041_v62 }
 0x378   : > { %6476 = vst [vmem:[%s8663_s26 + $0x868] sm:$0xff] %v7434_v2  ;;  %v2928_v3 = vpop.f32.mrf.mxu0  ;;  %v3155_v63 = vpop.f32.mrf.mxu1 }
 0x379   : > { %v7449_v30 = vpack.c.bf16 %v4213_v16, %v4212_v43  ;;  %v4228_v39 = vmax.f32 %v2927_v10, 0.0  ;;  %v2929_v11 = vadd.f32 %v2928_v3, %v9052_v37  ;;  %v7442_v20 = vpack.c.bf16 %v4199_v46, %v4198_v38 }
 0x37a   : > { %v3156_v56 = vadd.f32 %v3155_v63, %v9041_v62  ;;  %v2930_v41 = vpop.f32.mrf.mxu0  ;;  %v3159_v21 = vpop.f32.mrf.mxu1  ;;  %v4214_v54 = vmax.f32 %v3154_v7, 0.0 }
 0x37b   : > { %6491 = vst [vmem:[%s8663_s26 + $0x8e0] sm:$0xff] %v7449_v30  ;;  %v4229_v55 = vmax.f32 %v2929_v11, 0.0  ;;  %v2931_v15 = vadd.f32 %v2930_v41, %v9064_v58  ;;  %6484 = vst [vmem:[%s8663_s26 + $0x8a8] sm:$0xff] %v7442_v20  ;;  %v3160_v19 = vadd.f32 %v3159_v21, %v9052_v37 }
 0x37c   : > { %v4215_v61 = vmax.f32 %v3156_v56, 0.0  ;;  %v2932_v2 = vpop.f32.mrf.mxu0  ;;  %v3161_v45 = vpop.f32.mrf.mxu1 }
 0x37d   : > { %v7457_v6 = vpack.c.bf16 %v4229_v55, %v4228_v39  ;;  %v2933_v9 = vadd.f32 %v2932_v2, %v9064_v58  ;;  %v3162_v16 = vadd.f32 %v3161_v45, %v9052_v37  ;;  %v4244_v46 = vmax.f32 %v2931_v15, 0.0 }
 0x37e   : > { %v7450_v43 = vpack.c.bf16 %v4215_v61, %v4214_v54  ;;  %v2936_v10 = vpop.f32.mrf.mxu0  ;;  %v3163_v38 = vpop.f32.mrf.mxu1  ;;  %v4230_v7 = vmax.f32 %v3160_v19, 0.0 }
 0x37f   : > { %6499 = vst [vmem:[%s8663_s26 + $0x920] sm:$0xff] %v7457_v6  ;;  %v4245_v3 = vmax.f32 %v2933_v9, 0.0  ;;  %v2937_v63 = vadd.f32 %v2936_v10, %v9075_v27  ;;  %v4231_v30 = vmax.f32 %v3162_v16, 0.0  ;;  %v3164_v11 = vadd.f32 %v3163_v38, %v9064_v58 }
 0x380   : > { %6492 = vst [vmem:[%s8663_s26 + $0x8e8] sm:$0xff] %v7450_v43  ;;  %v2938_v39 = vpop.f32.mrf.mxu0  ;;  %v3165_v20 = vpop.f32.mrf.mxu1 }
 0x381   : > { %v7465_v56 = vpack.c.bf16 %v4245_v3, %v4244_v46  ;;  %v4260_v41 = vmax.f32 %v2937_v63, 0.0  ;;  %v2939_v21 = vadd.f32 %v2938_v39, %v9075_v27  ;;  %v7458_v55 = vpack.c.bf16 %v4231_v30, %v4230_v7 }
 0x382   : > { %v3166_v54 = vadd.f32 %v3165_v20, %v9064_v58  ;;  %v2940_v15 = vpop.f32.mrf.mxu0  ;;  %v3169_v61 = vpop.f32.mrf.mxu1  ;;  %v4246_v19 = vmax.f32 %v3164_v11, 0.0 }
 0x383   : > { %6507 = vst [vmem:[%s8663_s26 + $0x960] sm:$0xff] %v7465_v56  ;;  %v4261_v2 = vmax.f32 %v2939_v21, 0.0  ;;  %v2941_v45 = vadd.f32 %v2940_v15, %v9089_v22  ;;  %6500 = vst [vmem:[%s8663_s26 + $0x928] sm:$0xff] %v7458_v55  ;;  %v3170_v9 = vadd.f32 %v3169_v61, %v9075_v27 }
 0x384   : > { %v4247_v6 = vmax.f32 %v3166_v54, 0.0  ;;  %v2942_v43 = vpop.f32.mrf.mxu0  ;;  %v3171_v16 = vpop.f32.mrf.mxu1 }
 0x385   : > { %v7473_v10 = vpack.c.bf16 %v4261_v2, %v4260_v41  ;;  %v2943_v38 = vadd.f32 %v2942_v43, %v9089_v22  ;;  %v3172_v3 = vadd.f32 %v3171_v16, %v9075_v27  ;;  %v4276_v30 = vmax.f32 %v2941_v45, 0.0 }
 0x386   : > { %v7466_v46 = vpack.c.bf16 %v4247_v6, %v4246_v19  ;;  %v3173_v63 = vpop.f32.mrf.mxu1  ;;  %v3212_v7 = vpop.f32.mrf.mxu0  ;;  %v4262_v56 = vmax.f32 %v3170_v9, 0.0 }
 0x387   : > { %6515 = vst [vmem:[%s8663_s26 + $0x9a0] sm:$0xff] %v7473_v10  ;;  %v4277_v39 = vmax.f32 %v2943_v38, 0.0  ;;  %v3174_v11 = vadd.f32 %v3173_v63, %v9089_v22  ;;  %v3213_v20 = vadd.f32 %v3212_v7, %v8631_v26  ;;  %v4263_v21 = vmax.f32 %v3172_v3, 0.0 }
 0x388   : > { %6508 = vst [vmem:[%s8663_s26 + $0x968] sm:$0xff] %v7466_v46  ;;  %v3175_v41 = vpop.f32.mrf.mxu1  ;;  %v3214_v55 = vpop.f32.mrf.mxu0 }
 0x389   : > { %v7481_v54 = vpack.c.bf16 %v4277_v39, %v4276_v30  ;;  %v3176_v15 = vadd.f32 %v3175_v41, %v9089_v22  ;;  %v7474_v61 = vpack.c.bf16 %v4263_v21, %v4262_v56  ;;  %v3656_v2 = vmax.f32 %v3213_v20, 0.0 }
 0x38a   : > { %v3215_v19 = vadd.f32 %v3214_v55, %v8631_v26  ;;  %v3216_v45 = vpop.f32.mrf.mxu0  ;;  %v3445_v6 = vpop.f32.mrf.mxu1  ;;  %v4278_v43 = vmax.f32 %v3174_v11, 0.0 }
 0x38b   : > { %6523 = vst [vmem:[%s8663_s26 + $0x9e0] sm:$0xff] %v7481_v54  ;;  %v4279_v16 = vmax.f32 %v3176_v15, 0.0  ;;  %v3217_v10 = vadd.f32 %v3216_v45, %v8636_v14  ;;  %6516 = vst [vmem:[%s8663_s26 + $0x9a8] sm:$0xff] %v7474_v61  ;;  %v3446_v38 = vadd.f32 %v3445_v6, %v8631_v26 }
 0x38c   : > { %v3657_v9 = vmax.f32 %v3215_v19, 0.0  ;;  %v3218_v46 = vpop.f32.mrf.mxu0  ;;  %v3447_v3 = vpop.f32.mrf.mxu1 }
 0x38d   : > { %v7482_v63 = vpack.c.bf16 %v4279_v16, %v4278_v43  ;;  %v3219_v7 = vadd.f32 %v3218_v46, %v8636_v14  ;;  %v3448_v39 = vadd.f32 %v3447_v3, %v8631_v26  ;;  %v3672_v11 = vmax.f32 %v3217_v10, 0.0 }
 0x38e   : > { %v7171_v30 = vpack.c.bf16 %v3657_v9, %v3656_v2  ;;  %v3222_v20 = vpop.f32.mrf.mxu0  ;;  %v3449_v56 = vpop.f32.mrf.mxu1  ;;  %v3658_v55 = vmax.f32 %v3446_v38, 0.0 }
 0x38f   : > { %6524 = vst [vmem:[%s8663_s26 + $0x9e8] sm:$0xff] %v7482_v63  ;;  %v3673_v21 = vmax.f32 %v3219_v7, 0.0  ;;  %v3223_v41 = vadd.f32 %v3222_v20, %v8646_v50  ;;  %v3659_v54 = vmax.f32 %v3448_v39, 0.0  ;;  %v3450_v15 = vadd.f32 %v3449_v56, %v8636_v14 }
 0x390   : > { %6210 = vst [vmem:[%s8663_s26 + $0x30] sm:$0xff] %v7171_v30  ;;  %v3224_v61 = vpop.f32.mrf.mxu0  ;;  %v3451_v19 = vpop.f32.mrf.mxu1 }
 0x391   : > { %v7179_v2 = vpack.c.bf16 %v3673_v21, %v3672_v11  ;;  %v3688_v45 = vmax.f32 %v3223_v41, 0.0  ;;  %v3225_v6 = vadd.f32 %v3224_v61, %v8646_v50  ;;  %v7172_v43 = vpack.c.bf16 %v3659_v54, %v3658_v55 }
 0x392   : > { %v3452_v16 = vadd.f32 %v3451_v19, %v8636_v14  ;;  %v3226_v10 = vpop.f32.mrf.mxu0  ;;  %v3455_v9 = vpop.f32.mrf.mxu1  ;;  %v3674_v3 = vmax.f32 %v3450_v15, 0.0 }
 0x393   : > { %6221 = vst [vmem:[%s8663_s26 + $0x70] sm:$0xff] %v7179_v2  ;;  %v3689_v38 = vmax.f32 %v3225_v6, 0.0  ;;  %v3227_v46 = vadd.f32 %v3226_v10, %v8659_v12  ;;  %6214 = vst.msk [vmem:[%s8663_s26 + $0x38] sm:$0xff] %vm9847_vm1, %v7172_v43  ;;  %v3456_v7 = vadd.f32 %v3455_v9, %v8646_v50 }
 0x394   : > { %v3675_v63 = vmax.f32 %v3452_v16, 0.0  ;;  %v3228_v30 = vpop.f32.mrf.mxu0  ;;  %v3457_v39 = vpop.f32.mrf.mxu1 }
 0x395   : > { %v7187_v20 = vpack.c.bf16 %v3689_v38, %v3688_v45  ;;  %v3229_v14 = vadd.f32 %v3228_v30, %v8659_v12  ;;  %v3458_v11 = vadd.f32 %v3457_v39, %v8646_v50  ;;  %v3704_v55 = vmax.f32 %v3227_v46, 0.0 }
 0x396   : > { %v7180_v56 = vpack.c.bf16 %v3675_v63, %v3674_v3  ;;  %v3232_v21 = vpop.f32.mrf.mxu0  ;;  %v3459_v41 = vpop.f32.mrf.mxu1  ;;  %v3690_v15 = vmax.f32 %v3456_v7, 0.0 }
 0x397   : > { %6229 = vst [vmem:[%s8663_s26 + $0xb0] sm:$0xff] %v7187_v20  ;;  %v3705_v54 = vmax.f32 %v3229_v14, 0.0  ;;  %v3233_v61 = vadd.f32 %v3232_v21, %v8679_v29  ;;  %v3691_v19 = vmax.f32 %v3458_v11, 0.0  ;;  %v3460_v2 = vadd.f32 %v3459_v41, %v8659_v12 }
 0x398   : > { %6222 = vst.msk [vmem:[%s8663_s26 + $0x78] sm:$0xff] %vm9847_vm1, %v7180_v56  ;;  %v3234_v45 = vpop.f32.mrf.mxu0  ;;  %v3461_v6 = vpop.f32.mrf.mxu1 }
 0x399   : > { %v7195_v43 = vpack.c.bf16 %v3705_v54, %v3704_v55  ;;  %v3720_v50 = vmax.f32 %v3233_v61, 0.0  ;;  %v3235_v16 = vadd.f32 %v3234_v45, %v8679_v29  ;;  %v7188_v10 = vpack.c.bf16 %v3691_v19, %v3690_v15 }
 0x39a   : > { %v3462_v9 = vadd.f32 %v3461_v6, %v8659_v12  ;;  %v3236_v38 = vpop.f32.mrf.mxu0  ;;  %v3465_v46 = vpop.f32.mrf.mxu1  ;;  %v3706_v7 = vmax.f32 %v3460_v2, 0.0 }
 0x39b   : > { %6237 = vst [vmem:[%s8663_s26 + $0xf0] sm:$0xff] %v7195_v43  ;;  %v3721_v3 = vmax.f32 %v3235_v16, 0.0  ;;  %v3237_v63 = vadd.f32 %v3236_v38, %v8689_v53  ;;  %6230 = vst.msk [vmem:[%s8663_s26 + $0xb8] sm:$0xff] %vm9847_vm1, %v7188_v10  ;;  %v3466_v39 = vadd.f32 %v3465_v46, %v8679_v29 }
 0x39c   : > { %v3707_v30 = vmax.f32 %v3462_v9, 0.0  ;;  %v3238_v20 = vpop.f32.mrf.mxu0  ;;  %v3467_v14 = vpop.f32.mrf.mxu1 }
 0x39d   : > { %v7203_v56 = vpack.c.bf16 %v3721_v3, %v3720_v50  ;;  %v3239_v12 = vadd.f32 %v3238_v20, %v8689_v53  ;;  %v3468_v21 = vadd.f32 %v3467_v14, %v8679_v29  ;;  %v3736_v54 = vmax.f32 %v3237_v63, 0.0 }
 0x39e   : > { %v7196_v11 = vpack.c.bf16 %v3707_v30, %v3706_v7  ;;  %v3242_v41 = vpop.f32.mrf.mxu0  ;;  %v3469_v55 = vpop.f32.mrf.mxu1  ;;  %v3722_v19 = vmax.f32 %v3466_v39, 0.0 }
 0x39f   : > { %6245 = vst [vmem:[%s8663_s26 + $0x130] sm:$0xff] %v7203_v56  ;;  %v3737_v61 = vmax.f32 %v3239_v12, 0.0  ;;  %v3243_v15 = vadd.f32 %v3242_v41, %v8701_v59  ;;  %v3723_v2 = vmax.f32 %v3468_v21, 0.0  ;;  %v3470_v45 = vadd.f32 %v3469_v55, %v8689_v53 }
 0x3a0   : > { %6238 = vst.msk [vmem:[%s8663_s26 + $0xf8] sm:$0xff] %vm9847_vm1, %v7196_v11  ;;  %v3244_v6 = vpop.f32.mrf.mxu0  ;;  %v3471_v43 = vpop.f32.mrf.mxu1 }
 0x3a1   : > { %v7211_v50 = vpack.c.bf16 %v3737_v61, %v3736_v54  ;;  %v3752_v29 = vmax.f32 %v3243_v15, 0.0  ;;  %v3245_v16 = vadd.f32 %v3244_v6, %v8701_v59  ;;  %v7204_v10 = vpack.c.bf16 %v3723_v2, %v3722_v19 }
 0x3a2   : > { %v3472_v9 = vadd.f32 %v3471_v43, %v8689_v53  ;;  %v3246_v38 = vpop.f32.mrf.mxu0  ;;  %v3475_v46 = vpop.f32.mrf.mxu1  ;;  %v3738_v7 = vmax.f32 %v3470_v45, 0.0 }
 0x3a3   : > { %6253 = vst [vmem:[%s8663_s26 + $0x170] sm:$0xff] %v7211_v50  ;;  %v3753_v3 = vmax.f32 %v3245_v16, 0.0  ;;  %v3247_v63 = vadd.f32 %v3246_v38, %v8711_v42  ;;  %6246 = vst.msk [vmem:[%s8663_s26 + $0x138] sm:$0xff] %vm9847_vm1, %v7204_v10  ;;  %v3476_v39 = vadd.f32 %v3475_v46, %v8701_v59 }
 0x3a4   : > { %v3739_v30 = vmax.f32 %v3472_v9, 0.0  ;;  %v3248_v20 = vpop.f32.mrf.mxu0  ;;  %v3477_v14 = vpop.f32.mrf.mxu1 }
 0x3a5   : > { %v7219_v56 = vpack.c.bf16 %v3753_v3, %v3752_v29  ;;  %v3249_v53 = vadd.f32 %v3248_v20, %v8711_v42  ;;  %v3478_v11 = vadd.f32 %v3477_v14, %v8701_v59  ;;  %v3768_v55 = vmax.f32 %v3247_v63, 0.0 }
 0x3a6   : > { %v7212_v12 = vpack.c.bf16 %v3739_v30, %v3738_v7  ;;  %v3252_v21 = vpop.f32.mrf.mxu0  ;;  %v3479_v41 = vpop.f32.mrf.mxu1  ;;  %v3754_v15 = vmax.f32 %v3476_v39, 0.0 }
 0x3a7   : > { %6261 = vst [vmem:[%s8663_s26 + $0x1b0] sm:$0xff] %v7219_v56  ;;  %v3769_v54 = vmax.f32 %v3249_v53, 0.0  ;;  %v3253_v61 = vadd.f32 %v3252_v21, %v8723_v23  ;;  %v3755_v19 = vmax.f32 %v3478_v11, 0.0  ;;  %v3480_v2 = vadd.f32 %v3479_v41, %v8711_v42 }
 0x3a8   : > { %6254 = vst.msk [vmem:[%s8663_s26 + $0x178] sm:$0xff] %vm9847_vm1, %v7212_v12  ;;  %v3254_v45 = vpop.f32.mrf.mxu0  ;;  %v3481_v6 = vpop.f32.mrf.mxu1 }
 0x3a9   : > { %v7227_v43 = vpack.c.bf16 %v3769_v54, %v3768_v55  ;;  %v3784_v59 = vmax.f32 %v3253_v61, 0.0  ;;  %v3255_v50 = vadd.f32 %v3254_v45, %v8723_v23  ;;  %v7220_v29 = vpack.c.bf16 %v3755_v19, %v3754_v15 }
 0x3aa   : > { %v3482_v16 = vadd.f32 %v3481_v6, %v8711_v42  ;;  %v3256_v10 = vpop.f32.mrf.mxu0  ;;  %v3485_v9 = vpop.f32.mrf.mxu1  ;;  %v3770_v3 = vmax.f32 %v3480_v2, 0.0 }
 0x3ab   : > { %6269 = vst [vmem:[%s8663_s26 + $0x1f0] sm:$0xff] %v7227_v43  ;;  %v3785_v38 = vmax.f32 %v3255_v50, 0.0  ;;  %v3257_v46 = vadd.f32 %v3256_v10, %v8733_v31  ;;  %6262 = vst.msk [vmem:[%s8663_s26 + $0x1b8] sm:$0xff] %vm9847_vm1, %v7220_v29  ;;  %v3486_v7 = vadd.f32 %v3485_v9, %v8723_v23 }
 0x3ac   : > { %v3771_v63 = vmax.f32 %v3482_v16, 0.0  ;;  %v3258_v30 = vpop.f32.mrf.mxu0  ;;  %v3487_v39 = vpop.f32.mrf.mxu1 }
 0x3ad   : > { %v7235_v20 = vpack.c.bf16 %v3785_v38, %v3784_v59  ;;  %v3259_v42 = vadd.f32 %v3258_v30, %v8733_v31  ;;  %v3488_v56 = vadd.f32 %v3487_v39, %v8723_v23  ;;  %v3800_v11 = vmax.f32 %v3257_v46, 0.0 }
 0x3ae   : > { %v7228_v14 = vpack.c.bf16 %v3771_v63, %v3770_v3  ;;  %v3262_v53 = vpop.f32.mrf.mxu0  ;;  %v3489_v12 = vpop.f32.mrf.mxu1  ;;  %v3786_v55 = vmax.f32 %v3486_v7, 0.0 }
 0x3af   : > { %6277 = vst [vmem:[%s8663_s26 + $0x230] sm:$0xff] %v7235_v20  ;;  %v3801_v21 = vmax.f32 %v3259_v42, 0.0  ;;  %v3263_v41 = vadd.f32 %v3262_v53, %v8745_v44  ;;  %v3787_v54 = vmax.f32 %v3488_v56, 0.0  ;;  %v3490_v61 = vadd.f32 %v3489_v12, %v8733_v31 }
 0x3b0   : > { %6270 = vst.msk [vmem:[%s8663_s26 + $0x1f8] sm:$0xff] %vm9847_vm1, %v7228_v14  ;;  %v3264_v15 = vpop.f32.mrf.mxu0  ;;  %v3491_v19 = vpop.f32.mrf.mxu1 }
 0x3b1   : > { %v7243_v2 = vpack.c.bf16 %v3801_v21, %v3800_v11  ;;  %v3816_v23 = vmax.f32 %v3263_v41, 0.0  ;;  %v3265_v45 = vadd.f32 %v3264_v15, %v8745_v44  ;;  %v7236_v6 = vpack.c.bf16 %v3787_v54, %v3786_v55 }
 0x3b2   : > { %v3492_v43 = vadd.f32 %v3491_v19, %v8733_v31  ;;  %v3266_v59 = vpop.f32.mrf.mxu0  ;;  %v3495_v50 = vpop.f32.mrf.mxu1  ;;  %v3802_v10 = vmax.f32 %v3490_v61, 0.0 }
 0x3b3   : > { %6285 = vst [vmem:[%s8663_s26 + $0x270] sm:$0xff] %v7243_v2  ;;  %v3817_v29 = vmax.f32 %v3265_v45, 0.0  ;;  %v3267_v16 = vadd.f32 %v3266_v59, %v8755_v33  ;;  %6278 = vst.msk [vmem:[%s8663_s26 + $0x238] sm:$0xff] %vm9847_vm1, %v7236_v6  ;;  %v3496_v38 = vadd.f32 %v3495_v50, %v8745_v44 }
 0x3b4   : > { %v3803_v9 = vmax.f32 %v3492_v43, 0.0  ;;  %v3268_v46 = vpop.f32.mrf.mxu0  ;;  %v3497_v3 = vpop.f32.mrf.mxu1 }
 0x3b5   : > { %v7251_v63 = vpack.c.bf16 %v3817_v29, %v3816_v23  ;;  %v3269_v31 = vadd.f32 %v3268_v46, %v8755_v33  ;;  %v3498_v30 = vadd.f32 %v3497_v3, %v8745_v44  ;;  %v3832_v42 = vmax.f32 %v3267_v16, 0.0 }
 0x3b6   : > { %v7244_v7 = vpack.c.bf16 %v3803_v9, %v3802_v10  ;;  %v3272_v39 = vpop.f32.mrf.mxu0  ;;  %v3499_v20 = vpop.f32.mrf.mxu1  ;;  %v3818_v53 = vmax.f32 %v3496_v38, 0.0 }
 0x3b7   : > { %6293 = vst [vmem:[%s8663_s26 + $0x2b0] sm:$0xff] %v7251_v63  ;;  %v3833_v14 = vmax.f32 %v3269_v31, 0.0  ;;  %v3273_v56 = vadd.f32 %v3272_v39, %v8767_v49  ;;  %v3819_v12 = vmax.f32 %v3498_v30, 0.0  ;;  %v3500_v11 = vadd.f32 %v3499_v20, %v8755_v33 }
 0x3b8   : > { %6286 = vst.msk [vmem:[%s8663_s26 + $0x278] sm:$0xff] %vm9847_vm1, %v7244_v7  ;;  %v3274_v21 = vpop.f32.mrf.mxu0  ;;  %v3501_v41 = vpop.f32.mrf.mxu1 }
 0x3b9   : > { %v7259_v55 = vpack.c.bf16 %v3833_v14, %v3832_v42  ;;  %v3848_v44 = vmax.f32 %v3273_v56, 0.0  ;;  %v3275_v54 = vadd.f32 %v3274_v21, %v8767_v49  ;;  %v7252_v61 = vpack.c.bf16 %v3819_v12, %v3818_v53 }
 0x3ba   : > { %v3502_v15 = vadd.f32 %v3501_v41, %v8755_v33  ;;  %v3276_v19 = vpop.f32.mrf.mxu0  ;;  %v3505_v2 = vpop.f32.mrf.mxu1  ;;  %v3834_v6 = vmax.f32 %v3500_v11, 0.0 }
 0x3bb   : > { %6301 = vst [vmem:[%s8663_s26 + $0x2f0] sm:$0xff] %v7259_v55  ;;  %v3849_v23 = vmax.f32 %v3275_v54, 0.0  ;;  %v3277_v45 = vadd.f32 %v3276_v19, %v8777_v4  ;;  %6294 = vst.msk [vmem:[%s8663_s26 + $0x2b8] sm:$0xff] %vm9847_vm1, %v7252_v61  ;;  %v3506_v59 = vadd.f32 %v3505_v2, %v8767_v49 }
 0x3bc   : > { %v3835_v43 = vmax.f32 %v3502_v15, 0.0  ;;  %v3278_v50 = vpop.f32.mrf.mxu0  ;;  %v3507_v29 = vpop.f32.mrf.mxu1 }
 0x3bd   : > { %v7267_v16 = vpack.c.bf16 %v3849_v23, %v3848_v44  ;;  %v3279_v33 = vadd.f32 %v3278_v50, %v8777_v4  ;;  %v3508_v9 = vadd.f32 %v3507_v29, %v8767_v49  ;;  %v3864_v3 = vmax.f32 %v3277_v45, 0.0 }
 0x3be   : > { %v7260_v10 = vpack.c.bf16 %v3835_v43, %v3834_v6  ;;  %v3282_v38 = vpop.f32.mrf.mxu0  ;;  %v3509_v46 = vpop.f32.mrf.mxu1  ;;  %v3850_v7 = vmax.f32 %v3506_v59, 0.0 }
 0x3bf   : > { %6309 = vst [vmem:[%s8663_s26 + $0x330] sm:$0xff] %v7267_v16  ;;  %v3865_v63 = vmax.f32 %v3279_v33, 0.0  ;;  %v3283_v31 = vadd.f32 %v3282_v38, %v8789_v13  ;;  %v3851_v30 = vmax.f32 %v3508_v9, 0.0  ;;  %v3510_v39 = vadd.f32 %v3509_v46, %v8777_v4 }
 0x3c0   : > { %6302 = vst.msk [vmem:[%s8663_s26 + $0x2f8] sm:$0xff] %vm9847_vm1, %v7260_v10  ;;  %v3284_v20 = vpop.f32.mrf.mxu0  ;;  %v3511_v42 = vpop.f32.mrf.mxu1 }
 0x3c1   : > { %v7275_v14 = vpack.c.bf16 %v3865_v63, %v3864_v3  ;;  %v3880_v49 = vmax.f32 %v3283_v31, 0.0  ;;  %v3285_v56 = vadd.f32 %v3284_v20, %v8789_v13  ;;  %v7268_v53 = vpack.c.bf16 %v3851_v30, %v3850_v7 }
 0x3c2   : > { %v3512_v12 = vadd.f32 %v3511_v42, %v8777_v4  ;;  %v3286_v11 = vpop.f32.mrf.mxu0  ;;  %v3515_v21 = vpop.f32.mrf.mxu1  ;;  %v3866_v44 = vmax.f32 %v3510_v39, 0.0 }
 0x3c3   : > { %6317 = vst [vmem:[%s8663_s26 + $0x370] sm:$0xff] %v7275_v14  ;;  %v3881_v41 = vmax.f32 %v3285_v56, 0.0  ;;  %v3287_v55 = vadd.f32 %v3286_v11, %v8799_v24  ;;  %6310 = vst.msk [vmem:[%s8663_s26 + $0x338] sm:$0xff] %vm9847_vm1, %v7268_v53  ;;  %v3516_v61 = vadd.f32 %v3515_v21, %v8789_v13 }
 0x3c4   : > { %v3867_v54 = vmax.f32 %v3512_v12, 0.0  ;;  %v3288_v15 = vpop.f32.mrf.mxu0  ;;  %v3517_v19 = vpop.f32.mrf.mxu1 }
 0x3c5   : > { %v7283_v2 = vpack.c.bf16 %v3881_v41, %v3880_v49  ;;  %v3289_v4 = vadd.f32 %v3288_v15, %v8799_v24  ;;  %v3518_v45 = vadd.f32 %v3517_v19, %v8789_v13  ;;  %v3896_v59 = vmax.f32 %v3287_v55, 0.0 }
 0x3c6   : > { %v7276_v23 = vpack.c.bf16 %v3867_v54, %v3866_v44  ;;  %v3292_v6 = vpop.f32.mrf.mxu0  ;;  %v3519_v43 = vpop.f32.mrf.mxu1  ;;  %v3882_v16 = vmax.f32 %v3516_v61, 0.0 }
 0x3c7   : > { %6325 = vst [vmem:[%s8663_s26 + $0x3b0] sm:$0xff] %v7283_v2  ;;  %v3897_v50 = vmax.f32 %v3289_v4, 0.0  ;;  %v3293_v29 = vadd.f32 %v3292_v6, %v8811_v0  ;;  %v3883_v33 = vmax.f32 %v3518_v45, 0.0  ;;  %v3520_v10 = vadd.f32 %v3519_v43, %v8799_v24 }
 0x3c8   : > { %6318 = vst.msk [vmem:[%s8663_s26 + $0x378] sm:$0xff] %vm9847_vm1, %v7276_v23  ;;  %v3294_v9 = vpop.f32.mrf.mxu0  ;;  %v3521_v38 = vpop.f32.mrf.mxu1 }
 0x3c9   : > { %v7291_v46 = vpack.c.bf16 %v3897_v50, %v3896_v59  ;;  %v3912_v13 = vmax.f32 %v3293_v29, 0.0  ;;  %v3295_v3 = vadd.f32 %v3294_v9, %v8811_v0  ;;  %v7284_v63 = vpack.c.bf16 %v3883_v33, %v3882_v16 }
 0x3ca   : > { %v3522_v31 = vadd.f32 %v3521_v38, %v8799_v24  ;;  %v3296_v7 = vpop.f32.mrf.mxu0  ;;  %v3525_v30 = vpop.f32.mrf.mxu1  ;;  %v3898_v42 = vmax.f32 %v3520_v10, 0.0 }
 0x3cb   : > { %6333 = vst [vmem:[%s8663_s26 + $0x3f0] sm:$0xff] %v7291_v46  ;;  %v3913_v39 = vmax.f32 %v3295_v3, 0.0  ;;  %v3297_v20 = vadd.f32 %v3296_v7, %v8821_v28  ;;  %6326 = vst.msk [vmem:[%s8663_s26 + $0x3b8] sm:$0xff] %vm9847_vm1, %v7284_v63  ;;  %v3526_v49 = vadd.f32 %v3525_v30, %v8811_v0 }
 0x3cc   : > { %v3899_v14 = vmax.f32 %v3522_v31, 0.0  ;;  %v3298_v56 = vpop.f32.mrf.mxu0  ;;  %v3527_v53 = vpop.f32.mrf.mxu1 }
 0x3cd   : > { %v7299_v12 = vpack.c.bf16 %v3913_v39, %v3912_v13  ;;  %v3299_v24 = vadd.f32 %v3298_v56, %v8821_v28  ;;  %v3528_v21 = vadd.f32 %v3527_v53, %v8811_v0  ;;  %v3928_v44 = vmax.f32 %v3297_v20, 0.0 }
 0x3ce   : > { %v7292_v11 = vpack.c.bf16 %v3899_v14, %v3898_v42  ;;  %v3302_v41 = vpop.f32.mrf.mxu0  ;;  %v3529_v55 = vpop.f32.mrf.mxu1  ;;  %v3914_v15 = vmax.f32 %v3526_v49, 0.0 }
 0x3cf   : > { %6341 = vst [vmem:[%s8663_s26 + $0x430] sm:$0xff] %v7299_v12  ;;  %v3929_v54 = vmax.f32 %v3299_v24, 0.0  ;;  %v3303_v61 = vadd.f32 %v3302_v41, %v8833_v51  ;;  %v3915_v19 = vmax.f32 %v3528_v21, 0.0  ;;  %v3530_v2 = vadd.f32 %v3529_v55, %v8821_v28 }
 0x3d0   : > { %6334 = vst.msk [vmem:[%s8663_s26 + $0x3f8] sm:$0xff] %vm9847_vm1, %v7292_v11  ;;  %v3304_v4 = vpop.f32.mrf.mxu0  ;;  %v3531_v23 = vpop.f32.mrf.mxu1 }
 0x3d1   : > { %v7307_v45 = vpack.c.bf16 %v3929_v54, %v3928_v44  ;;  %v3944_v0 = vmax.f32 %v3303_v61, 0.0  ;;  %v3305_v6 = vadd.f32 %v3304_v4, %v8833_v51  ;;  %v7300_v43 = vpack.c.bf16 %v3915_v19, %v3914_v15 }
 0x3d2   : > { %v3532_v59 = vadd.f32 %v3531_v23, %v8821_v28  ;;  %v3306_v50 = vpop.f32.mrf.mxu0  ;;  %v3535_v29 = vpop.f32.mrf.mxu1  ;;  %v3930_v10 = vmax.f32 %v3530_v2, 0.0 }
 0x3d3   : > { %6349 = vst [vmem:[%s8663_s26 + $0x470] sm:$0xff] %v7307_v45  ;;  %v3945_v16 = vmax.f32 %v3305_v6, 0.0  ;;  %v3307_v33 = vadd.f32 %v3306_v50, %v8843_v36  ;;  %6342 = vst.msk [vmem:[%s8663_s26 + $0x438] sm:$0xff] %vm9847_vm1, %v7300_v43  ;;  %v3536_v38 = vadd.f32 %v3535_v29, %v8833_v51 }
 0x3d4   : > { %v3931_v9 = vmax.f32 %v3532_v59, 0.0  ;;  %v3308_v46 = vpop.f32.mrf.mxu0  ;;  %v3537_v13 = vpop.f32.mrf.mxu1 }
 0x3d5   : > { %v7315_v3 = vpack.c.bf16 %v3945_v16, %v3944_v0  ;;  %v3309_v28 = vadd.f32 %v3308_v46, %v8843_v36  ;;  %v3538_v31 = vadd.f32 %v3537_v13, %v8833_v51  ;;  %v3960_v39 = vmax.f32 %v3307_v33, 0.0 }
 0x3d6   : > { %v7308_v63 = vpack.c.bf16 %v3931_v9, %v3930_v10  ;;  %v3312_v7 = vpop.f32.mrf.mxu0  ;;  %v3539_v30 = vpop.f32.mrf.mxu1  ;;  %v3946_v14 = vmax.f32 %v3536_v38, 0.0 }
 0x3d7   : > { %6357 = vst [vmem:[%s8663_s26 + $0x4b0] sm:$0xff] %v7315_v3  ;;  %v3961_v20 = vmax.f32 %v3309_v28, 0.0  ;;  %v3313_v42 = vadd.f32 %v3312_v7, %v8855_v40  ;;  %v3947_v49 = vmax.f32 %v3538_v31, 0.0  ;;  %v3540_v56 = vadd.f32 %v3539_v30, %v8843_v36 }
 0x3d8   : > { %6350 = vst.msk [vmem:[%s8663_s26 + $0x478] sm:$0xff] %vm9847_vm1, %v7308_v63  ;;  %v3314_v53 = vpop.f32.mrf.mxu0  ;;  %v3541_v12 = vpop.f32.mrf.mxu1 }
 0x3d9   : > { %v7323_v24 = vpack.c.bf16 %v3961_v20, %v3960_v39  ;;  %v3976_v51 = vmax.f32 %v3313_v42, 0.0  ;;  %v3315_v11 = vadd.f32 %v3314_v53, %v8855_v40  ;;  %v7316_v21 = vpack.c.bf16 %v3947_v49, %v3946_v14 }
 0x3da   : > { %v3542_v41 = vadd.f32 %v3541_v12, %v8843_v36  ;;  %v3316_v55 = vpop.f32.mrf.mxu0  ;;  %v3545_v44 = vpop.f32.mrf.mxu1  ;;  %v3962_v15 = vmax.f32 %v3540_v56, 0.0 }
 0x3db   : > { %6365 = vst [vmem:[%s8663_s26 + $0x4f0] sm:$0xff] %v7323_v24  ;;  %v3977_v54 = vmax.f32 %v3315_v11, 0.0  ;;  %v3317_v61 = vadd.f32 %v3316_v55, %v8865_v47  ;;  %6358 = vst.msk [vmem:[%s8663_s26 + $0x4b8] sm:$0xff] %vm9847_vm1, %v7316_v21  ;;  %v3546_v2 = vadd.f32 %v3545_v44, %v8855_v40 }
 0x3dc   : > { %v3963_v19 = vmax.f32 %v3542_v41, 0.0  ;;  %v3318_v4 = vpop.f32.mrf.mxu0  ;;  %v3547_v23 = vpop.f32.mrf.mxu1 }
 0x3dd   : > { %v7331_v45 = vpack.c.bf16 %v3977_v54, %v3976_v51  ;;  %v3319_v36 = vadd.f32 %v3318_v4, %v8865_v47  ;;  %v3548_v6 = vadd.f32 %v3547_v23, %v8855_v40  ;;  %v3992_v50 = vmax.f32 %v3317_v61, 0.0 }
 0x3de   : > { %v7324_v0 = vpack.c.bf16 %v3963_v19, %v3962_v15  ;;  %v3322_v43 = vpop.f32.mrf.mxu0  ;;  %v3549_v59 = vpop.f32.mrf.mxu1  ;;  %v3978_v33 = vmax.f32 %v3546_v2, 0.0 }
 0x3df   : > { %6373 = vst [vmem:[%s8663_s26 + $0x530] sm:$0xff] %v7331_v45  ;;  %v3993_v29 = vmax.f32 %v3319_v36, 0.0  ;;  %v3323_v16 = vadd.f32 %v3322_v43, %v8877_v34  ;;  %v3979_v10 = vmax.f32 %v3548_v6, 0.0  ;;  %v3550_v9 = vadd.f32 %v3549_v59, %v8865_v47 }
 0x3e0   : > { %6366 = vst.msk [vmem:[%s8663_s26 + $0x4f8] sm:$0xff] %vm9847_vm1, %v7324_v0  ;;  %v3324_v38 = vpop.f32.mrf.mxu0  ;;  %v3551_v46 = vpop.f32.mrf.mxu1 }
 0x3e1   : > { %v7339_v13 = vpack.c.bf16 %v3993_v29, %v3992_v50  ;;  %v3325_v40 = vadd.f32 %v3324_v38, %v8877_v34  ;;  %v7332_v3 = vpack.c.bf16 %v3979_v10, %v3978_v33  ;;  %v3552_v28 = vadd.f32 %v3551_v46, %v8865_v47 }
 0x3e2   : > { %v3326_v63 = vpop.f32.mrf.mxu0  ;;  %v3555_v31 = vpop.f32.mrf.mxu1  ;;  %v4008_v7 = vmax.f32 %v3323_v16, 0.0  ;;  %v3994_v20 = vmax.f32 %v3550_v9, 0.0 }
 0x3e3   : > { %6381 = vst [vmem:[%s8663_s26 + $0x570] sm:$0xff] %v7339_v13  ;;  %v4009_v30 = vmax.f32 %v3325_v40, 0.0  ;;  %v3327_v39 = vadd.f32 %v3326_v63, %v8887_v1  ;;  %6374 = vst.msk [vmem:[%s8663_s26 + $0x538] sm:$0xff] %vm9847_vm1, %v7332_v3  ;;  %v3995_v42 = vmax.f32 %v3552_v28, 0.0  ;;  %v3556_v14 = vadd.f32 %v3555_v31, %v8877_v34 }
 0x3e4   : > { %v3328_v49 = vpop.f32.mrf.mxu0  ;;  %v3557_v56 = vpop.f32.mrf.mxu1 }
 0x3e5   : > { %v7347_v53 = vpack.c.bf16 %v4009_v30, %v4008_v7  ;;  %v3329_v47 = vadd.f32 %v3328_v49, %v8887_v1  ;;  %v7340_v12 = vpack.c.bf16 %v3995_v42, %v3994_v20  ;;  %v3558_v24 = vadd.f32 %v3557_v56, %v8877_v34 }
 0x3e6   : > { %v3332_v51 = vpop.f32.mrf.mxu0  ;;  %v3559_v11 = vpop.f32.mrf.mxu1  ;;  %v4024_v21 = vmax.f32 %v3327_v39, 0.0  ;;  %v4010_v44 = vmax.f32 %v3556_v14, 0.0 }
 0x3e7   : > { %6389 = vst [vmem:[%s8663_s26 + $0x5b0] sm:$0xff] %v7347_v53  ;;  %v4025_v41 = vmax.f32 %v3329_v47, 0.0  ;;  %v3333_v55 = vadd.f32 %v3332_v51, %v8899_v17  ;;  %6382 = vst.msk [vmem:[%s8663_s26 + $0x578] sm:$0xff] %vm9847_vm1, %v7340_v12  ;;  %v4011_v54 = vmax.f32 %v3558_v24, 0.0  ;;  %v3560_v61 = vadd.f32 %v3559_v11, %v8887_v1 }
 0x3e8   : > { %v3334_v15 = vpop.f32.mrf.mxu0  ;;  %v3561_v19 = vpop.f32.mrf.mxu1 }
 0x3e9   : > { %v7355_v2 = vpack.c.bf16 %v4025_v41, %v4024_v21  ;;  %v3335_v34 = vadd.f32 %v3334_v15, %v8899_v17  ;;  %v7348_v4 = vpack.c.bf16 %v4011_v54, %v4010_v44  ;;  %v3562_v23 = vadd.f32 %v3561_v19, %v8887_v1 }
 0x3ea   : > { %v3336_v45 = vpop.f32.mrf.mxu0  ;;  %v3565_v36 = vpop.f32.mrf.mxu1  ;;  %v4040_v0 = vmax.f32 %v3333_v55, 0.0  ;;  %v4026_v59 = vmax.f32 %v3560_v61, 0.0 }
 0x3eb   : > { %6397 = vst [vmem:[%s8663_s26 + $0x5f0] sm:$0xff] %v7355_v2  ;;  %v4041_v6 = vmax.f32 %v3335_v34, 0.0  ;;  %v3337_v43 = vadd.f32 %v3336_v45, %v8909_v8  ;;  %6390 = vst.msk [vmem:[%s8663_s26 + $0x5b8] sm:$0xff] %vm9847_vm1, %v7348_v4  ;;  %v4027_v50 = vmax.f32 %v3562_v23, 0.0  ;;  %v3566_v29 = vadd.f32 %v3565_v36, %v8899_v17 }
 0x3ec   : > { %v3338_v16 = vpop.f32.mrf.mxu0  ;;  %v3567_v33 = vpop.f32.mrf.mxu1 }
 0x3ed   : > { %v7363_v10 = vpack.c.bf16 %v4041_v6, %v4040_v0  ;;  %v3339_v1 = vadd.f32 %v3338_v16, %v8909_v8  ;;  %v7356_v9 = vpack.c.bf16 %v4027_v50, %v4026_v59  ;;  %v3568_v38 = vadd.f32 %v3567_v33, %v8899_v17 }
 0x3ee   : > { %v3342_v46 = vpop.f32.mrf.mxu0  ;;  %v3569_v13 = vpop.f32.mrf.mxu1  ;;  %v4056_v40 = vmax.f32 %v3337_v43, 0.0  ;;  %v4042_v63 = vmax.f32 %v3566_v29, 0.0 }
 0x3ef   : > { %6405 = vst [vmem:[%s8663_s26 + $0x630] sm:$0xff] %v7363_v10  ;;  %v4057_v3 = vmax.f32 %v3339_v1, 0.0  ;;  %v3343_v28 = vadd.f32 %v3342_v46, %v8923_v25  ;;  %6398 = vst.msk [vmem:[%s8663_s26 + $0x5f8] sm:$0xff] %vm9847_vm1, %v7356_v9  ;;  %v4043_v31 = vmax.f32 %v3568_v38, 0.0  ;;  %v3570_v7 = vadd.f32 %v3569_v13, %v8909_v8 }
 0x3f0   : > { %v3344_v30 = vpop.f32.mrf.mxu0  ;;  %v3571_v39 = vpop.f32.mrf.mxu1 }
 0x3f1   : > { %v7371_v20 = vpack.c.bf16 %v4057_v3, %v4056_v40  ;;  %v3345_v17 = vadd.f32 %v3344_v30, %v8923_v25  ;;  %v7364_v42 = vpack.c.bf16 %v4043_v31, %v4042_v63  ;;  %v3572_v14 = vadd.f32 %v3571_v39, %v8909_v8 }
 0x3f2   : > { %v3346_v49 = vpop.f32.mrf.mxu0  ;;  %v3575_v56 = vpop.f32.mrf.mxu1  ;;  %v4072_v53 = vmax.f32 %v3343_v28, 0.0  ;;  %v4058_v24 = vmax.f32 %v3570_v7, 0.0 }
 0x3f3   : > { %6413 = vst [vmem:[%s8663_s26 + $0x670] sm:$0xff] %v7371_v20  ;;  %v4073_v47 = vmax.f32 %v3345_v17, 0.0  ;;  %v3347_v12 = vadd.f32 %v3346_v49, %v8935_v32  ;;  %6406 = vst.msk [vmem:[%s8663_s26 + $0x638] sm:$0xff] %vm9847_vm1, %v7364_v42  ;;  %v4059_v51 = vmax.f32 %v3572_v14, 0.0  ;;  %v3576_v11 = vadd.f32 %v3575_v56, %v8923_v25 }
 0x3f4   : > { %v3348_v21 = vpop.f32.mrf.mxu0  ;;  %v3577_v41 = vpop.f32.mrf.mxu1 }
 0x3f5   : > { %v7379_v55 = vpack.c.bf16 %v4073_v47, %v4072_v53  ;;  %v3349_v8 = vadd.f32 %v3348_v21, %v8935_v32  ;;  %v7372_v44 = vpack.c.bf16 %v4059_v51, %v4058_v24  ;;  %v3578_v54 = vadd.f32 %v3577_v41, %v8923_v25 }
 0x3f6   : > { %v3352_v61 = vpop.f32.mrf.mxu0  ;;  %v3579_v15 = vpop.f32.mrf.mxu1  ;;  %v4088_v19 = vmax.f32 %v3347_v12, 0.0  ;;  %v4074_v4 = vmax.f32 %v3576_v11, 0.0 }
 0x3f7   : > { %6421 = vst [vmem:[%s8663_s26 + $0x6b0] sm:$0xff] %v7379_v55  ;;  %v4089_v2 = vmax.f32 %v3349_v8, 0.0  ;;  %v3353_v34 = vadd.f32 %v3352_v61, %v8946_v57  ;;  %6414 = vst.msk [vmem:[%s8663_s26 + $0x678] sm:$0xff] %vm9847_vm1, %v7372_v44  ;;  %v4075_v23 = vmax.f32 %v3578_v54, 0.0  ;;  %v3580_v45 = vadd.f32 %v3579_v15, %v8935_v32 }
 0x3f8   : > { %v3354_v36 = vpop.f32.mrf.mxu0  ;;  %v3581_v0 = vpop.f32.mrf.mxu1 }
 0x3f9   : > { %v7387_v6 = vpack.c.bf16 %v4089_v2, %v4088_v19  ;;  %v3355_v25 = vadd.f32 %v3354_v36, %v8946_v57  ;;  %v7380_v43 = vpack.c.bf16 %v4075_v23, %v4074_v4  ;;  %v3582_v59 = vadd.f32 %v3581_v0, %v8935_v32 }
 0x3fa   : > { %v3356_v50 = vpop.f32.mrf.mxu0  ;;  %v3585_v29 = vpop.f32.mrf.mxu1  ;;  %v4104_v16 = vmax.f32 %v3353_v34, 0.0  ;;  %v4090_v1 = vmax.f32 %v3580_v45, 0.0 }
 0x3fb   : > { %6429 = vst [vmem:[%s8663_s26 + $0x6f0] sm:$0xff] %v7387_v6  ;;  %v4105_v33 = vmax.f32 %v3355_v25, 0.0  ;;  %v3357_v10 = vadd.f32 %v3356_v50, %v8958_v18  ;;  %6422 = vst.msk [vmem:[%s8663_s26 + $0x6b8] sm:$0xff] %vm9847_vm1, %v7380_v43  ;;  %v4091_v9 = vmax.f32 %v3582_v59, 0.0  ;;  %v3586_v38 = vadd.f32 %v3585_v29, %v8946_v57 }
 0x3fc   : > { %v3358_v46 = vpop.f32.mrf.mxu0  ;;  %v3587_v13 = vpop.f32.mrf.mxu1 }
 0x3fd   : > { %v7395_v40 = vpack.c.bf16 %v4105_v33, %v4104_v16  ;;  %v3359_v32 = vadd.f32 %v3358_v46, %v8958_v18  ;;  %v7388_v3 = vpack.c.bf16 %v4091_v9, %v4090_v1  ;;  %v3588_v28 = vadd.f32 %v3587_v13, %v8946_v57 }
 0x3fe   : > { %v3362_v63 = vpop.f32.mrf.mxu0  ;;  %v3589_v31 = vpop.f32.mrf.mxu1  ;;  %v4120_v7 = vmax.f32 %v3357_v10, 0.0  ;;  %v4106_v20 = vmax.f32 %v3586_v38, 0.0 }
 0x3ff   : > { %6437 = vst [vmem:[%s8663_s26 + $0x730] sm:$0xff] %v7395_v40  ;;  %v4121_v30 = vmax.f32 %v3359_v32, 0.0  ;;  %v3363_v39 = vadd.f32 %v3362_v63, %v8969_v52  ;;  %6430 = vst.msk [vmem:[%s8663_s26 + $0x6f8] sm:$0xff] %vm9847_vm1, %v7388_v3  ;;  %v4107_v17 = vmax.f32 %v3588_v28, 0.0  ;;  %v3590_v42 = vadd.f32 %v3589_v31, %v8958_v18 }
 0x400   : > { %v3364_v14 = vpop.f32.mrf.mxu0  ;;  %v3591_v49 = vpop.f32.mrf.mxu1 }
 0x401   : > { %v7403_v56 = vpack.c.bf16 %v4121_v30, %v4120_v7  ;;  %v3365_v57 = vadd.f32 %v3364_v14, %v8969_v52  ;;  %v7396_v53 = vpack.c.bf16 %v4107_v17, %v4106_v20  ;;  %v3592_v47 = vadd.f32 %v3591_v49, %v8958_v18 }
 0x402   : > { %v3366_v12 = vpop.f32.mrf.mxu0  ;;  %v3595_v24 = vpop.f32.mrf.mxu1  ;;  %v4136_v51 = vmax.f32 %v3363_v39, 0.0  ;;  %v4122_v41 = vmax.f32 %v3590_v42, 0.0 }
 0x403   : > { %6445 = vst [vmem:[%s8663_s26 + $0x770] sm:$0xff] %v7403_v56  ;;  %v4137_v11 = vmax.f32 %v3365_v57, 0.0  ;;  %v3367_v21 = vadd.f32 %v3366_v12, %v8981_v48  ;;  %6438 = vst.msk [vmem:[%s8663_s26 + $0x738] sm:$0xff] %vm9847_vm1, %v7396_v53  ;;  %v4123_v55 = vmax.f32 %v3592_v47, 0.0  ;;  %v3596_v8 = vadd.f32 %v3595_v24, %v8969_v52 }
 0x404   : > { %v3368_v44 = vpop.f32.mrf.mxu0  ;;  %v3597_v54 = vpop.f32.mrf.mxu1 }
 0x405   : > { %v7411_v61 = vpack.c.bf16 %v4137_v11, %v4136_v51  ;;  %v3369_v18 = vadd.f32 %v3368_v44, %v8981_v48  ;;  %v7404_v15 = vpack.c.bf16 %v4123_v55, %v4122_v41  ;;  %v3598_v19 = vadd.f32 %v3597_v54, %v8969_v52 }
 0x406   : > { %v3372_v2 = vpop.f32.mrf.mxu0  ;;  %v3599_v34 = vpop.f32.mrf.mxu1  ;;  %v4152_v4 = vmax.f32 %v3367_v21, 0.0  ;;  %v4138_v36 = vmax.f32 %v3596_v8, 0.0 }
 0x407   : > { %6453 = vst [vmem:[%s8663_s26 + $0x7b0] sm:$0xff] %v7411_v61  ;;  %v4153_v23 = vmax.f32 %v3369_v18, 0.0  ;;  %v3373_v45 = vadd.f32 %v3372_v2, %v8992_v60  ;;  %6446 = vst.msk [vmem:[%s8663_s26 + $0x778] sm:$0xff] %vm9847_vm1, %v7404_v15  ;;  %v4139_v0 = vmax.f32 %v3598_v19, 0.0  ;;  %v3600_v6 = vadd.f32 %v3599_v34, %v8981_v48 }
 0x408   : > { %v3374_v25 = vpop.f32.mrf.mxu0  ;;  %v3601_v43 = vpop.f32.mrf.mxu1 }
 0x409   : > { %v7419_v59 = vpack.c.bf16 %v4153_v23, %v4152_v4  ;;  %v3375_v52 = vadd.f32 %v3374_v25, %v8992_v60  ;;  %v7412_v50 = vpack.c.bf16 %v4139_v0, %v4138_v36  ;;  %v3602_v29 = vadd.f32 %v3601_v43, %v8981_v48 }
 0x40a   : > { %v3376_v16 = vpop.f32.mrf.mxu0  ;;  %v3605_v33 = vpop.f32.mrf.mxu1  ;;  %v4168_v10 = vmax.f32 %v3373_v45, 0.0  ;;  %v4154_v38 = vmax.f32 %v3600_v6, 0.0 }
 0x40b   : > { %6461 = vst [vmem:[%s8663_s26 + $0x7f0] sm:$0xff] %v7419_v59  ;;  %v4169_v1 = vmax.f32 %v3375_v52, 0.0  ;;  %v3377_v9 = vadd.f32 %v3376_v16, %v9011_v35  ;;  %6454 = vst.msk [vmem:[%s8663_s26 + $0x7b8] sm:$0xff] %vm9847_vm1, %v7412_v50  ;;  %v4155_v46 = vmax.f32 %v3602_v29, 0.0  ;;  %v3606_v13 = vadd.f32 %v3605_v33, %v8992_v60 }
 0x40c   : > { %v3378_v40 = vpop.f32.mrf.mxu0  ;;  %v3607_v32 = vpop.f32.mrf.mxu1 }
 0x40d   : > { %v7427_v3 = vpack.c.bf16 %v4169_v1, %v4168_v10  ;;  %v3379_v48 = vadd.f32 %v3378_v40, %v9011_v35  ;;  %v7420_v28 = vpack.c.bf16 %v4155_v46, %v4154_v38  ;;  %v3608_v63 = vadd.f32 %v3607_v32, %v8992_v60 }
 0x40e   : > { %v3382_v31 = vpop.f32.mrf.mxu0  ;;  %v3609_v7 = vpop.f32.mrf.mxu1  ;;  %v4184_v30 = vmax.f32 %v3377_v9, 0.0  ;;  %v4170_v17 = vmax.f32 %v3606_v13, 0.0 }
 0x40f   : > { %6469 = vst [vmem:[%s8663_s26 + $0x830] sm:$0xff] %v7427_v3  ;;  %v4185_v39 = vmax.f32 %v3379_v48, 0.0  ;;  %v3383_v20 = vadd.f32 %v3382_v31, %v9028_v5  ;;  %6462 = vst.msk [vmem:[%s8663_s26 + $0x7f8] sm:$0xff] %vm9847_vm1, %v7420_v28  ;;  %v4171_v42 = vmax.f32 %v3608_v63, 0.0  ;;  %v3610_v14 = vadd.f32 %v3609_v7, %v9011_v35 }
 0x410   : > { %v3384_v49 = vpop.f32.mrf.mxu0  ;;  %v3611_v56 = vpop.f32.mrf.mxu1 }
 0x411   : > { %v7435_v57 = vpack.c.bf16 %v4185_v39, %v4184_v30  ;;  %v3385_v60 = vadd.f32 %v3384_v49, %v9028_v5  ;;  %v7428_v53 = vpack.c.bf16 %v4171_v42, %v4170_v17  ;;  %v3612_v47 = vadd.f32 %v3611_v56, %v9011_v35 }
 0x412   : > { %v3386_v12 = vpop.f32.mrf.mxu0  ;;  %v3615_v24 = vpop.f32.mrf.mxu1  ;;  %v4200_v51 = vmax.f32 %v3383_v20, 0.0  ;;  %v4186_v41 = vmax.f32 %v3610_v14, 0.0 }
 0x413   : > { %6477 = vst [vmem:[%s8663_s26 + $0x870] sm:$0xff] %v7435_v57  ;;  %v4201_v11 = vmax.f32 %v3385_v60, 0.0  ;;  %v3387_v21 = vadd.f32 %v3386_v12, %v9041_v62  ;;  %6470 = vst.msk [vmem:[%s8663_s26 + $0x838] sm:$0xff] %vm9847_vm1, %v7428_v53  ;;  %v4187_v55 = vmax.f32 %v3612_v47, 0.0  ;;  %v3616_v8 = vadd.f32 %v3615_v24, %v9028_v5 }
 0x414   : > { %v3388_v44 = vpop.f32.mrf.mxu0  ;;  %v3617_v54 = vpop.f32.mrf.mxu1 }
 0x415   : > { %v7443_v61 = vpack.c.bf16 %v4201_v11, %v4200_v51  ;;  %v3389_v35 = vadd.f32 %v3388_v44, %v9041_v62  ;;  %v7436_v18 = vpack.c.bf16 %v4187_v55, %v4186_v41  ;;  %v3618_v15 = vadd.f32 %v3617_v54, %v9028_v5 }
 0x416   : > { %v3392_v19 = vpop.f32.mrf.mxu0  ;;  %v3619_v2 = vpop.f32.mrf.mxu1  ;;  %v4216_v34 = vmax.f32 %v3387_v21, 0.0  ;;  %v4202_v45 = vmax.f32 %v3616_v8, 0.0 }
 0x417   : > { %6485 = vst [vmem:[%s8663_s26 + $0x8b0] sm:$0xff] %v7443_v61  ;;  %v4217_v4 = vmax.f32 %v3389_v35, 0.0  ;;  %v3393_v23 = vadd.f32 %v3392_v19, %v9052_v37  ;;  %6478 = vst.msk [vmem:[%s8663_s26 + $0x878] sm:$0xff] %vm9847_vm1, %v7436_v18  ;;  %v4203_v36 = vmax.f32 %v3618_v15, 0.0  ;;  %v3620_v0 = vadd.f32 %v3619_v2, %v9041_v62 }
 0x418   : > { %v3394_v6 = vpop.f32.mrf.mxu0  ;;  %v3621_v25 = vpop.f32.mrf.mxu1 }
 0x419   : > { %v7451_v43 = vpack.c.bf16 %v4217_v4, %v4216_v34  ;;  %v3395_v5 = vadd.f32 %v3394_v6, %v9052_v37  ;;  %v7444_v59 = vpack.c.bf16 %v4203_v36, %v4202_v45  ;;  %v3622_v52 = vadd.f32 %v3621_v25, %v9041_v62 }
 0x41a   : > { %v3396_v50 = vpop.f32.mrf.mxu0  ;;  %v3625_v29 = vpop.f32.mrf.mxu1  ;;  %v4232_v16 = vmax.f32 %v3393_v23, 0.0  ;;  %v4218_v1 = vmax.f32 %v3620_v0, 0.0 }
 0x41b   : > { %6493 = vst [vmem:[%s8663_s26 + $0x8f0] sm:$0xff] %v7451_v43  ;;  %v4233_v33 = vmax.f32 %v3395_v5, 0.0  ;;  %v3397_v10 = vadd.f32 %v3396_v50, %v9064_v58  ;;  %6486 = vst.msk [vmem:[%s8663_s26 + $0x8b8] sm:$0xff] %vm9847_vm1, %v7444_v59  ;;  %v4219_v9 = vmax.f32 %v3622_v52, 0.0  ;;  %v3626_v38 = vadd.f32 %v3625_v29, %v9052_v37 }
 0x41c   : > { %v3398_v46 = vpop.f32.mrf.mxu0  ;;  %v3627_v13 = vpop.f32.mrf.mxu1 }
 0x41d   : > { %v7459_v40 = vpack.c.bf16 %v4233_v33, %v4232_v16  ;;  %v3399_v62 = vadd.f32 %v3398_v46, %v9064_v58  ;;  %v7452_v32 = vpack.c.bf16 %v4219_v9, %v4218_v1  ;;  %v3628_v3 = vadd.f32 %v3627_v13, %v9052_v37 }
 0x41e   : > { %v3402_v48 = vpop.f32.mrf.mxu0  ;;  %v3629_v28 = vpop.f32.mrf.mxu1  ;;  %v4248_v63 = vmax.f32 %v3397_v10, 0.0  ;;  %v4234_v30 = vmax.f32 %v3626_v38, 0.0 }
 0x41f   : > { %6501 = vst [vmem:[%s8663_s26 + $0x930] sm:$0xff] %v7459_v40  ;;  %v4249_v31 = vmax.f32 %v3399_v62, 0.0  ;;  %v3403_v7 = vadd.f32 %v3402_v48, %v9075_v27  ;;  %6494 = vst.msk [vmem:[%s8663_s26 + $0x8f8] sm:$0xff] %vm9847_vm1, %v7452_v32  ;;  %v4235_v39 = vmax.f32 %v3628_v3, 0.0  ;;  %v3630_v20 = vadd.f32 %v3629_v28, %v9064_v58 }
 0x420   : > { %v3404_v17 = vpop.f32.mrf.mxu0  ;;  %v3631_v42 = vpop.f32.mrf.mxu1 }
 0x421   : > { %v7467_v14 = vpack.c.bf16 %v4249_v31, %v4248_v63  ;;  %v3405_v37 = vadd.f32 %v3404_v17, %v9075_v27  ;;  %v7460_v49 = vpack.c.bf16 %v4235_v39, %v4234_v30  ;;  %v3632_v56 = vadd.f32 %v3631_v42, %v9064_v58 }
 0x422   : > { %v3406_v57 = vpop.f32.mrf.mxu0  ;;  %v3635_v60 = vpop.f32.mrf.mxu1  ;;  %v4264_v53 = vmax.f32 %v3403_v7, 0.0  ;;  %v4250_v24 = vmax.f32 %v3630_v20, 0.0 }
 0x423   : > { %6509 = vst [vmem:[%s8663_s26 + $0x970] sm:$0xff] %v7467_v14  ;;  %v4265_v47 = vmax.f32 %v3405_v37, 0.0  ;;  %v3407_v12 = vadd.f32 %v3406_v57, %v9089_v22  ;;  %6502 = vst.msk [vmem:[%s8663_s26 + $0x938] sm:$0xff] %vm9847_vm1, %v7460_v49  ;;  %v4251_v51 = vmax.f32 %v3632_v56, 0.0  ;;  %v3636_v11 = vadd.f32 %v3635_v60, %v9075_v27 }
 0x424   : > { %v3408_v21 = vpop.f32.mrf.mxu0  ;;  %v3637_v41 = vpop.f32.mrf.mxu1 }
 0x425   : > { %v7475_v58 = vpack.c.bf16 %v4265_v47, %v4264_v53  ;;  %v3409_v55 = vadd.f32 %v3408_v21, %v9089_v22  ;;  %v7468_v8 = vpack.c.bf16 %v4251_v51, %v4250_v24  ;;  %v3638_v44 = vadd.f32 %v3637_v41, %v9075_v27 }
 0x426   : > { %v3639_v54 = vpop.f32.mrf.mxu1  ;;  %v4280_v61 = vmax.f32 %v3407_v12, 0.0  ;;  %v4266_v15 = vmax.f32 %v3636_v11, 0.0 }
 0x427   : > { %6517 = vst [vmem:[%s8663_s26 + $0x9b0] sm:$0xff] %v7475_v58  ;;  %v4281_v35 = vmax.f32 %v3409_v55, 0.0  ;;  %v3640_v18 = vadd.f32 %v3639_v54, %v9089_v22  ;;  %6510 = vst.msk [vmem:[%s8663_s26 + $0x978] sm:$0xff] %vm9847_vm1, %v7468_v8  ;;  %v4267_v19 = vmax.f32 %v3638_v44, 0.0 }
 0x428   : > { %v3641_v2 = vpop.f32.mrf.mxu1 }
 0x429   : > { %v7483_v34 = vpack.c.bf16 %v4281_v35, %v4280_v61  ;;  %v3642_v27 = vadd.f32 %v3641_v2, %v9089_v22  ;;  %v7476_v4 = vpack.c.bf16 %v4267_v19, %v4266_v15  ;;  %v4282_v23 = vmax.f32 %v3640_v18, 0.0 }
 0x42b   : > { %6525 = vst [vmem:[%s8663_s26 + $0x9f0] sm:$0xff] %v7483_v34  ;;  %v4283_v45 = vmax.f32 %v3642_v27, 0.0  ;;  %6518 = vst.msk [vmem:[%s8663_s26 + $0x9b8] sm:$0xff] %vm9847_vm1, %v7476_v4 }
 0x42d   : > { %v7484_v36 = vpack.c.bf16 %v4283_v45, %v4282_v23 }
 0x42f   : > { %6526 = vst.msk [vmem:[%s8663_s26 + $0x9f8] sm:$0xff] %vm9847_vm1, %v7484_v36 }
 0x430   : > { %7657 = shalt.err (!%p7654_p10)
}
 0x431   : > { %s7658_s26 = scalar_lea.hbm %s10164_s17, 40960  ;;  %s7662_s5 = scalar_lea.hbm %s10215_s3, 81920 }
 0x432   : > { %p7659_p2 = scmp.ne.s32.totalorder %s10164_s17, %s7658_s26  ;;  %p7663_p7 = scmp.lt.s32.totalorder %s10164_s17, %s10215_s3 }
 0x433   : > { %p7664_p0 = scmp.lt.s32.totalorder %s7662_s5, %s7658_s26 }
 0x434   : > { %p7660_p4 = pnand %p7659_p2, %p10232_p12 }
 0x435   : > { %p7665_p6 = por %p7664_p0, %p7663_p7 }
 0x436   : > { %p7661_p9 = pneg %p7660_p4 }
 0x438   : > { %p7666_p11 = pnand %p7665_p6, %p7661_p9 }
 0x43a   : > { %7669 = shalt.err (!%p7666_p11)
}
 0x43b   : > { %s7721_s4 = smov 1024   ;;  %s7722_s6 = smov 64  }
 0x43c   : > { %7489 = dma.vmem_to_hbm [thread:$0]  (%p10232_p12), %s10166_s8, 40960, %s10164_s17, %s6528_s16, %s7721_s4, %s7721_s4, %s7722_s6  }
 0x43d PF: > { %s6556_s7 = sand.u32 1, %s7696_s12   ;;  %p10233_p13 = scmp.ne.s32.totalorder %s10221_s25, 0 }
 0x43e   : > { %p10234_p1 = scmp.ge.s32.totalorder %s7708_s15, 2  ;;  %s6557_s10 = scalar_lea.sflag [#allocation5], %s6556_s7 }
 0x440   : > { %p7496_p3 = pnand %p10234_p1, %p10233_p13 }
 0x442   : > { %p7497_p5 = pneg %p7496_p3 }
 0x444   : > { %7691 = dma.done.wait (%p7497_p5), %s6557_s10, 40960  }
 0x445   : > { %7693 = vsyncadd (%p7497_p5), %s6557_s10, 4294926336  ;;  %p16_p8 = scmp.ge.s32.totalorder %s7768_s18, 4   ;;  %s10235_s12 = smov %s7700_s13 }
 0x446   : > { %s10236_s13 = smov %s7704_s14  ;;  %s10237_s14 = smov %s7780_s21 }
 0x447   : > { %s10238_s15 = smov %s7768_s18  ;;  %18 = sbr.rel (!%p16_p8) target bundleno = 5 (0x5), region = 77 }
 0x44c   :  { %6562 = vsyncpa [#allocation4], 1 }
 0x44d   :  { %6564 = vsyncpa [#allocation4 + $0x1], 1 }
 0x44e   :  { %6565 = vsyncpa [#allocation5], 1 }
 0x44f   :  { %6567 = vsyncpa [#allocation5 + $0x1], 1 }

</bundles_post_ra>
